<compile_context>
chip_gen: v7x
topology: tpu7x:2x2x1
jax: 0.10.0
libtpu: 0.0.40
codegen_flags: <defaults>
</compile_context>

<pallas_src>
import jax
import jax.numpy as jnp
import numpy as np
from jax import lax
from jax.experimental import pallas as pl
from jax.experimental.pallas import tpu as pltpu

_EPS = 1e-5


# ----------------------------------------------------------------------------
# Kernels
# ----------------------------------------------------------------------------

def _conv1_kernel(x_ref, w1_ref, y1_ref, ps_ref):
    # x_ref: (TM, Cin) f32   w1_ref: (Cin, P) bf16
    # y1_ref: (TM, P) bf16   ps_ref: (1, 2, P) f32
    y = jnp.dot(x_ref[...].astype(jnp.bfloat16), w1_ref[...],
                preferred_element_type=jnp.float32)                  # (TM, P) f32
    y1_ref[...] = y.astype(y1_ref.dtype)
    s = jnp.sum(y, axis=0, keepdims=True)
    sq = jnp.sum(y * y, axis=0, keepdims=True)
    ps_ref[...] = jnp.concatenate([s, sq], axis=0)[None]


def _conv2_kernel(y1_ref, s1_ref, b1_ref, w2_ref, y2_ref, ps_ref, pad_ref):
    # y1_ref: (1, H, W, P) bf16   s1/b1: (1, P) f32 (folded BN1 scale/shift)
    # w2_ref: (9P, P) bf16        y2_ref: (1, HW, P) bf16   ps_ref: (1, 2, P) f32
    # pad_ref: (H+2, W+2, P) f32 VMEM scratch
    _, H, W, P = y1_ref.shape
    s1 = s1_ref[...].reshape(1, 1, P)
    b1 = b1_ref[...].reshape(1, 1, P)
    z = jnp.maximum(y1_ref[0].astype(jnp.float32) * s1 + b1, 0.0)    # bn1 + relu

    # Zero only the 1-wide halo; the interior is fully overwritten every step.
    # (Zero-once was rejected: the batch axis is "parallel" and may be sharded
    # across v7x cores, so program_id==0 is not "first step on this core".)
    pad_ref[0:1, :, :] = jnp.zeros((1, W + 2, P), jnp.float32)
    pad_ref[H + 1:H + 2, :, :] = jnp.zeros((1, W + 2, P), jnp.float32)
    pad_ref[:, 0:1, :] = jnp.zeros((H + 2, 1, P), jnp.float32)
    pad_ref[:, W + 1:W + 2, :] = jnp.zeros((H + 2, 1, P), jnp.float32)
    pad_ref[1:H + 1, 1:W + 1, :] = z

    # im2col in bf16: one (HW, 9P) @ (9P, P) matmul instead of nine skinny ones.
    taps = [pad_ref[dy:dy + H, dx:dx + W, :].astype(jnp.bfloat16)
            for dy in range(3) for dx in range(3)]
    patches = jnp.concatenate(taps, axis=-1).reshape(H * W, 9 * P)   # bf16 slab
    y = jnp.dot(patches, w2_ref[...], preferred_element_type=jnp.float32)  # (HW, P)
    y2_ref[...] = y[None].astype(y2_ref.dtype)
    s = jnp.sum(y, axis=0, keepdims=True)
    sq = jnp.sum(y * y, axis=0, keepdims=True)
    ps_ref[...] = jnp.concatenate([s, sq], axis=0)[None]


def _conv3_kernel(y2_ref, s2_ref, b2_ref, w3_ref, y3_ref, ps_ref):
    # y2_ref: (TM, P) bf16   w3_ref: (P, 4P) bf16
    # y3_ref: (TM, 4P) bf16  ps_ref: (1, 2, 4P) f32
    P = y2_ref.shape[-1]
    s2 = s2_ref[...].reshape(1, P)
    b2 = b2_ref[...].reshape(1, P)
    z = jnp.maximum(y2_ref[...].astype(jnp.float32) * s2 + b2, 0.0)  # bn2 + relu
    y = jnp.dot(z.astype(jnp.bfloat16), w3_ref[...],
                preferred_element_type=jnp.float32)                  # (TM, 4P) f32
    y3_ref[...] = y.astype(y3_ref.dtype)
    s = jnp.sum(y, axis=0, keepdims=True)
    sq = jnp.sum(y * y, axis=0, keepdims=True)
    ps_ref[...] = jnp.concatenate([s, sq], axis=0)[None]


def _residual_kernel(y3_ref, s3_ref, b3_ref, x_ref, o_ref):
    # bn3 (folded) + residual add + relu.  y3: (TM, C4) bf16, x/o: (TM, C4) f32.
    C4 = y3_ref.shape[-1]
    s3 = s3_ref[...].reshape(1, C4)
    b3 = b3_ref[...].reshape(1, C4)
    o_ref[...] = jnp.maximum(
        y3_ref[...].astype(jnp.float32) * s3 + b3 + x_ref[...], 0.0
    ).astype(o_ref.dtype)


# ----------------------------------------------------------------------------
# Host-side glue
# ----------------------------------------------------------------------------

def _fold_bn(psum, count, gamma, beta):
    """Finalize per-channel batch stats and fold BN into (scale, shift)."""
    tot = jnp.sum(psum.astype(jnp.float32).reshape(-1, 2, psum.shape[-1]), axis=0)
    mean = tot[0] / count
    var = jnp.maximum(tot[1] / count - mean * mean, 0.0)   # biased variance
    scale = gamma.reshape(-1) * lax.rsqrt(var + _EPS)
    shift = beta.reshape(-1) - mean * scale
    return scale.reshape(1, -1), shift.reshape(1, -1)


def _vmem_cap_bytes():
    try:
        return int(pltpu.get_tpu_info().vmem_capacity_bytes)
    except Exception:
        return 64 * 2 ** 20       # conservative fallback: v7x per-core VMEM


def _pick_row_tile(rows):
    """Largest power-of-two tile (<=1024, mult. of 8) dividing rows with >=2 steps."""
    for tm in (1024, 512, 256, 128, 64, 32, 16, 8):
        if rows % tm == 0 and rows // tm >= 2:
            return tm
    return rows                   # single full block (still a valid BlockSpec)


def bottleneck_pallas(x_nhwc, w1, g1, b1, w2, g2, b2, w3, g3, b3):
    N, H, W, Cin = x_nhwc.shape
    P = w1.shape[1]
    C4 = 4 * P
    # TODO(synk): stride>1 / downsample path not implemented.
    assert Cin == C4, "downsample=None & stride=1 requires inplanes == planes*4"
    HW = H * W
    NHW = N * HW
    count = float(NHW)

    TM = _pick_row_tile(NHW)      # rows per grid step for the pointwise stages
    T = NHW // TM

    w1b = w1.astype(jnp.bfloat16)                        # (Cin, P)
    w2b = w2.reshape(9 * P, P).astype(jnp.bfloat16)      # HWIO (3,3,P,P) -> (9P, P)
    w3b = w3.astype(jnp.bfloat16)                        # (P, 4P)

    x_flat = x_nhwc.reshape(NHW, Cin)                    # free (contiguous) reshape

    cap = _vmem_cap_bytes()
    ceiling = max((cap * 3) // 4, 32 * 2 ** 20)          # ~48 MiB v7x, ~96 MiB v5e/v6e

    def cparams(per_step_bytes, semantics):
        limit = int(min(max(int(1.5 * per_step_bytes), 32 * 2 ** 20), ceiling))
        return pltpu.CompilerParams(dimension_semantics=semantics,
                                    vmem_limit_bytes=limit)

    def row_spec(C):
        return pl.BlockSpec((TM, C), lambda t: (t, 0))

    def vec_spec(C):
        return pl.BlockSpec((1, C), lambda t: (0, 0))

    def ps_spec(C):
        return pl.BlockSpec((1, 2, C), lambda t: (t, 0, 0))

    # ---- stage 1: conv1 (1x1) + partial BN1 stats (grid over flattened rows) ----
    s1_bytes = (2 * TM * (4 * Cin + 2 * P)          # in/out blocks, double-buffered
                + TM * (2 * Cin + 4 * P)            # bf16 cast + f32 result temps
                + 2 * Cin * P)                      # resident weights
    y1, ps1 = pl.pallas_call(
        _conv1_kernel,
        grid=(T,),
        in_specs=[row_spec(Cin), pl.BlockSpec((Cin, P), lambda t: (0, 0))],
        out_specs=(row_spec(P), ps_spec(P)),
        out_shape=(jax.ShapeDtypeStruct((NHW, P), jnp.bfloat16),
                   jax.ShapeDtypeStruct((T, 2, P), jnp.float32)),
        compiler_params=cparams(s1_bytes, ("parallel",)),
    )(x_flat, w1b)
    s1, sh1 = _fold_bn(ps1, count, g1, b1)

    # ---- stage 2: bn1+relu -> conv2 (3x3, bf16 im2col) + partial BN2 stats ----
    s2_bytes = (2 * 2 * (HW * P * 2)                # y1 in + y2 out blocks (bf16, DB)
                + (H + 2) * (W + 2) * P * 4         # f32 pad scratch
                + HW * P * 4                        # f32 bn1+relu image
                + HW * 9 * P * 2                    # bf16 im2col slab
                + HW * P * 4                        # f32 matmul result
                + 9 * P * P * 2)                    # resident weights
    y2, ps2 = pl.pallas_call(
        _conv2_kernel,
        grid=(N,),
        in_specs=[pl.BlockSpec((1, H, W, P), lambda n: (n, 0, 0, 0)),
                  vec_spec(P), vec_spec(P),
                  pl.BlockSpec((9 * P, P), lambda n: (0, 0))],
        out_specs=(pl.BlockSpec((1, HW, P), lambda n: (n, 0, 0)), ps_spec(P)),
        out_shape=(jax.ShapeDtypeStruct((N, HW, P), jnp.bfloat16),
                   jax.ShapeDtypeStruct((N, 2, P), jnp.float32)),
        scratch_shapes=[pltpu.VMEM((H + 2, W + 2, P), jnp.float32)],
        compiler_params=cparams(s2_bytes, ("parallel",)),
    )(y1.reshape(N, H, W, P), s1, sh1, w2b)
    s2, sh2 = _fold_bn(ps2, count, g2, b2)

    # ---- stage 3: bn2+relu -> conv3 (1x1) + partial BN3 stats ----
    s3_bytes = (2 * TM * (2 * P + 2 * C4)
                + TM * (4 * P + 4 * C4)
                + 2 * P * C4)
    y3, ps3 = pl.pallas_call(
        _conv3_kernel,
        grid=(T,),
        in_specs=[row_spec(P), vec_spec(P), vec_spec(P),
                  pl.BlockSpec((P, C4), lambda t: (0, 0))],
        out_specs=(row_spec(C4), ps_spec(C4)),
        out_shape=(jax.ShapeDtypeStruct((NHW, C4), jnp.bfloat16),
                   jax.ShapeDtypeStruct((T, 2, C4), jnp.float32)),
        compiler_params=cparams(s3_bytes, ("parallel",)),
    )(y2.reshape(NHW, P), s2, sh2, w3b)
    s3, sh3 = _fold_bn(ps3, count, g3, b3)

    # ---- stage 4: bn3 (folded) + residual add + relu ----
    s4_bytes = 2 * TM * (2 * C4 + 4 * C4 + 4 * C4) + TM * 4 * C4
    out = pl.pallas_call(
        _residual_kernel,
        grid=(T,),
        in_specs=[row_spec(C4), vec_spec(C4), vec_spec(C4), row_spec(C4)],
        out_specs=row_spec(C4),
        out_shape=jax.ShapeDtypeStruct((NHW, C4), jnp.float32),
        compiler_params=cparams(s4_bytes, ("parallel",)),
    )(y3, s3, sh3, x_flat)
    return out.reshape(N, H, W, C4)


def bottleneck_ref(x_nhwc, w1, g1, b1, w2, g2, b2, w3, g3, b3):
    """Pure-JAX f32 reference (lax convs, NHWC) with the same BN semantics."""
    def bn(y, g, b):
        m = jnp.mean(y, axis=(0, 1, 2), keepdims=True)
        v = jnp.mean((y - m) ** 2, axis=(0, 1, 2), keepdims=True)
        return (y - m) / jnp.sqrt(v + _EPS) * g.reshape(1, 1, 1, -1) + b.reshape(1, 1, 1, -1)

    dn = ('NHWC', 'HWIO', 'NHWC')
    Cin = x_nhwc.shape[-1]
    P = w1.shape[1]
    y = lax.conv_general_dilated(x_nhwc, w1.reshape(1, 1, Cin, P), (1, 1), 'VALID',
                                 dimension_numbers=dn)
    y = jax.nn.relu(bn(y, g1, b1))
    y = lax.conv_general_dilated(y, w2, (1, 1), 'SAME', dimension_numbers=dn)
    y = jax.nn.relu(bn(y, g2, b2))
    y = lax.conv_general_dilated(y, w3.reshape(1, 1, P, 4 * P), (1, 1), 'VALID',
                                 dimension_numbers=dn)
    y = bn(y, g3, b3)
    return jax.nn.relu(y + x_nhwc)


if __name__ == "__main__":
    key = jax.random.PRNGKey(0)
    N, Cin, H, W = 2, 16, 16, 16      # PyTorch-style NCHW sizes
    planes = 4                        # output channels = planes * 4 = 16 = Cin

    ks = jax.random.split(key, 10)
    x_nchw = jax.random.normal(ks[0], (N, Cin, H, W), jnp.float32)

    # Deterministic synthetic parameters (shapes match the module's __init__).
    w1 = 0.1 * jax.random.normal(ks[1], (Cin, planes), jnp.float32)            # conv1 1x1
    w2 = 0.1 * jax.random.normal(ks[2], (3, 3, planes, planes), jnp.float32)   # conv2 3x3 (HWIO)
    w3 = 0.1 * jax.random.normal(ks[3], (planes, 4 * planes), jnp.float32)     # conv3 1x1
    g1 = 1.0 + 0.1 * jax.random.normal(ks[4], (1, planes), jnp.float32)
    b1 = 0.1 * jax.random.normal(ks[5], (1, planes), jnp.float32)
    g2 = 1.0 + 0.1 * jax.random.normal(ks[6], (1, planes), jnp.float32)
    b2 = 0.1 * jax.random.normal(ks[7], (1, planes), jnp.float32)
    g3 = 1.0 + 0.1 * jax.random.normal(ks[8], (1, 4 * planes), jnp.float32)
    b3 = 0.1 * jax.random.normal(ks[9], (1, 4 * planes), jnp.float32)

    # NCHW (PyTorch) -> NHWC (kernel layout)
    x_nhwc = jnp.transpose(x_nchw, (0, 2, 3, 1))

    run = jax.jit(bottleneck_pallas)
    out = run(x_nhwc, w1, g1, b1, w2, g2, b2, w3, g3, b3)
    out = jax.block_until_ready(out)

    ref = bottleneck_ref(x_nhwc, w1, g1, b1, w2, g2, b2, w3, g3, b3)
    # bf16 intermediates + bf16 MXU operands (f32 accumulation) vs all-f32 reference.
    np.testing.assert_allclose(np.asarray(out), np.asarray(ref), rtol=6e-2, atol=6e-2)

    print("KERNEL_OK")
</pallas_src>

<mosaic_0001>
module attributes {stable_mosaic.version = 11 : i64} {
  func.func @_conv2_kernel(%arg0: i32, %arg1: memref<1x16x16x4xbf16, #tpu.memory_space<vmem>>, %arg2: memref<1x4xf32, #tpu.memory_space<vmem>>, %arg3: memref<1x4xf32, #tpu.memory_space<vmem>>, %arg4: memref<36x4xbf16, #tpu.memory_space<vmem>>, %arg5: memref<1x256x4xbf16, #tpu.memory_space<vmem>>, %arg6: memref<1x2x4xf32, #tpu.memory_space<vmem>>, %arg7: memref<18x18x4xf32, #tpu.memory_space<vmem>>) attributes {dimension_semantics = [#tpu.dimension_semantics<parallel>], iteration_bounds = array<i64: 2>, scalar_prefetch = 0 : i64, scratch_operands = 1 : i64, tpu.core_type = #tpu.core_type<tc>, window_params = [{transform_indices = @transform_0, window_bounds = array<i64: 1, 16, 16, 4>}, {pipeline_mode = #tpu.pipeline_mode<synchronous>, transform_indices = @transform_1, window_bounds = array<i64: 1, 4>}, {pipeline_mode = #tpu.pipeline_mode<synchronous>, transform_indices = @transform_2, window_bounds = array<i64: 1, 4>}, {pipeline_mode = #tpu.pipeline_mode<synchronous>, transform_indices = @transform_3, window_bounds = array<i64: 36, 4>}, {transform_indices = @transform_4, window_bounds = array<i64: 1, 256, 4>}, {transform_indices = @transform_5, window_bounds = array<i64: 1, 2, 4>}]} {
    %c0 = arith.constant 0 : index
    %c0_0 = arith.constant 0 : index
    %0 = vector.load %arg2[%c0, %c0_0] : memref<1x4xf32, #tpu.memory_space<vmem>>, vector<1x4xf32>
    %1 = vector.shape_cast %0 : vector<1x4xf32> to vector<1x1x4xf32>
    %c0_1 = arith.constant 0 : index
    %c0_2 = arith.constant 0 : index
    %2 = vector.load %arg3[%c0_1, %c0_2] : memref<1x4xf32, #tpu.memory_space<vmem>>, vector<1x4xf32>
    %3 = vector.shape_cast %2 : vector<1x4xf32> to vector<1x1x4xf32>
    %c0_3 = arith.constant 0 : index
    %c0_4 = arith.constant 0 : index
    %c0_5 = arith.constant 0 : index
    %c0_6 = arith.constant 0 : index
    %4 = vector.load %arg1[%c0_3, %c0_4, %c0_5, %c0_6] : memref<1x16x16x4xbf16, #tpu.memory_space<vmem>>, vector<1x16x16x4xbf16>
    %5 = vector.shape_cast %4 : vector<1x16x16x4xbf16> to vector<16x16x4xbf16>
    %6 = arith.extf %5 : vector<16x16x4xbf16> to vector<16x16x4xf32>
    %7 = vector.broadcast %1 : vector<1x1x4xf32> to vector<16x16x4xf32>
    %8 = arith.mulf %6, %7 : vector<16x16x4xf32>
    %9 = vector.broadcast %3 : vector<1x1x4xf32> to vector<16x16x4xf32>
    %10 = arith.addf %8, %9 : vector<16x16x4xf32>
    %cst = arith.constant 0.000000e+00 : f32
    %11 = vector.broadcast %cst : f32 to vector<16x16x4xf32>
    %12 = arith.maximumf %10, %11 : vector<16x16x4xf32>
    %cst_7 = arith.constant 0.000000e+00 : f32
    %13 = vector.broadcast %cst_7 : f32 to vector<1x18x4xf32>
    %c0_8 = arith.constant 0 : index
    %c0_9 = arith.constant 0 : index
    %c0_10 = arith.constant 0 : index
    %14 = vector.load %arg7[%c0_8, %c0_9, %c0_10] : memref<18x18x4xf32, #tpu.memory_space<vmem>>, vector<1x18x4xf32>
    tpu.vector_store %arg7[%c0_8, %c0_9, %c0_10], %13 {strides = array<i32>} : memref<18x18x4xf32, #tpu.memory_space<vmem>>, vector<1x18x4xf32>,
    %cst_11 = arith.constant 0.000000e+00 : f32
    %15 = vector.broadcast %cst_11 : f32 to vector<1x18x4xf32>
    %c17 = arith.constant 17 : index
    %c0_12 = arith.constant 0 : index
    %c0_13 = arith.constant 0 : index
    %16 = vector.load %arg7[%c17, %c0_12, %c0_13] : memref<18x18x4xf32, #tpu.memory_space<vmem>>, vector<1x18x4xf32>
    tpu.vector_store %arg7[%c17, %c0_12, %c0_13], %15 {strides = array<i32>} : memref<18x18x4xf32, #tpu.memory_space<vmem>>, vector<1x18x4xf32>,
    %cst_14 = arith.constant 0.000000e+00 : f32
    %17 = vector.broadcast %cst_14 : f32 to vector<18x1x4xf32>
    %c0_15 = arith.constant 0 : index
    %c0_16 = arith.constant 0 : index
    %c0_17 = arith.constant 0 : index
    %18 = vector.load %arg7[%c0_15, %c0_16, %c0_17] : memref<18x18x4xf32, #tpu.memory_space<vmem>>, vector<18x1x4xf32>
    tpu.vector_store %arg7[%c0_15, %c0_16, %c0_17], %17 {strides = array<i32>} : memref<18x18x4xf32, #tpu.memory_space<vmem>>, vector<18x1x4xf32>,
    %cst_18 = arith.constant 0.000000e+00 : f32
    %19 = vector.broadcast %cst_18 : f32 to vector<18x1x4xf32>
    %c0_19 = arith.constant 0 : index
    %c17_20 = arith.constant 17 : index
    %c0_21 = arith.constant 0 : index
    %20 = vector.load %arg7[%c0_19, %c17_20, %c0_21] : memref<18x18x4xf32, #tpu.memory_space<vmem>>, vector<18x1x4xf32>
    tpu.vector_store %arg7[%c0_19, %c17_20, %c0_21], %19 {strides = array<i32>} : memref<18x18x4xf32, #tpu.memory_space<vmem>>, vector<18x1x4xf32>,
    %c1 = arith.constant 1 : index
    %c1_22 = arith.constant 1 : index
    %c0_23 = arith.constant 0 : index
    %21 = vector.load %arg7[%c1, %c1_22, %c0_23] : memref<18x18x4xf32, #tpu.memory_space<vmem>>, vector<16x16x4xf32>
    tpu.vector_store %arg7[%c1, %c1_22, %c0_23], %12 {strides = array<i32>} : memref<18x18x4xf32, #tpu.memory_space<vmem>>, vector<16x16x4xf32>,
    %c0_24 = arith.constant 0 : index
    %c0_25 = arith.constant 0 : index
    %c0_26 = arith.constant 0 : index
    %22 = vector.load %arg7[%c0_24, %c0_25, %c0_26] : memref<18x18x4xf32, #tpu.memory_space<vmem>>, vector<16x16x4xf32>
    %23 = arith.truncf %22 : vector<16x16x4xf32> to vector<16x16x4xbf16>
    %c0_27 = arith.constant 0 : index
    %c1_28 = arith.constant 1 : index
    %c0_29 = arith.constant 0 : index
    %24 = vector.load %arg7[%c0_27, %c1_28, %c0_29] : memref<18x18x4xf32, #tpu.memory_space<vmem>>, vector<16x16x4xf32>
    %25 = arith.truncf %24 : vector<16x16x4xf32> to vector<16x16x4xbf16>
    %c0_30 = arith.constant 0 : index
    %c2 = arith.constant 2 : index
    %c0_31 = arith.constant 0 : index
    %26 = vector.load %arg7[%c0_30, %c2, %c0_31] : memref<18x18x4xf32, #tpu.memory_space<vmem>>, vector<16x16x4xf32>
    %27 = arith.truncf %26 : vector<16x16x4xf32> to vector<16x16x4xbf16>
    %c1_32 = arith.constant 1 : index
    %c0_33 = arith.constant 0 : index
    %c0_34 = arith.constant 0 : index
    %28 = vector.load %arg7[%c1_32, %c0_33, %c0_34] : memref<18x18x4xf32, #tpu.memory_space<vmem>>, vector<16x16x4xf32>
    %29 = arith.truncf %28 : vector<16x16x4xf32> to vector<16x16x4xbf16>
    %c1_35 = arith.constant 1 : index
    %c1_36 = arith.constant 1 : index
    %c0_37 = arith.constant 0 : index
    %30 = vector.load %arg7[%c1_35, %c1_36, %c0_37] : memref<18x18x4xf32, #tpu.memory_space<vmem>>, vector<16x16x4xf32>
    %31 = arith.truncf %30 : vector<16x16x4xf32> to vector<16x16x4xbf16>
    %c1_38 = arith.constant 1 : index
    %c2_39 = arith.constant 2 : index
    %c0_40 = arith.constant 0 : index
    %32 = vector.load %arg7[%c1_38, %c2_39, %c0_40] : memref<18x18x4xf32, #tpu.memory_space<vmem>>, vector<16x16x4xf32>
    %33 = arith.truncf %32 : vector<16x16x4xf32> to vector<16x16x4xbf16>
    %c2_41 = arith.constant 2 : index
    %c0_42 = arith.constant 0 : index
    %c0_43 = arith.constant 0 : index
    %34 = vector.load %arg7[%c2_41, %c0_42, %c0_43] : memref<18x18x4xf32, #tpu.memory_space<vmem>>, vector<16x16x4xf32>
    %35 = arith.truncf %34 : vector<16x16x4xf32> to vector<16x16x4xbf16>
    %c2_44 = arith.constant 2 : index
    %c1_45 = arith.constant 1 : index
    %c0_46 = arith.constant 0 : index
    %36 = vector.load %arg7[%c2_44, %c1_45, %c0_46] : memref<18x18x4xf32, #tpu.memory_space<vmem>>, vector<16x16x4xf32>
    %37 = arith.truncf %36 : vector<16x16x4xf32> to vector<16x16x4xbf16>
    %c2_47 = arith.constant 2 : index
    %c2_48 = arith.constant 2 : index
    %c0_49 = arith.constant 0 : index
    %38 = vector.load %arg7[%c2_47, %c2_48, %c0_49] : memref<18x18x4xf32, #tpu.memory_space<vmem>>, vector<16x16x4xf32>
    %39 = arith.truncf %38 : vector<16x16x4xf32> to vector<16x16x4xbf16>
    %40 = tpu.concatenate %23, %25, %27, %29, %31, %33, %35, %37, %39 in 2 : vector<16x16x4xbf16>, vector<16x16x4xbf16>, vector<16x16x4xbf16>, vector<16x16x4xbf16>, vector<16x16x4xbf16>, vector<16x16x4xbf16>, vector<16x16x4xbf16>, vector<16x16x4xbf16>, vector<16x16x4xbf16> -> vector<16x16x36xbf16>
    %41 = vector.shape_cast %40 : vector<16x16x36xbf16> to vector<256x36xbf16>
    %c0_50 = arith.constant 0 : index
    %c0_51 = arith.constant 0 : index
    %42 = vector.load %arg4[%c0_50, %c0_51] : memref<36x4xbf16, #tpu.memory_space<vmem>>, vector<36x4xbf16>
    %cst_52 = arith.constant dense<0.000000e+00> : vector<256x4xf32>
    %43 = tpu.matmul %41, %42, %cst_52 {dimension_numbers = #tpu.dot_dimension_numbers<[1], [0], [0], [1], [0, 0, 1, 1], [], []>} : vector<256x36xbf16>, vector<36x4xbf16>, vector<256x4xf32> -> vector<256x4xf32>
    %44 = vector.shape_cast %43 : vector<256x4xf32> to vector<1x256x4xf32>
    %45 = arith.truncf %44 : vector<1x256x4xf32> to vector<1x256x4xbf16>
    %c0_53 = arith.constant 0 : index
    %c0_54 = arith.constant 0 : index
    %c0_55 = arith.constant 0 : index
    %46 = vector.load %arg5[%c0_53, %c0_54, %c0_55] : memref<1x256x4xbf16, #tpu.memory_space<vmem>>, vector<1x256x4xbf16>
    tpu.vector_store %arg5[%c0_53, %c0_54, %c0_55], %45 {strides = array<i32>} : memref<1x256x4xbf16, #tpu.memory_space<vmem>>, vector<1x256x4xbf16>,
    %cst_56 = arith.constant dense<0.000000e+00> : vector<4xf32>
    %47 = vector.multi_reduction <add>, %43, %cst_56 [0] : vector<256x4xf32> to vector<4xf32>
    %48 = vector.shape_cast %47 : vector<4xf32> to vector<1x4xf32>
    %49 = arith.mulf %43, %43 : vector<256x4xf32>
    %cst_57 = arith.constant dense<0.000000e+00> : vector<4xf32>
    %50 = vector.multi_reduction <add>, %49, %cst_57 [0] : vector<256x4xf32> to vector<4xf32>
    %51 = vector.shape_cast %50 : vector<4xf32> to vector<1x4xf32>
    %52 = tpu.concatenate %48, %51 in 0 : vector<1x4xf32>, vector<1x4xf32> -> vector<2x4xf32>
    %53 = vector.shape_cast %52 : vector<2x4xf32> to vector<1x2x4xf32>
    %c0_58 = arith.constant 0 : index
    %c0_59 = arith.constant 0 : index
    %c0_60 = arith.constant 0 : index
    %54 = vector.load %arg6[%c0_58, %c0_59, %c0_60] : memref<1x2x4xf32, #tpu.memory_space<vmem>>, vector<1x2x4xf32>
    tpu.vector_store %arg6[%c0_58, %c0_59, %c0_60], %53 {strides = array<i32>} : memref<1x2x4xf32, #tpu.memory_space<vmem>>, vector<1x2x4xf32>,
    return
  }
  func.func @transform_0(%arg0: i32) -> (i32, i32, i32, i32) {
    %c0_i32 = arith.constant 0 : i32
    %c0_i32_0 = arith.constant 0 : i32
    %c0_i32_1 = arith.constant 0 : i32
    %c0_i32_2 = arith.constant 0 : i32
    return %arg0, %c0_i32, %c0_i32_0, %c0_i32_1 : i32, i32, i32, i32
  }
  func.func @transform_1(%arg0: i32) -> (i32, i32) {
    %c0_i32 = arith.constant 0 : i32
    %c0_i32_0 = arith.constant 0 : i32
    %c0_i32_1 = arith.constant 0 : i32
    return %c0_i32, %c0_i32_0 : i32, i32
  }
  func.func @transform_2(%arg0: i32) -> (i32, i32) {
    %c0_i32 = arith.constant 0 : i32
    %c0_i32_0 = arith.constant 0 : i32
    %c0_i32_1 = arith.constant 0 : i32
    return %c0_i32, %c0_i32_0 : i32, i32
  }
  func.func @transform_3(%arg0: i32) -> (i32, i32) {
    %c0_i32 = arith.constant 0 : i32
    %c0_i32_0 = arith.constant 0 : i32
    %c0_i32_1 = arith.constant 0 : i32
    return %c0_i32, %c0_i32_0 : i32, i32
  }
  func.func @transform_4(%arg0: i32) -> (i32, i32, i32) {
    %c0_i32 = arith.constant 0 : i32
    %c0_i32_0 = arith.constant 0 : i32
    %c0_i32_1 = arith.constant 0 : i32
    return %arg0, %c0_i32, %c0_i32_0 : i32, i32, i32
  }
  func.func @transform_5(%arg0: i32) -> (i32, i32, i32) {
    %c0_i32 = arith.constant 0 : i32
    %c0_i32_0 = arith.constant 0 : i32
    %c0_i32_1 = arith.constant 0 : i32
    return %arg0, %c0_i32, %c0_i32_0 : i32, i32, i32
  }
}

module attributes {stable_mosaic.version = 11 : i64} {
  func.func @_conv1_kernel(%arg0: i32, %arg1: memref<256x16xf32, #tpu.memory_space<vmem>>, %arg2: memref<16x4xbf16, #tpu.memory_space<vmem>>, %arg3: memref<256x4xbf16, #tpu.memory_space<vmem>>, %arg4: memref<1x2x4xf32, #tpu.memory_space<vmem>>) attributes {dimension_semantics = [#tpu.dimension_semantics<parallel>], iteration_bounds = array<i64: 2>, scalar_prefetch = 0 : i64, scratch_operands = 0 : i64, tpu.core_type = #tpu.core_type<tc>, window_params = [{transform_indices = @transform_0, window_bounds = array<i64: 256, 16>}, {pipeline_mode = #tpu.pipeline_mode<synchronous>, transform_indices = @transform_1, window_bounds = array<i64: 16, 4>}, {transform_indices = @transform_2, window_bounds = array<i64: 256, 4>}, {transform_indices = @transform_3, window_bounds = array<i64: 1, 2, 4>}]} {
    %c0 = arith.constant 0 : index
    %c0_0 = arith.constant 0 : index
    %0 = vector.load %arg1[%c0, %c0_0] : memref<256x16xf32, #tpu.memory_space<vmem>>, vector<256x16xf32>
    %1 = arith.truncf %0 : vector<256x16xf32> to vector<256x16xbf16>
    %c0_1 = arith.constant 0 : index
    %c0_2 = arith.constant 0 : index
    %2 = vector.load %arg2[%c0_1, %c0_2] : memref<16x4xbf16, #tpu.memory_space<vmem>>, vector<16x4xbf16>
    %cst = arith.constant dense<0.000000e+00> : vector<256x4xf32>
    %3 = tpu.matmul %1, %2, %cst {dimension_numbers = #tpu.dot_dimension_numbers<[1], [0], [0], [1], [0, 0, 1, 1], [], []>} : vector<256x16xbf16>, vector<16x4xbf16>, vector<256x4xf32> -> vector<256x4xf32>
    %4 = arith.truncf %3 : vector<256x4xf32> to vector<256x4xbf16>
    %c0_3 = arith.constant 0 : index
    %c0_4 = arith.constant 0 : index
    %5 = vector.load %arg3[%c0_3, %c0_4] : memref<256x4xbf16, #tpu.memory_space<vmem>>, vector<256x4xbf16>
    tpu.vector_store %arg3[%c0_3, %c0_4], %4 {strides = array<i32>} : memref<256x4xbf16, #tpu.memory_space<vmem>>, vector<256x4xbf16>,
    %cst_5 = arith.constant dense<0.000000e+00> : vector<4xf32>
    %6 = vector.multi_reduction <add>, %3, %cst_5 [0] : vector<256x4xf32> to vector<4xf32>
    %7 = vector.shape_cast %6 : vector<4xf32> to vector<1x4xf32>
    %8 = arith.mulf %3, %3 : vector<256x4xf32>
    %cst_6 = arith.constant dense<0.000000e+00> : vector<4xf32>
    %9 = vector.multi_reduction <add>, %8, %cst_6 [0] : vector<256x4xf32> to vector<4xf32>
    %10 = vector.shape_cast %9 : vector<4xf32> to vector<1x4xf32>
    %11 = tpu.concatenate %7, %10 in 0 : vector<1x4xf32>, vector<1x4xf32> -> vector<2x4xf32>
    %12 = vector.shape_cast %11 : vector<2x4xf32> to vector<1x2x4xf32>
    %c0_7 = arith.constant 0 : index
    %c0_8 = arith.constant 0 : index
    %c0_9 = arith.constant 0 : index
    %13 = vector.load %arg4[%c0_7, %c0_8, %c0_9] : memref<1x2x4xf32, #tpu.memory_space<vmem>>, vector<1x2x4xf32>
    tpu.vector_store %arg4[%c0_7, %c0_8, %c0_9], %12 {strides = array<i32>} : memref<1x2x4xf32, #tpu.memory_space<vmem>>, vector<1x2x4xf32>,
    return
  }
  func.func @transform_0(%arg0: i32) -> (i32, i32) {
    %c0_i32 = arith.constant 0 : i32
    %c0_i32_0 = arith.constant 0 : i32
    return %arg0, %c0_i32 : i32, i32
  }
  func.func @transform_1(%arg0: i32) -> (i32, i32) {
    %c0_i32 = arith.constant 0 : i32
    %c0_i32_0 = arith.constant 0 : i32
    %c0_i32_1 = arith.constant 0 : i32
    return %c0_i32, %c0_i32_0 : i32, i32
  }
  func.func @transform_2(%arg0: i32) -> (i32, i32) {
    %c0_i32 = arith.constant 0 : i32
    %c0_i32_0 = arith.constant 0 : i32
    return %arg0, %c0_i32 : i32, i32
  }
  func.func @transform_3(%arg0: i32) -> (i32, i32, i32) {
    %c0_i32 = arith.constant 0 : i32
    %c0_i32_0 = arith.constant 0 : i32
    %c0_i32_1 = arith.constant 0 : i32
    return %arg0, %c0_i32, %c0_i32_0 : i32, i32, i32
  }
}

module attributes {stable_mosaic.version = 11 : i64} {
  func.func @_conv3_kernel(%arg0: i32, %arg1: memref<256x4xbf16, #tpu.memory_space<vmem>>, %arg2: memref<1x4xf32, #tpu.memory_space<vmem>>, %arg3: memref<1x4xf32, #tpu.memory_space<vmem>>, %arg4: memref<4x16xbf16, #tpu.memory_space<vmem>>, %arg5: memref<256x16xbf16, #tpu.memory_space<vmem>>, %arg6: memref<1x2x16xf32, #tpu.memory_space<vmem>>) attributes {dimension_semantics = [#tpu.dimension_semantics<parallel>], iteration_bounds = array<i64: 2>, scalar_prefetch = 0 : i64, scratch_operands = 0 : i64, tpu.core_type = #tpu.core_type<tc>, window_params = [{transform_indices = @transform_0, window_bounds = array<i64: 256, 4>}, {pipeline_mode = #tpu.pipeline_mode<synchronous>, transform_indices = @transform_1, window_bounds = array<i64: 1, 4>}, {pipeline_mode = #tpu.pipeline_mode<synchronous>, transform_indices = @transform_2, window_bounds = array<i64: 1, 4>}, {pipeline_mode = #tpu.pipeline_mode<synchronous>, transform_indices = @transform_3, window_bounds = array<i64: 4, 16>}, {transform_indices = @transform_4, window_bounds = array<i64: 256, 16>}, {transform_indices = @transform_5, window_bounds = array<i64: 1, 2, 16>}]} {
    %c0 = arith.constant 0 : index
    %c0_0 = arith.constant 0 : index
    %0 = vector.load %arg2[%c0, %c0_0] : memref<1x4xf32, #tpu.memory_space<vmem>>, vector<1x4xf32>
    %c0_1 = arith.constant 0 : index
    %c0_2 = arith.constant 0 : index
    %1 = vector.load %arg3[%c0_1, %c0_2] : memref<1x4xf32, #tpu.memory_space<vmem>>, vector<1x4xf32>
    %c0_3 = arith.constant 0 : index
    %c0_4 = arith.constant 0 : index
    %2 = vector.load %arg1[%c0_3, %c0_4] : memref<256x4xbf16, #tpu.memory_space<vmem>>, vector<256x4xbf16>
    %3 = arith.extf %2 : vector<256x4xbf16> to vector<256x4xf32>
    %4 = vector.broadcast %0 : vector<1x4xf32> to vector<256x4xf32>
    %5 = arith.mulf %3, %4 : vector<256x4xf32>
    %6 = vector.broadcast %1 : vector<1x4xf32> to vector<256x4xf32>
    %7 = arith.addf %5, %6 : vector<256x4xf32>
    %cst = arith.constant 0.000000e+00 : f32
    %8 = vector.broadcast %cst : f32 to vector<256x4xf32>
    %9 = arith.maximumf %7, %8 : vector<256x4xf32>
    %10 = arith.truncf %9 : vector<256x4xf32> to vector<256x4xbf16>
    %c0_5 = arith.constant 0 : index
    %c0_6 = arith.constant 0 : index
    %11 = vector.load %arg4[%c0_5, %c0_6] : memref<4x16xbf16, #tpu.memory_space<vmem>>, vector<4x16xbf16>
    %cst_7 = arith.constant dense<0.000000e+00> : vector<256x16xf32>
    %12 = tpu.matmul %10, %11, %cst_7 {dimension_numbers = #tpu.dot_dimension_numbers<[1], [0], [0], [1], [0, 0, 1, 1], [], []>} : vector<256x4xbf16>, vector<4x16xbf16>, vector<256x16xf32> -> vector<256x16xf32>
    %13 = arith.truncf %12 : vector<256x16xf32> to vector<256x16xbf16>
    %c0_8 = arith.constant 0 : index
    %c0_9 = arith.constant 0 : index
    %14 = vector.load %arg5[%c0_8, %c0_9] : memref<256x16xbf16, #tpu.memory_space<vmem>>, vector<256x16xbf16>
    tpu.vector_store %arg5[%c0_8, %c0_9], %13 {strides = array<i32>} : memref<256x16xbf16, #tpu.memory_space<vmem>>, vector<256x16xbf16>,
    %cst_10 = arith.constant dense<0.000000e+00> : vector<16xf32>
    %15 = vector.multi_reduction <add>, %12, %cst_10 [0] : vector<256x16xf32> to vector<16xf32>
    %16 = vector.shape_cast %15 : vector<16xf32> to vector<1x16xf32>
    %17 = arith.mulf %12, %12 : vector<256x16xf32>
    %cst_11 = arith.constant dense<0.000000e+00> : vector<16xf32>
    %18 = vector.multi_reduction <add>, %17, %cst_11 [0] : vector<256x16xf32> to vector<16xf32>
    %19 = vector.shape_cast %18 : vector<16xf32> to vector<1x16xf32>
    %20 = tpu.concatenate %16, %19 in 0 : vector<1x16xf32>, vector<1x16xf32> -> vector<2x16xf32>
    %21 = vector.shape_cast %20 : vector<2x16xf32> to vector<1x2x16xf32>
    %c0_12 = arith.constant 0 : index
    %c0_13 = arith.constant 0 : index
    %c0_14 = arith.constant 0 : index
    %22 = vector.load %arg6[%c0_12, %c0_13, %c0_14] : memref<1x2x16xf32, #tpu.memory_space<vmem>>, vector<1x2x16xf32>
    tpu.vector_store %arg6[%c0_12, %c0_13, %c0_14], %21 {strides = array<i32>} : memref<1x2x16xf32, #tpu.memory_space<vmem>>, vector<1x2x16xf32>,
    return
  }
  func.func @transform_0(%arg0: i32) -> (i32, i32) {
    %c0_i32 = arith.constant 0 : i32
    %c0_i32_0 = arith.constant 0 : i32
    return %arg0, %c0_i32 : i32, i32
  }
  func.func @transform_1(%arg0: i32) -> (i32, i32) {
    %c0_i32 = arith.constant 0 : i32
    %c0_i32_0 = arith.constant 0 : i32
    %c0_i32_1 = arith.constant 0 : i32
    return %c0_i32, %c0_i32_0 : i32, i32
  }
  func.func @transform_2(%arg0: i32) -> (i32, i32) {
    %c0_i32 = arith.constant 0 : i32
    %c0_i32_0 = arith.constant 0 : i32
    %c0_i32_1 = arith.constant 0 : i32
    return %c0_i32, %c0_i32_0 : i32, i32
  }
  func.func @transform_3(%arg0: i32) -> (i32, i32) {
    %c0_i32 = arith.constant 0 : i32
    %c0_i32_0 = arith.constant 0 : i32
    %c0_i32_1 = arith.constant 0 : i32
    return %c0_i32, %c0_i32_0 : i32, i32
  }
  func.func @transform_4(%arg0: i32) -> (i32, i32) {
    %c0_i32 = arith.constant 0 : i32
    %c0_i32_0 = arith.constant 0 : i32
    return %arg0, %c0_i32 : i32, i32
  }
  func.func @transform_5(%arg0: i32) -> (i32, i32, i32) {
    %c0_i32 = arith.constant 0 : i32
    %c0_i32_0 = arith.constant 0 : i32
    %c0_i32_1 = arith.constant 0 : i32
    return %arg0, %c0_i32, %c0_i32_0 : i32, i32, i32
  }
}

module attributes {stable_mosaic.version = 11 : i64} {
  func.func @_residual_kernel(%arg0: i32, %arg1: memref<256x16xbf16, #tpu.memory_space<vmem>>, %arg2: memref<1x16xf32, #tpu.memory_space<vmem>>, %arg3: memref<1x16xf32, #tpu.memory_space<vmem>>, %arg4: memref<256x16xf32, #tpu.memory_space<vmem>>, %arg5: memref<256x16xf32, #tpu.memory_space<vmem>>) attributes {dimension_semantics = [#tpu.dimension_semantics<parallel>], iteration_bounds = array<i64: 2>, scalar_prefetch = 0 : i64, scratch_operands = 0 : i64, tpu.core_type = #tpu.core_type<tc>, window_params = [{transform_indices = @transform_0, window_bounds = array<i64: 256, 16>}, {pipeline_mode = #tpu.pipeline_mode<synchronous>, transform_indices = @transform_1, window_bounds = array<i64: 1, 16>}, {pipeline_mode = #tpu.pipeline_mode<synchronous>, transform_indices = @transform_2, window_bounds = array<i64: 1, 16>}, {transform_indices = @transform_3, window_bounds = array<i64: 256, 16>}, {transform_indices = @transform_4, window_bounds = array<i64: 256, 16>}]} {
    %c0 = arith.constant 0 : index
    %c0_0 = arith.constant 0 : index
    %0 = vector.load %arg2[%c0, %c0_0] : memref<1x16xf32, #tpu.memory_space<vmem>>, vector<1x16xf32>
    %c0_1 = arith.constant 0 : index
    %c0_2 = arith.constant 0 : index
    %1 = vector.load %arg3[%c0_1, %c0_2] : memref<1x16xf32, #tpu.memory_space<vmem>>, vector<1x16xf32>
    %c0_3 = arith.constant 0 : index
    %c0_4 = arith.constant 0 : index
    %2 = vector.load %arg1[%c0_3, %c0_4] : memref<256x16xbf16, #tpu.memory_space<vmem>>, vector<256x16xbf16>
    %3 = arith.extf %2 : vector<256x16xbf16> to vector<256x16xf32>
    %4 = vector.broadcast %0 : vector<1x16xf32> to vector<256x16xf32>
    %5 = arith.mulf %3, %4 : vector<256x16xf32>
    %6 = vector.broadcast %1 : vector<1x16xf32> to vector<256x16xf32>
    %7 = arith.addf %5, %6 : vector<256x16xf32>
    %c0_5 = arith.constant 0 : index
    %c0_6 = arith.constant 0 : index
    %8 = vector.load %arg4[%c0_5, %c0_6] : memref<256x16xf32, #tpu.memory_space<vmem>>, vector<256x16xf32>
    %9 = arith.addf %7, %8 : vector<256x16xf32>
    %cst = arith.constant 0.000000e+00 : f32
    %10 = vector.broadcast %cst : f32 to vector<256x16xf32>
    %11 = arith.maximumf %9, %10 : vector<256x16xf32>
    %c0_7 = arith.constant 0 : index
    %c0_8 = arith.constant 0 : index
    %12 = vector.load %arg5[%c0_7, %c0_8] : memref<256x16xf32, #tpu.memory_space<vmem>>, vector<256x16xf32>
    tpu.vector_store %arg5[%c0_7, %c0_8], %11 {strides = array<i32>} : memref<256x16xf32, #tpu.memory_space<vmem>>, vector<256x16xf32>,
    return
  }
  func.func @transform_0(%arg0: i32) -> (i32, i32) {
    %c0_i32 = arith.constant 0 : i32
    %c0_i32_0 = arith.constant 0 : i32
    return %arg0, %c0_i32 : i32, i32
  }
  func.func @transform_1(%arg0: i32) -> (i32, i32) {
    %c0_i32 = arith.constant 0 : i32
    %c0_i32_0 = arith.constant 0 : i32
    %c0_i32_1 = arith.constant 0 : i32
    return %c0_i32, %c0_i32_0 : i32, i32
  }
  func.func @transform_2(%arg0: i32) -> (i32, i32) {
    %c0_i32 = arith.constant 0 : i32
    %c0_i32_0 = arith.constant 0 : i32
    %c0_i32_1 = arith.constant 0 : i32
    return %c0_i32, %c0_i32_0 : i32, i32
  }
  func.func @transform_3(%arg0: i32) -> (i32, i32) {
    %c0_i32 = arith.constant 0 : i32
    %c0_i32_0 = arith.constant 0 : i32
    return %arg0, %c0_i32 : i32, i32
  }
  func.func @transform_4(%arg0: i32) -> (i32, i32) {
    %c0_i32 = arith.constant 0 : i32
    %c0_i32_0 = arith.constant 0 : i32
    return %arg0, %c0_i32 : i32, i32
  }
}

</mosaic_0001>

<bundles_post_ra>
// kernel: bottleneck_pallas.7
= control target key start
LH: loop header
LB: loop body
LE: loop exit
PB: predicated region body
PF: predicated region fallthrough
CT: control target
= control target key end

     0   :  { %9 = vsyncpa [#allocation3], 0  ;;  %s1114_s0 = inlined_call_operand.vmem [shape: bf16[512,16], index: 0, kind: input, shape index: {}]   ;;  %s1115_s1 = inlined_call_operand.vmem [shape: f32[1,16], index: 1, kind: input, shape index: {}]   ;;  %s1116_s2 = inlined_call_operand.vmem [shape: f32[1,16], index: 2, kind: input, shape index: {}]   ;;  %s1117_s3 = inlined_call_operand.vmem [shape: f32[512,16], index: 3, kind: input, shape index: {}]   ;;  %s1118_s4 = inlined_call_operand.hbm [shape: f32[512,16], index: 4, kind: output, shape index: {}]  }
   0x1   :  { %11 = vsyncpa [#allocation3 + $0x1], 0  ;;  %s809_s15 = smov 0   ;;  %s811_s16 = smov 0  }
   0x2   :  { %s813_s17 = smov 0   ;;  %s815_s18 = smov 0  }
   0x3 LB: > { %s830_s19 = sadd.s32 4294967295, %s779_s18   ;;  %s580_s20 = sadd.s32 4294967294, %s779_s18   ;;  %s779_s18 = sphi %s815_s18, %s1124_s18   ;;  %s775_s17 = sphi %s813_s17, %s1123_s17   ;;  %s771_s16 = sphi %s811_s16, %s1122_s16   ;;  %s767_s15 = sphi %s809_s15, %s1121_s15  }
   0x4   : > { %s834_s21 = sadd.s32 1, %s779_s18   ;;  %s118_s22 = sadd.s32 1, %s775_s17 }
   0x5   : > { %s115_s23 = ssub.s32 %s779_s18, %s834_s21  ;;  %p128_p0 = scmp.ne.s32.totalorder %s775_s17, %s771_s16 }
   0x6   : > { %p116_p1 = scmp.eq.s32.totalorder %s115_s23, 0  ;;  %p129_p2 = scmp.eq.s32.totalorder %s830_s19, 1 }
   0x7   : > { %p134_p3 = scmp.ne.s32.totalorder %s771_s16, %s767_s15  ;;  %p135_p4 = scmp.eq.s32.totalorder %s580_s20, 1 }
   0x8   : > { %s845_s24 = scalar_select %p116_p1, %s775_s17, %s118_s22  }
   0x9   : > { %p847_p5 = por %p129_p2, %p128_p0  ;;  %p851_p6 = por %p135_p4, %p134_p3 }
   0xa   : > { %p583_p7 = scmp.ge.s32.totalorder %s779_s18, 1  ;;  %p177_p8 = scmp.lt.s32.totalorder %s779_s18, 3 }
   0xc   : > { %p178_p9 = pnand %p583_p7, %p177_p8 }
   0xd   : > { %s585_s27 = sshll.u32 (!%p178_p9), %s830_s19, 5  ;;  %v866_v0 = vld [vmem:[%s1115_s1] ss:$0 sm:$0xff] (!%p178_p9)  ;;  %s205_s12 = sand.u32 (!%p178_p9), 1, %s771_s16   ;;  %vm459_vm0 = vcmask (!%p178_p9), 130048  }
   0xe   : > { %181 = sbr.rel (%p178_p9) target bundleno = 82 (0x52), region = 36  ;;  %p209_p10 = scmp.lt.s32.totalorder (!%p178_p9), %s585_s27, 63  ;;  %v879_v5 = vld [vmem:[%s1116_s2] ss:$0 sm:$0xff] (!%p178_p9) }
   0xf   : > { %s891_s20 = sshll.u32 (!%p178_p9), %s205_s12, 8  ;;  %s596_s23 = sshll.u32 (!%p178_p9), %s830_s19, 12 }
  0x10   : > { %s915_s22 = scalar_lea.vmem (!%p178_p9), [#allocation2], %s891_s20  ;;  %s1073_s30 = scalar_lea.sflag (!%p178_p9), [#allocation3], %s205_s12 }
  0x15   : > { %s1126_s27 = smov (!%p209_p10, %s585_s27), 63 }
  0x16   : > { %s586_s28 = sshll.u32 %s1126_s27, 2  ;;  %s588_s29 = sshll.u32 %s1126_s27, 3 }
  0x17   : > { %s861_s6 = scalar_lea.vmem %s1114_s0, %s586_s28  ;;  %s872_s11 = scalar_lea.vmem %s1117_s3, %s588_s29 }
  0x18   : > { %v598_v1 = vld [vmem:[%s861_s6] sm:$0xff]   ;;  %v661_v4 = vld [vmem:[%s861_s6 + $0x8] sm:$0xff]   ;;  %v662_v8 = vld [vmem:[%s861_s6 + $0x10] sm:$0xff]   ;;  %s506_s27 = sshll.u32 %s915_s22, 4  ;;  %s1055_s29 = scalar_lea.hbm %s1118_s4, %s596_s23  ;;  %s1057_s27 = int_to_ptr.vmem [resolvable:$true] %s506_s27 }
  0x19   : > { %v599_v2 = vunpack.c.l.bf16 %v598_v1  ;;  %v600_v3 = vunpack.c.h.bf16 %v598_v1  ;;  %v603_v6 = vunpack.c.l.bf16 %v661_v4  ;;  %v604_v7 = vunpack.c.h.bf16 %v661_v4  ;;  %v663_v13 = vld [vmem:[%s861_s6 + $0x18] sm:$0xff]   ;;  %v363_v14 = vld [vmem:[%s872_s11] sm:$0xff]  ;;  %v364_v15 = vld [vmem:[%s872_s11 + $0x8] sm:$0xff]  ;;  %s717_s5 = scalar_lea.vmem %s1057_s27, 4096 }
  0x1a   : > { %v607_v11 = vunpack.c.l.bf16 %v662_v8  ;;  %v608_v12 = vunpack.c.h.bf16 %v662_v8  ;;  %v611_v18 = vunpack.c.l.bf16 %v663_v13  ;;  %v612_v19 = vunpack.c.h.bf16 %v663_v13  ;;  %v365_v22 = vld [vmem:[%s872_s11 + $0x10] sm:$0xff]  ;;  %v366_v23 = vld [vmem:[%s872_s11 + $0x18] sm:$0xff]  ;;  %v367_v28 = vld [vmem:[%s872_s11 + $0x20] sm:$0xff]  ;;  %p718_p11 = scmp.ne.s32.totalorder %s1057_s27, %s717_s5 }
  0x1b   : > { %v293_v9 = vmul.f32 %v599_v2, %v866_v0  ;;  %v294_v10 = vmul.f32 %v600_v3, %v866_v0  ;;  %v295_v16 = vmul.f32 %v603_v6, %v866_v0  ;;  %v296_v17 = vmul.f32 %v604_v7, %v866_v0  ;;  %v368_v29 = vld [vmem:[%s872_s11 + $0x28] sm:$0xff]  ;;  %v369_v36 = vld [vmem:[%s872_s11 + $0x30] sm:$0xff]  ;;  %v370_v37 = vld [vmem:[%s872_s11 + $0x38] sm:$0xff] }
  0x1c   : > { %v297_v24 = vmul.f32 %v607_v11, %v866_v0  ;;  %v298_v25 = vmul.f32 %v608_v12, %v866_v0  ;;  %v299_v30 = vmul.f32 %v611_v18, %v866_v0  ;;  %v300_v31 = vmul.f32 %v612_v19, %v866_v0  ;;  %v664_v42 = vld [vmem:[%s861_s6 + $0x20] sm:$0xff]   ;;  %v665_v47 = vld [vmem:[%s861_s6 + $0x28] sm:$0xff]   ;;  %v666_v52 = vld [vmem:[%s861_s6 + $0x30] sm:$0xff]   ;;  %p719_p12 = pnand %p718_p11, %p847_p5 }
  0x1d   : > { %v331_v20 = vadd.f32 %v879_v5, %v293_v9  ;;  %v332_v21 = vadd.f32 %v879_v5, %v294_v10  ;;  %v333_v26 = vadd.f32 %v879_v5, %v295_v16  ;;  %v334_v27 = vadd.f32 %v879_v5, %v296_v17  ;;  %v667_v57 = vld [vmem:[%s861_s6 + $0x38] sm:$0xff]   ;;  %v371_v3 = vld [vmem:[%s872_s11 + $0x40] sm:$0xff]  ;;  %v372_v4 = vld [vmem:[%s872_s11 + $0x48] sm:$0xff] }
  0x1e   : > { %v335_v34 = vadd.f32 %v879_v5, %v297_v24  ;;  %v336_v35 = vadd.f32 %v879_v5, %v298_v25  ;;  %v337_v40 = vadd.f32 %v879_v5, %v299_v30  ;;  %v338_v41 = vadd.f32 %v879_v5, %v300_v31  ;;  %v373_v12 = vld [vmem:[%s872_s11 + $0x50] sm:$0xff]  ;;  %v374_v13 = vld [vmem:[%s872_s11 + $0x58] sm:$0xff]  ;;  %v375_v18 = vld [vmem:[%s872_s11 + $0x60] sm:$0xff]  ;;  %p720_p13 = pneg %p719_p12 }
  0x1f   : > { %v395_v32 = vadd.f32 %v363_v14, %v331_v20  ;;  %v396_v33 = vadd.f32 %v364_v15, %v332_v21  ;;  %v397_v38 = vadd.f32 %v365_v22, %v333_v26  ;;  %v398_v39 = vadd.f32 %v366_v23, %v334_v27  ;;  %v376_v19 = vld [vmem:[%s872_s11 + $0x68] sm:$0xff]  ;;  %v377_v26 = vld [vmem:[%s872_s11 + $0x70] sm:$0xff]  ;;  %v378_v27 = vld [vmem:[%s872_s11 + $0x78] sm:$0xff] }
  0x20   : > { %v399_v45 = vadd.f32 %v367_v28, %v335_v34  ;;  %v400_v46 = vadd.f32 %v368_v29, %v336_v35  ;;  %v401_v50 = vadd.f32 %v369_v36, %v337_v40  ;;  %v402_v51 = vadd.f32 %v370_v37, %v338_v41  ;;  %v669_v37 = vld [vmem:[%s861_s6 + $0x48] sm:$0xff]  }
  0x21   : > { %v427_v43 = vmax.f32 %v395_v32, 0.0  ;;  %v428_v44 = vmax.f32 %v396_v33, 0.0  ;;  %v429_v48 = vmax.f32 %v397_v38, 0.0  ;;  %v430_v49 = vmax.f32 %v398_v39, 0.0  ;;  %v668_v32 = vld [vmem:[%s861_s6 + $0x40] sm:$0xff]  }
  0x22   : > { %v431_v53 = vmax.f32 %v399_v45, 0.0  ;;  %v432_v54 = vmax.f32 %v400_v46, 0.0  ;;  %v615_v55 = vunpack.c.l.bf16 %v664_v42  ;;  %v616_v56 = vunpack.c.h.bf16 %v664_v42  ;;  %v670_v42 = vld [vmem:[%s861_s6 + $0x50] sm:$0xff]  }
  0x23   : > { %460 = vst.msk [vmem:[%s915_s22] sm:$0xff] %vm459_vm0, %v427_v43  ;;  %461 = vst.msk [vmem:[%s915_s22 + $0x8] sm:$0xff] %vm459_vm0, %v428_v44  ;;  %v433_v58 = vmax.f32 %v401_v50, 0.0  ;;  %v434_v59 = vmax.f32 %v402_v51, 0.0  ;;  %v619_v60 = vunpack.c.l.bf16 %v665_v47  ;;  %v620_v61 = vunpack.c.h.bf16 %v665_v47  ;;  %v671_v47 = vld [vmem:[%s861_s6 + $0x58] sm:$0xff]  }
  0x24   : > { %462 = vst.msk [vmem:[%s915_s22 + $0x10] sm:$0xff] %vm459_vm0, %v429_v48  ;;  %463 = vst.msk [vmem:[%s915_s22 + $0x18] sm:$0xff] %vm459_vm0, %v430_v49  ;;  %v301_v62 = vmul.f32 %v615_v55, %v866_v0  ;;  %v302_v63 = vmul.f32 %v616_v56, %v866_v0  ;;  %v623_v1 = vunpack.c.l.bf16 %v666_v52  ;;  %v624_v2 = vunpack.c.h.bf16 %v666_v52  ;;  %v379_v56 = vld [vmem:[%s872_s11 + $0x80] sm:$0xff] }
  0x25   : > { %464 = vst.msk [vmem:[%s915_s22 + $0x20] sm:$0xff] %vm459_vm0, %v431_v53  ;;  %465 = vst.msk [vmem:[%s915_s22 + $0x28] sm:$0xff] %vm459_vm0, %v432_v54  ;;  %v303_v6 = vmul.f32 %v619_v60, %v866_v0  ;;  %v304_v7 = vmul.f32 %v620_v61, %v866_v0  ;;  %v627_v8 = vunpack.c.l.bf16 %v667_v57  ;;  %v628_v9 = vunpack.c.h.bf16 %v667_v57  ;;  %v380_v57 = vld [vmem:[%s872_s11 + $0x88] sm:$0xff] }
  0x26   : > { %466 = vst.msk [vmem:[%s915_s22 + $0x30] sm:$0xff] %vm459_vm0, %v433_v58  ;;  %467 = vst.msk [vmem:[%s915_s22 + $0x38] sm:$0xff] %vm459_vm0, %v434_v59  ;;  %v339_v10 = vadd.f32 %v879_v5, %v301_v62  ;;  %v340_v11 = vadd.f32 %v879_v5, %v302_v63  ;;  %v305_v14 = vmul.f32 %v623_v1, %v866_v0  ;;  %v631_v45 = vunpack.c.l.bf16 %v668_v32  ;;  %v381_v1 = vld [vmem:[%s872_s11 + $0x90] sm:$0xff] }
  0x27   : > { %v306_v15 = vmul.f32 %v624_v2, %v866_v0  ;;  %v341_v16 = vadd.f32 %v879_v5, %v303_v6  ;;  %v342_v17 = vadd.f32 %v879_v5, %v304_v7  ;;  %v307_v20 = vmul.f32 %v627_v8, %v866_v0  ;;  %v382_v2 = vld [vmem:[%s872_s11 + $0x98] sm:$0xff]  ;;  %v383_v8 = vld [vmem:[%s872_s11 + $0xa0] sm:$0xff] }
  0x28   : > { %v308_v21 = vmul.f32 %v628_v9, %v866_v0  ;;  %v403_v22 = vadd.f32 %v371_v3, %v339_v10  ;;  %v404_v23 = vadd.f32 %v372_v4, %v340_v11  ;;  %v343_v24 = vadd.f32 %v879_v5, %v305_v14  ;;  %v384_v9 = vld [vmem:[%s872_s11 + $0xa8] sm:$0xff] }
  0x29   : > { %v344_v25 = vadd.f32 %v879_v5, %v306_v15  ;;  %v405_v28 = vadd.f32 %v373_v12, %v341_v16  ;;  %v406_v29 = vadd.f32 %v374_v13, %v342_v17  ;;  %v345_v30 = vadd.f32 %v879_v5, %v307_v20  ;;  %v385_v16 = vld [vmem:[%s872_s11 + $0xb0] sm:$0xff]  ;;  %v386_v17 = vld [vmem:[%s872_s11 + $0xb8] sm:$0xff] }
  0x2a   : > { %v346_v31 = vadd.f32 %v879_v5, %v308_v21  ;;  %v435_v33 = vmax.f32 %v403_v22, 0.0  ;;  %v436_v34 = vmax.f32 %v404_v23, 0.0  ;;  %v407_v35 = vadd.f32 %v375_v18, %v343_v24  ;;  %v672_v22 = vld [vmem:[%s861_s6 + $0x60] sm:$0xff]  }
  0x2b   : > { %v408_v36 = vadd.f32 %v376_v19, %v344_v25  ;;  %v437_v38 = vmax.f32 %v405_v28, 0.0  ;;  %v438_v39 = vmax.f32 %v406_v29, 0.0  ;;  %v409_v40 = vadd.f32 %v377_v26, %v345_v30 }
  0x2c   : > { %v410_v41 = vadd.f32 %v378_v27, %v346_v31  ;;  %468 = vst.msk [vmem:[%s915_s22 + $0x40] sm:$0xff] %vm459_vm0, %v435_v33  ;;  %469 = vst.msk [vmem:[%s915_s22 + $0x48] sm:$0xff] %vm459_vm0, %v436_v34  ;;  %v439_v43 = vmax.f32 %v407_v35, 0.0  ;;  %v632_v46 = vunpack.c.h.bf16 %v668_v32  ;;  %v635_v50 = vunpack.c.l.bf16 %v669_v37  ;;  %v673_v27 = vld [vmem:[%s861_s6 + $0x68] sm:$0xff]   ;;  %v674_v32 = vld [vmem:[%s861_s6 + $0x70] sm:$0xff]  }
  0x2d   : > { %v440_v44 = vmax.f32 %v408_v36, 0.0  ;;  %470 = vst.msk [vmem:[%s915_s22 + $0x50] sm:$0xff] %vm459_vm0, %v437_v38  ;;  %471 = vst.msk [vmem:[%s915_s22 + $0x58] sm:$0xff] %vm459_vm0, %v438_v39  ;;  %v441_v48 = vmax.f32 %v409_v40, 0.0  ;;  %v636_v51 = vunpack.c.h.bf16 %v669_v37  ;;  %v309_v52 = vmul.f32 %v631_v45, %v866_v0  ;;  %v675_v37 = vld [vmem:[%s861_s6 + $0x78] sm:$0xff]   ;;  %s781_s6 = smov [#allocation2]  }
  0x2e   : > { %v442_v49 = vmax.f32 %v410_v41, 0.0  ;;  %472 = vst.msk [vmem:[%s915_s22 + $0x60] sm:$0xff] %vm459_vm0, %v439_v43  ;;  %v310_v53 = vmul.f32 %v632_v46, %v866_v0  ;;  %v639_v54 = vunpack.c.l.bf16 %v670_v42  ;;  %v640_v55 = vunpack.c.h.bf16 %v670_v42  ;;  %v387_v46 = vld [vmem:[%s872_s11 + $0xc0] sm:$0xff]  ;;  %s721_s7 = sshll.u32 %s781_s6, 4  ;;  %s722_s7 = int_to_ptr.vmem [resolvable:$false] %s721_s7 }
  0x2f   : > { %473 = vst.msk [vmem:[%s915_s22 + $0x68] sm:$0xff] %vm459_vm0, %v440_v44  ;;  %474 = vst.msk [vmem:[%s915_s22 + $0x70] sm:$0xff] %vm459_vm0, %v441_v48  ;;  %v311_v58 = vmul.f32 %v635_v50, %v866_v0  ;;  %v312_v59 = vmul.f32 %v636_v51, %v866_v0  ;;  %v643_v60 = vunpack.c.l.bf16 %v671_v47  ;;  %v644_v61 = vunpack.c.h.bf16 %v671_v47  ;;  %v388_v47 = vld [vmem:[%s872_s11 + $0xc8] sm:$0xff]  ;;  %s723_s8 = scalar_lea.vmem %s722_s7, 8192  ;;  %p724_p0 = scmp.lt.s32.totalorder %s1057_s27, %s722_s7 }
  0x30   : > { %475 = vst.msk [vmem:[%s915_s22 + $0x78] sm:$0xff] %vm459_vm0, %v442_v49  ;;  %v347_v62 = vadd.f32 %v879_v5, %v309_v52  ;;  %v348_v63 = vadd.f32 %v879_v5, %v310_v53  ;;  %v313_v3 = vmul.f32 %v639_v54, %v866_v0  ;;  %v314_v4 = vmul.f32 %v640_v55, %v866_v0  ;;  %v389_v54 = vld [vmem:[%s872_s11 + $0xd0] sm:$0xff]  ;;  %v390_v55 = vld [vmem:[%s872_s11 + $0xd8] sm:$0xff]  ;;  %p725_p1 = scmp.lt.s32.totalorder %s723_s8, %s717_s5 }
  0x31   : > { %v349_v6 = vadd.f32 %v879_v5, %v311_v58  ;;  %v350_v7 = vadd.f32 %v879_v5, %v312_v59  ;;  %v315_v10 = vmul.f32 %v643_v60, %v866_v0  ;;  %v316_v11 = vmul.f32 %v644_v61, %v866_v0  ;;  %v391_v60 = vld [vmem:[%s872_s11 + $0xe0] sm:$0xff]  ;;  %v392_v61 = vld [vmem:[%s872_s11 + $0xe8] sm:$0xff] }
  0x32   : > { %v411_v12 = vadd.f32 %v379_v56, %v347_v62  ;;  %v412_v13 = vadd.f32 %v380_v57, %v348_v63  ;;  %v351_v14 = vadd.f32 %v879_v5, %v313_v3  ;;  %v352_v15 = vadd.f32 %v879_v5, %v314_v4  ;;  %p726_p2 = por %p725_p1, %p724_p0 }
  0x33   : > { %v413_v18 = vadd.f32 %v381_v1, %v349_v6  ;;  %v414_v19 = vadd.f32 %v382_v2, %v350_v7  ;;  %v353_v20 = vadd.f32 %v879_v5, %v315_v10  ;;  %v354_v21 = vadd.f32 %v879_v5, %v316_v11  ;;  %v393_v6 = vld [vmem:[%s872_s11 + $0xf0] sm:$0xff]  ;;  %v394_v7 = vld [vmem:[%s872_s11 + $0xf8] sm:$0xff] }
  0x34   : > { %v443_v23 = vmax.f32 %v411_v12, 0.0  ;;  %v444_v24 = vmax.f32 %v412_v13, 0.0  ;;  %v415_v25 = vadd.f32 %v383_v8, %v351_v14  ;;  %v416_v26 = vadd.f32 %v384_v9, %v352_v15  ;;  %p727_p3 = pnand %p726_p2, %p720_p13 }
  0x35   : > { %v445_v28 = vmax.f32 %v413_v18, 0.0  ;;  %v446_v29 = vmax.f32 %v414_v19, 0.0  ;;  %v417_v30 = vadd.f32 %v385_v16, %v353_v20  ;;  %v418_v31 = vadd.f32 %v386_v17, %v354_v21 }
  0x36   : > { %476 = vst.msk [vmem:[%s915_s22 + $0x80] sm:$0xff] %vm459_vm0, %v443_v23  ;;  %477 = vst.msk [vmem:[%s915_s22 + $0x88] sm:$0xff] %vm459_vm0, %v444_v24  ;;  %v447_v33 = vmax.f32 %v415_v25, 0.0  ;;  %v448_v34 = vmax.f32 %v416_v26, 0.0  ;;  %v647_v35 = vunpack.c.l.bf16 %v672_v22  ;;  %v648_v36 = vunpack.c.h.bf16 %v672_v22 }
  0x37   : > { %478 = vst.msk [vmem:[%s915_s22 + $0x90] sm:$0xff] %vm459_vm0, %v445_v28  ;;  %479 = vst.msk [vmem:[%s915_s22 + $0x98] sm:$0xff] %vm459_vm0, %v446_v29  ;;  %v449_v38 = vmax.f32 %v417_v30, 0.0  ;;  %v450_v39 = vmax.f32 %v418_v31, 0.0  ;;  %v651_v40 = vunpack.c.l.bf16 %v673_v27  ;;  %v652_v41 = vunpack.c.h.bf16 %v673_v27 }
  0x38   : > { %480 = vst.msk [vmem:[%s915_s22 + $0xa0] sm:$0xff] %vm459_vm0, %v447_v33  ;;  %481 = vst.msk [vmem:[%s915_s22 + $0xa8] sm:$0xff] %vm459_vm0, %v448_v34  ;;  %v317_v42 = vmul.f32 %v647_v35, %v866_v0  ;;  %v318_v43 = vmul.f32 %v648_v36, %v866_v0  ;;  %v655_v44 = vunpack.c.l.bf16 %v674_v32  ;;  %v656_v45 = vunpack.c.h.bf16 %v674_v32 }
  0x39   : > { %482 = vst.msk [vmem:[%s915_s22 + $0xb0] sm:$0xff] %vm459_vm0, %v449_v38  ;;  %483 = vst.msk [vmem:[%s915_s22 + $0xb8] sm:$0xff] %vm459_vm0, %v450_v39  ;;  %v319_v48 = vmul.f32 %v651_v40, %v866_v0  ;;  %v320_v49 = vmul.f32 %v652_v41, %v866_v0  ;;  %v659_v50 = vunpack.c.l.bf16 %v675_v37  ;;  %v660_v51 = vunpack.c.h.bf16 %v675_v37 }
  0x3a   : > { %v355_v52 = vadd.f32 %v879_v5, %v317_v42  ;;  %v356_v53 = vadd.f32 %v879_v5, %v318_v43  ;;  %v321_v56 = vmul.f32 %v655_v44, %v866_v0  ;;  %v322_v57 = vmul.f32 %v656_v45, %v866_v0 }
  0x3b   : > { %v357_v58 = vadd.f32 %v879_v5, %v319_v48  ;;  %v358_v59 = vadd.f32 %v879_v5, %v320_v49  ;;  %v323_v62 = vmul.f32 %v659_v50, %v866_v0  ;;  %v324_v63 = vmul.f32 %v660_v51, %v866_v0 }
  0x3c   : > { %v419_v1 = vadd.f32 %v387_v46, %v355_v52  ;;  %v420_v2 = vadd.f32 %v388_v47, %v356_v53  ;;  %v359_v3 = vadd.f32 %v879_v5, %v321_v56  ;;  %v360_v4 = vadd.f32 %v879_v5, %v322_v57 }
  0x3d   : > { %v421_v8 = vadd.f32 %v389_v54, %v357_v58  ;;  %v422_v9 = vadd.f32 %v390_v55, %v358_v59  ;;  %v361_v10 = vadd.f32 %v879_v5, %v323_v62  ;;  %v362_v11 = vadd.f32 %v879_v5, %v324_v63 }
  0x3e   : > { %v451_v0 = vmax.f32 %v419_v1, 0.0  ;;  %v452_v12 = vmax.f32 %v420_v2, 0.0  ;;  %v423_v13 = vadd.f32 %v391_v60, %v359_v3  ;;  %v424_v14 = vadd.f32 %v392_v61, %v360_v4 }
  0x3f   : > { %v453_v15 = vmax.f32 %v421_v8, 0.0  ;;  %v454_v16 = vmax.f32 %v422_v9, 0.0  ;;  %v425_v17 = vadd.f32 %v393_v6, %v361_v10  ;;  %v426_v18 = vadd.f32 %v394_v7, %v362_v11 }
  0x40   : > { %484 = vst.msk [vmem:[%s915_s22 + $0xc0] sm:$0xff] %vm459_vm0, %v451_v0  ;;  %485 = vst.msk [vmem:[%s915_s22 + $0xc8] sm:$0xff] %vm459_vm0, %v452_v12  ;;  %v455_v5 = vmax.f32 %v423_v13, 0.0  ;;  %v456_v19 = vmax.f32 %v424_v14, 0.0 }
  0x41   : > { %486 = vst.msk [vmem:[%s915_s22 + $0xd0] sm:$0xff] %vm459_vm0, %v453_v15  ;;  %487 = vst.msk [vmem:[%s915_s22 + $0xd8] sm:$0xff] %vm459_vm0, %v454_v16  ;;  %v457_v20 = vmax.f32 %v425_v17, 0.0  ;;  %v458_v21 = vmax.f32 %v426_v18, 0.0 }
  0x42   : > { %488 = vst.msk [vmem:[%s915_s22 + $0xe0] sm:$0xff] %vm459_vm0, %v455_v5  ;;  %489 = vst.msk [vmem:[%s915_s22 + $0xe8] sm:$0xff] %vm459_vm0, %v456_v19 }
  0x43   : > { %490 = vst.msk [vmem:[%s915_s22 + $0xf0] sm:$0xff] %vm459_vm0, %v457_v20  ;;  %491 = vst.msk [vmem:[%s915_s22 + $0xf8] sm:$0xff] %vm459_vm0, %v458_v21 }
  0x44   : > { %730 = shalt.err (!%p727_p3)
}
  0x45   : > { %s731_s9 = scalar_lea.hbm %s1055_s29, 4096  ;;  %s735_s12 = scalar_lea.hbm %s1118_s4, 8192 }
  0x46   : > { %p732_p4 = scmp.ne.s32.totalorder %s1055_s29, %s731_s9  ;;  %p736_p9 = scmp.lt.u32.totalorder %s1055_s29, %s1118_s4 }
  0x47   : > { %p737_p10 = scmp.lt.u32.totalorder %s735_s12, %s731_s9  ;;  %p739_p12 = scmp.lt.u32.totalorder %s731_s9, %s1055_s29 }
  0x48   : > { %p733_p7 = pnand %p732_p4, %p847_p5 }
  0x49   : > { %p738_p11 = por %p737_p10, %p736_p9 }
  0x4a   : > { %p734_p8 = pneg %p733_p7 }
  0x4b   : > { %p740_p13 = por %p739_p12, %p738_p11 }
  0x4d   : > { %p741_p0 = pnand %p740_p13, %p734_p8 }
  0x4f   : > { %744 = shalt.err (!%p741_p0)
}
  0x50   : > { %s782_s20 = smov 128   ;;  %s783_s22 = smov 8  }
  0x51   : > { %676 = dma.vmem_to_hbm [thread:$0]  (%p847_p5), %s1057_s27, 4096, %s1055_s29, %s1073_s30, %s782_s20, %s782_s20, %s783_s22  }
  0x52 PF: > { %p682_p1 = scmp.ge.s32.totalorder %s779_s18, 2  ;;  %s521_s23 = sand.u32 1, %s767_s15  }
  0x53   : > { %s522_s19 = scalar_lea.sflag [#allocation3], %s521_s23 }
  0x54   : > { %p679_p2 = pnand %p682_p1, %p851_p6 }
  0x56   : > { %762 = dma.done.wait (!%p679_p2), %s522_s19, 4096  }
  0x57   : > { %764 = vsyncadd (!%p679_p2), %s522_s19, 4294963200  ;;  %p14_p3 = scmp.ge.s32.totalorder %s834_s21, 4   ;;  %s1121_s15 = smov %s771_s16 }
  0x58   : > { %s1122_s16 = smov %s775_s17  ;;  %s1123_s17 = smov %s845_s24 }
  0x59   : > { %s1124_s18 = smov %s834_s21  ;;  %16 = sbr.rel (!%p14_p3) target bundleno = 3 (0x3), region = 74 }
  0x60   :  { %527 = vsyncpa [#allocation3], 1 }
  0x61   :  { %529 = vsyncpa [#allocation3 + $0x1], 1 }

// kernel: bottleneck_pallas.4
= control target key start
LH: loop header
LB: loop body
LE: loop exit
PB: predicated region body
PF: predicated region fallthrough
CT: control target
= control target key end

     0   :  { %9 = vsyncpa [#allocation3], 0  ;;  %s1592_s0 = inlined_call_operand.hbm [shape: f32[512,16], index: 0, kind: input, shape index: {}]   ;;  %s1593_s1 = inlined_call_operand.vmem [shape: bf16[16,4], index: 1, kind: input, shape index: {}]   ;;  %s1594_s2 = inlined_call_operand.vmem [shape: bf16[512,4], index: 2, kind: output, shape index: {0}]   ;;  %s1595_s3 = inlined_call_operand.vmem [shape: f32[2,2,4], index: 3, kind: output, shape index: {1}]  }
   0x1   :  { %11 = vsyncpa [#allocation3 + $0x1], 0  ;;  %s1185_s12 = smov 0   ;;  %s1187_s13 = smov 0  }
   0x2   :  { %s1189_s14 = smov 0   ;;  %s1191_s15 = smov 0  }
   0x3 LB: > { %s1204_s16 = sadd.s32 4294967295, %s1160_s15   ;;  %s1207_s17 = sadd.s32 1, %s1160_s15   ;;  %s1160_s15 = sphi %s1191_s15, %s1602_s15   ;;  %s1156_s14 = sphi %s1189_s14, %s1601_s14   ;;  %s1152_s13 = sphi %s1187_s13, %s1600_s13   ;;  %s1148_s12 = sphi %s1185_s12, %s1599_s12  }
   0x4   : > { %s21_s18 = ssub.s32 %s1160_s15, %s1207_s17  ;;  %s24_s19 = sadd.s32 1, %s1156_s14 }
   0x5   : > { %p22_p0 = scmp.eq.s32.totalorder %s21_s18, 0  ;;  %p31_p1 = scmp.ne.s32.totalorder %s1156_s14, %s1152_s13 }
   0x6   : > { %p32_p2 = scmp.eq.s32.totalorder %s1160_s15, 0  ;;  %p37_p3 = scmp.ne.s32.totalorder %s1152_s13, %s1148_s12 }
   0x7   : > { %s1217_s20 = scalar_select %p22_p0, %s1156_s14, %s24_s19  }
   0x8   : > { %p33_p4 = por %p32_p2, %p31_p1  ;;  %p38_p5 = scmp.eq.s32.totalorder %s1204_s16, 0 }
   0x9   : > { %p1060_p6 = scmp.lt.s32.totalorder %s1160_s15, 2  ;;  %s137_s22 = sand.u32 1, %s1156_s14  }
   0xa   : > { %p1221_p7 = por %p38_p5, %p37_p3  ;;  %s909_s23 = sshll.u32 %s137_s22, 8 }
   0xb   : > { %s968_s24 = sshll.u32 %s1160_s15, 12  ;;  %s141_s28 = scalar_lea.vmem [#allocation2], %s909_s23 }
   0xc   : > { %s1230_s27 = scalar_lea.hbm %s1592_s0, %s968_s24  ;;  %s148_s29 = sshll.u32 %s141_s28, 4  ;;  %s1232_s29 = int_to_ptr.vmem [resolvable:$true] %s148_s29 }
   0xd   : > { %p1234_p8 = pnand %p1060_p6, %p33_p4  ;;  %s1239_s4 = scalar_lea.sflag [#allocation3], %s137_s22 }
   0xe   : > { %s1096_s5 = scalar_lea.hbm %s1230_s27, 4096  ;;  %s1101_s8 = scalar_lea.hbm %s1592_s0, 8192 }
   0xf   : > { %p1097_p10 = scmp.ne.s32.totalorder %s1230_s27, %s1096_s5  ;;  %p1098_p11 = pneg %p1234_p8 }
  0x10   : > { %p1102_p0 = scmp.lt.u32.totalorder %s1230_s27, %s1592_s0  ;;  %p1103_p1 = scmp.lt.u32.totalorder %s1101_s8, %s1096_s5 }
  0x11   : > { %p1099_p12 = pnand %p1098_p11, %p1097_p10  ;;  %p1105_p3 = scmp.lt.u32.totalorder %s1096_s5, %s1230_s27 }
  0x12   : > { %p1104_p2 = por %p1103_p1, %p1102_p0 }
  0x13   : > { %p1100_p13 = pneg %p1099_p12 }
  0x14   : > { %p1106_p4 = por %p1105_p3, %p1104_p2 }
  0x16   : > { %p1107_p5 = pnand %p1106_p4, %p1100_p13 }
  0x18   : > { %1110 = shalt.err (!%p1107_p5)
}
  0x19   : > { %s1111_s11 = scalar_lea.vmem %s1232_s29, 4096  ;;  %s1162_s12 = smov [#allocation2]  }
  0x1a   : > { %p1112_p6 = scmp.ne.s32.totalorder %s1232_s29, %s1111_s11  ;;  %s1116_s18 = sshll.u32 %s1162_s12, 4  ;;  %s1117_s18 = int_to_ptr.vmem [resolvable:$false] %s1116_s18 }
  0x1b   : > { %s1118_s19 = scalar_lea.vmem %s1117_s18, 8192  ;;  %p1119_p9 = scmp.lt.s32.totalorder %s1232_s29, %s1117_s18 }
  0x1c   : > { %p1114_p10 = pnand %p1112_p6, %p1098_p11  ;;  %p1120_p0 = scmp.lt.s32.totalorder %s1118_s19, %s1111_s11 }
  0x1e   : > { %p1115_p12 = pneg %p1114_p10  ;;  %p1121_p1 = por %p1120_p0, %p1119_p9 }
  0x20   : > { %p1122_p2 = pnand %p1121_p1, %p1115_p12 }
  0x22   : > { %1125 = shalt.err (!%p1122_p2)
}
  0x23   : > { %s1163_s22 = smov 128   ;;  %s1164_s23 = smov 8  }
  0x24   : > { %1059 = dma.hbm_to_vmem [thread:$0]  (!%p1234_p8), %s1230_s27, 4096, %s1232_s29, %s1239_s4, %s1163_s22, %s1163_s22, %s1164_s23  }
  0x25   : > { %p156_p11 = scmp.lt.s32.totalorder %s1160_s15, 3  ;;  %p1598_p13 = scmp.ge.s32.totalorder %s1160_s15, 1 }
  0x27   : > { %p157_p3 = pnand %p1598_p13, %p156_p11 }
  0x28   : > { %s162_s24 = sand.u32 (!%p157_p3), 1, %s1152_s13  }
  0x29   : > { %160 = sbr.rel (%p157_p3) target bundleno = 348 (0x15c), region = 28  ;;  %s913_s25 = sshll.u32 (!%p157_p3), %s162_s24, 8 }
  0x2a   : > { %s163_s26 = scalar_lea.sflag (!%p157_p3), [#allocation3], %s162_s24  ;;  %s1271_s28 = scalar_lea.vmem (!%p157_p3), [#allocation2], %s913_s25 }
  0x30   : > { %1143 = dma.done.wait (%p1221_p7), %s163_s26, 4096  }
  0x31   : > { %1145 = vsyncadd (%p1221_p7), %s163_s26, 4294963200  ;;  %v1095_v0 = vld [vmem:[%s1593_s1] sm:$0xff]   ;;  %v206_v2 = vld [vmem:[%s1271_s28 + $0x8] sm:$0xff]  ;;  %vm261_vm0 = vcmask 130048   ;;  %s914_s15 = sshll.u32 %s1204_s16, 5  ;;  %vm599_vm1 = vcmask 27648  }
  0x32   : > { %v205_v1 = vld [vmem:[%s1271_s28] sm:$0xff]  ;;  %v207_v3 = vld [vmem:[%s1271_s28 + $0x10] sm:$0xff]  ;;  %1018 = vmatprep.subr.bf16.mxu0 %v1095_v0  ;;  %v208_v5 = vld [vmem:[%s1271_s28 + $0x18] sm:$0xff]  ;;  %1052 = vmatprep.subr.bf16.mxu1 %v1095_v0  ;;  %p195_p7 = scmp.lt.s32.totalorder %s914_s15, 63  ;;  %vm632_vm2 = vcmask 31744   ;;  %p200_p8 = scmp.lt.s32.totalorder %s1204_s16, 1 }
  0x33   : > { %v237_v4 = vpack.c.bf16 %v206_v2, %v205_v1  ;;  %v209_v6 = vld [vmem:[%s1271_s28 + $0x20] sm:$0xff]  ;;  %v210_v7 = vld [vmem:[%s1271_s28 + $0x28] sm:$0xff]  ;;  %1019 = vmatpush3.bf16.msra.mxu0 %v1095_v0  ;;  %v238_v8 = vpack.c.bf16 %v208_v5, %v207_v3  ;;  %1053 = vmatpush3.bf16.msra.mxu1 %v1095_v0  ;;  %v211_v10 = vld [vmem:[%s1271_s28 + $0x30] sm:$0xff]  ;;  %vm803_vm3 = vcmask 1040384   ;;  %vm805_vm4 = vcmask 25600  }
  0x34   : > { %v239_v9 = vpack.c.bf16 %v210_v7, %v209_v6  ;;  %v212_v11 = vld [vmem:[%s1271_s28 + $0x38] sm:$0xff]  ;;  %v221_v12 = vld [vmem:[%s1271_s28 + $0x80] sm:$0xff]  ;;  %v222_v13 = vld [vmem:[%s1271_s28 + $0x88] sm:$0xff]  ;;  %s1604_s15 = smov (!%p195_p7, %s914_s15), 63  ;;  %s1606_s16 = smov (!%p200_p8, %s1204_s16), 1 }
  0x35   : > { %1020 = vmatprep.mubr.msk.bf16.mxu0 %vm261_vm0, %v237_v4  ;;  %v245_v14 = vpack.c.bf16 %v222_v13, %v221_v12  ;;  %v223_v15 = vld [vmem:[%s1271_s28 + $0x90] sm:$0xff]  ;;  %v224_v16 = vld [vmem:[%s1271_s28 + $0x98] sm:$0xff]  ;;  %v225_v17 = vld [vmem:[%s1271_s28 + $0xa0] sm:$0xff]  ;;  %v240_v23 = vpack.c.bf16 %v212_v11, %v211_v10  ;;  %s915_s21 = sshll.u32 %s1604_s15, 2  ;;  %s916_s4 = sshll.u32 %s1606_s16, 1 }
  0x36   : > { %1021 = vmatmul.mubr.msk.bf16.vlgmr.msra.gmra.mrb[0].mxu0 %vm261_vm0, %v238_v8  ;;  %v213_v18 = vld [vmem:[%s1271_s28 + $0x40] sm:$0xff]  ;;  %v214_v19 = vld [vmem:[%s1271_s28 + $0x48] sm:$0xff]  ;;  %v246_v20 = vpack.c.bf16 %v224_v16, %v223_v15  ;;  %v227_v25 = vld [vmem:[%s1271_s28 + $0xb0] sm:$0xff]  ;;  %s1332_s30 = scalar_lea.vmem %s1594_s2, %s915_s21  ;;  %s203_s9 = scalar_lea.vmem %s1595_s3, %s916_s4 }
  0x37   : > { %1024 = vmatprep.mubr.msk.bf16.mxu0 %vm261_vm0, %v239_v9  ;;  %v226_v21 = vld [vmem:[%s1271_s28 + $0xa8] sm:$0xff]  ;;  %1036 = vmatprep.mubr.msk.bf16.mxu1 %vm261_vm0, %v245_v14  ;;  %v241_v24 = vpack.c.bf16 %v214_v19, %v213_v18  ;;  %v228_v26 = vld [vmem:[%s1271_s28 + $0xb8] sm:$0xff]  ;;  %v229_v27 = vld [vmem:[%s1271_s28 + $0xc0] sm:$0xff] }
  0x38   : > { %v247_v22 = vpack.c.bf16 %v226_v21, %v225_v17  ;;  %1037 = vmatmul.mubr.msk.bf16.vlgmr.msra.gmra.mrb[0].mxu1 %vm261_vm0, %v246_v20  ;;  %v230_v28 = vld [vmem:[%s1271_s28 + $0xc8] sm:$0xff]  ;;  %v248_v29 = vpack.c.bf16 %v228_v26, %v227_v25  ;;  %v215_v30 = vld [vmem:[%s1271_s28 + $0x50] sm:$0xff]  ;;  %v216_v31 = vld [vmem:[%s1271_s28 + $0x58] sm:$0xff] }
  0x39   : > { %v249_v32 = vpack.c.bf16 %v230_v28, %v229_v27  ;;  %v217_v33 = vld [vmem:[%s1271_s28 + $0x60] sm:$0xff]  ;;  %v218_v34 = vld [vmem:[%s1271_s28 + $0x68] sm:$0xff]  ;;  %v242_v35 = vpack.c.bf16 %v216_v31, %v215_v30  ;;  %v231_v37 = vld [vmem:[%s1271_s28 + $0xd0] sm:$0xff] }
  0x3a   : > { %1040 = vmatprep.mubr.msk.bf16.mxu1 %vm261_vm0, %v247_v22  ;;  %v243_v36 = vpack.c.bf16 %v218_v34, %v217_v33  ;;  %v232_v38 = vld [vmem:[%s1271_s28 + $0xd8] sm:$0xff]  ;;  %v233_v39 = vld [vmem:[%s1271_s28 + $0xe0] sm:$0xff]  ;;  %v234_v40 = vld [vmem:[%s1271_s28 + $0xe8] sm:$0xff] }
  0x3b   : > { %v250_v41 = vpack.c.bf16 %v232_v38, %v231_v37  ;;  %v219_v42 = vld [vmem:[%s1271_s28 + $0x70] sm:$0xff]  ;;  %v220_v43 = vld [vmem:[%s1271_s28 + $0x78] sm:$0xff]  ;;  %v251_v44 = vpack.c.bf16 %v234_v40, %v233_v39 }
  0x3c   : > { %v244_v45 = vpack.c.bf16 %v220_v43, %v219_v42  ;;  %v235_v46 = vld [vmem:[%s1271_s28 + $0xf0] sm:$0xff]  ;;  %v236_v47 = vld [vmem:[%s1271_s28 + $0xf8] sm:$0xff] }
  0x3d   : > { %v252_v48 = vpack.c.bf16 %v236_v47, %v235_v46 }
  0x3e   : > { %1025 = vmatmul.mubr.msk.bf16.gmra.mrb[4].mxu0 %vm261_vm0, %v240_v23 }
  0x3f   : > { %1028 = vmatprep.mubr.msk.bf16.mxu0 %vm261_vm0, %v241_v24 }
  0x40   : > { %1041 = vmatmul.mubr.msk.bf16.gmra.mrb[4].mxu1 %vm261_vm0, %v248_v29 }
  0x41   : > { %1044 = vmatprep.mubr.msk.bf16.mxu1 %vm261_vm0, %v249_v32 }
  0x46   : > { %1029 = vmatmul.mubr.msk.bf16.gmra.mrb[8].mxu0 %vm261_vm0, %v242_v35 }
  0x47   : > { %1032 = vmatprep.mubr.msk.bf16.mxu0 %vm261_vm0, %v243_v36 }
  0x48   : > { %1045 = vmatmul.mubr.msk.bf16.gmra.mrb[8].mxu1 %vm261_vm0, %v250_v41 }
  0x49   : > { %1048 = vmatprep.mubr.msk.bf16.mxu1 %vm261_vm0, %v251_v44 }
  0x4e   : > { %1033 = vmatmul.mubr.msk.bf16.gmra.mrb[12].mxu0 %vm261_vm0, %v244_v45 }
  0x50   : > { %1049 = vmatmul.mubr.msk.bf16.gmra.mrb[12].mxu1 %vm261_vm0, %v252_v48 }
 0x109   : > { %v1022_v49 = vpop.f32.mrb[0].mxu0 }
 0x10a   : > { %v971_v50 = vpack.c.bf16 %v1022_v49, %v1022_v49  ;;  %v344_v51 = vpop.f32.mrb[1].mxu0  ;;  %v704_v55 = vmul.f32 %v1022_v49, %v1022_v49  ;;  %v636_v3 = vsel %vm632_vm2, %v1022_v49, 0.0 }
 0x10b   : > { %v969_v52 = vpack.c.bf16 %v344_v51, %v344_v51  ;;  %v702_v53 = vmul.f32 %v344_v51, %v344_v51  ;;  %v1023_v54 = vpop.f32.mrb[2].mxu0  ;;  %v633_v58 = vsel %vm632_vm2, %v344_v51, 0.0  ;;  %v1340_v62 = vpop.f32.mrb[0].mxu1 }
 0x10c   : > { %602 = vst.msk [vmem:[%s1332_s30 + $0x8] sm:$0xf] %vm599_vm1, %v971_v50  ;;  %v972_v56 = vpack.c.bf16 %v1023_v54, %v1023_v54  ;;  %v347_v57 = vpop.f32.mrb[3].mxu0  ;;  %v705_v63 = vmul.f32 %v1023_v54, %v1023_v54  ;;  %v987_v1 = vpack.c.bf16 %v1340_v62, %v1340_v62  ;;  %v1346_v2 = vpop.f32.mrb[1].mxu1  ;;  %v737_v12 = vsel %vm632_vm2, %v704_v55, 0.0 }
 0x10d   : > { %600 = vst.msk [vmem:[%s1332_s30] sm:$0xf] %vm599_vm1, %v969_v52  ;;  %v970_v59 = vpack.c.bf16 %v347_v57, %v347_v57  ;;  %v634_v60 = vsel %vm632_vm2, %v347_v57, 0.0  ;;  %v703_v61 = vmul.f32 %v347_v57, %v347_v57  ;;  %v734_v4 = vsel %vm632_vm2, %v702_v53, 0.0  ;;  %v1355_v7 = vpop.f32.mrb[2].mxu1 }
 0x10e   : > { %603 = vst.msk [vmem:[%s1332_s30 + $0xc] sm:$0xf] %vm599_vm1, %v972_v56  ;;  %v635_v0 = vadd.f32 %v634_v60, %v633_v58  ;;  %v985_v6 = vpack.c.bf16 %v1346_v2, %v1346_v2  ;;  %618 = vst.msk [vmem:[%s1332_s30 + $0x48] sm:$0xf] %vm599_vm1, %v987_v1  ;;  %v988_v10 = vpack.c.bf16 %v1355_v7, %v1355_v7  ;;  %v1361_v11 = vpop.f32.mrb[3].mxu1  ;;  %v638_v15 = vsel %vm632_vm2, %v1023_v54, 0.0 }
 0x10f   : > { %601 = vst.msk [vmem:[%s1332_s30 + $0x4] sm:$0xf] %vm599_vm1, %v970_v59  ;;  %v735_v5 = vsel %vm632_vm2, %v703_v61, 0.0  ;;  %v986_v14 = vpack.c.bf16 %v1361_v11, %v1361_v11  ;;  %v739_v16 = vsel %vm632_vm2, %v705_v63, 0.0 }
 0x110   : > { %v637_v8 = vadd.f32 %v636_v3, %v635_v0  ;;  %v736_v9 = vadd.f32 %v735_v5, %v734_v4  ;;  %616 = vst.msk [vmem:[%s1332_s30 + $0x40] sm:$0xf] %vm599_vm1, %v985_v6  ;;  %619 = vst.msk [vmem:[%s1332_s30 + $0x4c] sm:$0xf] %vm599_vm1, %v988_v10 }
 0x111   : > { %v1026_v13 = vpop.f32.mrb[4].mxu0  ;;  %617 = vst.msk [vmem:[%s1332_s30 + $0x44] sm:$0xf] %vm599_vm1, %v986_v14 }
 0x112   : > { %v738_v17 = vadd.f32 %v737_v12, %v736_v9  ;;  %v975_v18 = vpack.c.bf16 %v1026_v13, %v1026_v13  ;;  %v360_v19 = vpop.f32.mrb[5].mxu0  ;;  %v639_v21 = vadd.f32 %v638_v15, %v637_v8  ;;  %v708_v32 = vmul.f32 %v1026_v13, %v1026_v13 }
 0x113   : > { %v973_v20 = vpack.c.bf16 %v360_v19, %v360_v19  ;;  %v640_v22 = vsel %vm632_vm2, %v360_v19, 0.0  ;;  %v706_v23 = vmul.f32 %v360_v19, %v360_v19  ;;  %v1027_v24 = vpop.f32.mrb[6].mxu0  ;;  %v1380_v31 = vpop.f32.mrb[4].mxu1  ;;  %v644_v39 = vsel %vm632_vm2, %v1026_v13, 0.0 }
 0x114   : > { %606 = vst.msk [vmem:[%s1332_s30 + $0x18] sm:$0xf] %vm599_vm1, %v975_v18  ;;  %v740_v25 = vadd.f32 %v739_v16, %v738_v17  ;;  %v976_v26 = vpack.c.bf16 %v1027_v24, %v1027_v24  ;;  %v363_v27 = vpop.f32.mrb[7].mxu0  ;;  %v641_v28 = vadd.f32 %v640_v22, %v639_v21  ;;  %v1385_v36 = vpop.f32.mrb[5].mxu1  ;;  %v709_v40 = vmul.f32 %v1027_v24, %v1027_v24 }
 0x115   : > { %604 = vst.msk [vmem:[%s1332_s30 + $0x10] sm:$0xf] %vm599_vm1, %v973_v20  ;;  %v741_v29 = vsel %vm632_vm2, %v706_v23, 0.0  ;;  %v974_v30 = vpack.c.bf16 %v363_v27, %v363_v27  ;;  %v642_v34 = vsel %vm632_vm2, %v363_v27, 0.0  ;;  %v707_v35 = vmul.f32 %v363_v27, %v363_v27  ;;  %v1389_v38 = vpop.f32.mrb[6].mxu1 }
 0x116   : > { %v742_v33 = vadd.f32 %v741_v29, %v740_v25  ;;  %607 = vst.msk [vmem:[%s1332_s30 + $0x1c] sm:$0xf] %vm599_vm1, %v976_v26  ;;  %v643_v37 = vadd.f32 %v642_v34, %v641_v28  ;;  %v991_v42 = vpack.c.bf16 %v1380_v31, %v1380_v31  ;;  %v1395_v43 = vpop.f32.mrb[7].mxu1  ;;  %v989_v47 = vpack.c.bf16 %v1385_v36, %v1385_v36 }
 0x117   : > { %605 = vst.msk [vmem:[%s1332_s30 + $0x14] sm:$0xf] %vm599_vm1, %v974_v30  ;;  %v743_v41 = vsel %vm632_vm2, %v707_v35, 0.0  ;;  %v745_v48 = vsel %vm632_vm2, %v708_v32, 0.0  ;;  %v646_v49 = vsel %vm632_vm2, %v1027_v24, 0.0  ;;  %v747_v57 = vsel %vm632_vm2, %v709_v40, 0.0 }
 0x118   : > { %v645_v44 = vadd.f32 %v644_v39, %v643_v37  ;;  %v744_v45 = vadd.f32 %v743_v41, %v742_v33  ;;  %622 = vst.msk [vmem:[%s1332_s30 + $0x58] sm:$0xf] %vm599_vm1, %v991_v42  ;;  %620 = vst.msk [vmem:[%s1332_s30 + $0x50] sm:$0xf] %vm599_vm1, %v989_v47  ;;  %v992_v16 = vpack.c.bf16 %v1389_v38, %v1389_v38 }
 0x119   : > { %v1030_v46 = vpop.f32.mrb[8].mxu0  ;;  %v990_v21 = vpack.c.bf16 %v1395_v43, %v1395_v43 }
 0x11a   : > { %v979_v50 = vpack.c.bf16 %v1030_v46, %v1030_v46  ;;  %v376_v51 = vpop.f32.mrb[9].mxu0  ;;  %v746_v52 = vadd.f32 %v745_v48, %v744_v45  ;;  %v647_v54 = vadd.f32 %v646_v49, %v645_v44  ;;  %v712_v3 = vmul.f32 %v1030_v46, %v1030_v46  ;;  %623 = vst.msk [vmem:[%s1332_s30 + $0x5c] sm:$0xf] %vm599_vm1, %v992_v16 }
 0x11b   : > { %v977_v53 = vpack.c.bf16 %v376_v51, %v376_v51  ;;  %v648_v55 = vsel %vm632_vm2, %v376_v51, 0.0  ;;  %v1031_v56 = vpop.f32.mrb[10].mxu0  ;;  %v710_v58 = vmul.f32 %v376_v51, %v376_v51  ;;  %v1411_v1 = vpop.f32.mrb[8].mxu1  ;;  %v652_v13 = vsel %vm632_vm2, %v1030_v46, 0.0  ;;  %621 = vst.msk [vmem:[%s1332_s30 + $0x54] sm:$0xf] %vm599_vm1, %v990_v21 }
 0x11c   : > { %610 = vst.msk [vmem:[%s1332_s30 + $0x28] sm:$0xf] %vm599_vm1, %v979_v50  ;;  %v980_v59 = vpack.c.bf16 %v1031_v56, %v1031_v56  ;;  %v379_v60 = vpop.f32.mrb[11].mxu0  ;;  %v649_v61 = vadd.f32 %v648_v55, %v647_v54  ;;  %v748_v63 = vadd.f32 %v747_v57, %v746_v52  ;;  %v1417_v8 = vpop.f32.mrb[9].mxu1  ;;  %v713_v14 = vmul.f32 %v1031_v56, %v1031_v56 }
 0x11d   : > { %608 = vst.msk [vmem:[%s1332_s30 + $0x20] sm:$0xf] %vm599_vm1, %v977_v53  ;;  %v978_v0 = vpack.c.bf16 %v379_v60, %v379_v60  ;;  %v749_v4 = vsel %vm632_vm2, %v710_v58, 0.0  ;;  %v650_v5 = vsel %vm632_vm2, %v379_v60, 0.0  ;;  %v711_v6 = vmul.f32 %v379_v60, %v379_v60  ;;  %v1421_v12 = vpop.f32.mrb[10].mxu1 }
 0x11e   : > { %611 = vst.msk [vmem:[%s1332_s30 + $0x2c] sm:$0xf] %vm599_vm1, %v980_v59  ;;  %v750_v9 = vadd.f32 %v749_v4, %v748_v63  ;;  %v651_v10 = vadd.f32 %v650_v5, %v649_v61  ;;  %v1427_v17 = vpop.f32.mrb[11].mxu1  ;;  %v753_v22 = vsel %vm632_vm2, %v712_v3, 0.0  ;;  %v654_v23 = vsel %vm632_vm2, %v1031_v56, 0.0 }
 0x11f   : > { %609 = vst.msk [vmem:[%s1332_s30 + $0x24] sm:$0xf] %vm599_vm1, %v978_v0  ;;  %v751_v15 = vsel %vm632_vm2, %v711_v6, 0.0  ;;  %v755_v32 = vsel %vm632_vm2, %v713_v14, 0.0  ;;  %v718_v50 = vmul.f32 %v1346_v2, %v1346_v2  ;;  %v995_v55 = vpack.c.bf16 %v1411_v1, %v1411_v1 }
 0x120   : > { %v653_v18 = vadd.f32 %v652_v13, %v651_v10  ;;  %v752_v19 = vadd.f32 %v751_v15, %v750_v9  ;;  %v993_v59 = vpack.c.bf16 %v1417_v8, %v1417_v8  ;;  %v664_v63 = vsel %vm632_vm2, %v1346_v2, 0.0 }
 0x121   : > { %v1034_v20 = vpop.f32.mrb[12].mxu0  ;;  %626 = vst.msk [vmem:[%s1332_s30 + $0x68] sm:$0xf] %vm599_vm1, %v995_v55  ;;  %v996_v0 = vpack.c.bf16 %v1421_v12, %v1421_v12  ;;  %v765_v6 = vsel %vm632_vm2, %v718_v50, 0.0  ;;  %v719_v9 = vmul.f32 %v1361_v11, %v1361_v11  ;;  %v994_v2 = vpack.c.bf16 %v1427_v17, %v1427_v17 }
 0x122   : > { %v983_v24 = vpack.c.bf16 %v1034_v20, %v1034_v20  ;;  %v392_v25 = vpop.f32.mrb[13].mxu0  ;;  %v754_v26 = vadd.f32 %v753_v22, %v752_v19  ;;  %v655_v28 = vadd.f32 %v654_v23, %v653_v18  ;;  %v716_v42 = vmul.f32 %v1034_v20, %v1034_v20  ;;  %624 = vst.msk [vmem:[%s1332_s30 + $0x60] sm:$0xf] %vm599_vm1, %v993_v59 }
 0x123   : > { %v981_v27 = vpack.c.bf16 %v392_v25, %v392_v25  ;;  %v656_v29 = vsel %vm632_vm2, %v392_v25, 0.0  ;;  %v1035_v30 = vpop.f32.mrb[14].mxu0  ;;  %v714_v33 = vmul.f32 %v392_v25, %v392_v25  ;;  %v1443_v41 = vpop.f32.mrb[12].mxu1  ;;  %v660_v52 = vsel %vm632_vm2, %v1034_v20, 0.0  ;;  %627 = vst.msk [vmem:[%s1332_s30 + $0x6c] sm:$0xf] %vm599_vm1, %v996_v0 }
 0x124   : > { %614 = vst.msk [vmem:[%s1332_s30 + $0x38] sm:$0xf] %vm599_vm1, %v983_v24  ;;  %v984_v34 = vpack.c.bf16 %v1035_v30, %v1035_v30  ;;  %v395_v35 = vpop.f32.mrb[15].mxu0  ;;  %v657_v37 = vadd.f32 %v656_v29, %v655_v28  ;;  %v756_v39 = vadd.f32 %v755_v32, %v754_v26  ;;  %v1449_v47 = vpop.f32.mrb[13].mxu1  ;;  %v717_v53 = vmul.f32 %v1035_v30, %v1035_v30 }
 0x125   : > { %612 = vst.msk [vmem:[%s1332_s30 + $0x30] sm:$0xf] %vm599_vm1, %v981_v27  ;;  %v982_v40 = vpack.c.bf16 %v395_v35, %v395_v35  ;;  %v757_v44 = vsel %vm632_vm2, %v714_v33, 0.0  ;;  %v658_v45 = vsel %vm632_vm2, %v395_v35, 0.0  ;;  %v715_v46 = vmul.f32 %v395_v35, %v395_v35  ;;  %v1455_v51 = vpop.f32.mrb[14].mxu1 }
 0x126   : > { %615 = vst.msk [vmem:[%s1332_s30 + $0x3c] sm:$0xf] %vm599_vm1, %v984_v34  ;;  %v758_v48 = vadd.f32 %v757_v44, %v756_v39  ;;  %v659_v49 = vadd.f32 %v658_v45, %v657_v37  ;;  %v1461_v56 = vpop.f32.mrb[15].mxu1  ;;  %v761_v60 = vsel %vm632_vm2, %v716_v42, 0.0  ;;  %v662_v61 = vsel %vm632_vm2, %v1035_v30, 0.0 }
 0x127   : > { %613 = vst.msk [vmem:[%s1332_s30 + $0x34] sm:$0xf] %vm599_vm1, %v982_v40  ;;  %v759_v54 = vsel %vm632_vm2, %v715_v46, 0.0  ;;  %v763_v5 = vsel %vm632_vm2, %v717_v53, 0.0  ;;  %v999_v14 = vpack.c.bf16 %v1443_v41, %v1443_v41  ;;  %v720_v15 = vmul.f32 %v1340_v62, %v1340_v62  ;;  %625 = vst.msk [vmem:[%s1332_s30 + $0x64] sm:$0xf] %vm599_vm1, %v994_v2 }
 0x128   : > { %v661_v57 = vadd.f32 %v660_v52, %v659_v49  ;;  %v760_v58 = vadd.f32 %v759_v54, %v758_v48  ;;  %v666_v16 = vsel %vm632_vm2, %v1361_v11, 0.0  ;;  %v997_v18 = vpack.c.bf16 %v1449_v47, %v1449_v47 }
 0x129   : > { %v668_v19 = vsel %vm632_vm2, %v1340_v62, 0.0  ;;  %630 = vst.msk [vmem:[%s1332_s30 + $0x78] sm:$0xf] %vm599_vm1, %v999_v14  ;;  %v721_v22 = vmul.f32 %v1355_v7, %v1355_v7  ;;  %v767_v23 = vsel %vm632_vm2, %v719_v9, 0.0  ;;  %v722_v11 = vmul.f32 %v1385_v36, %v1385_v36 }
 0x12a   : > { %v762_v3 = vadd.f32 %v761_v60, %v760_v58  ;;  %v663_v4 = vadd.f32 %v662_v61, %v661_v57  ;;  %628 = vst.msk [vmem:[%s1332_s30 + $0x70] sm:$0xf] %vm599_vm1, %v997_v18  ;;  %v1000_v24 = vpack.c.bf16 %v1455_v51, %v1455_v51  ;;  %v998_v26 = vpack.c.bf16 %v1461_v56, %v1461_v56 }
 0x12b   : > { %v769_v27 = vsel %vm632_vm2, %v720_v15, 0.0  ;;  %v670_v28 = vsel %vm632_vm2, %v1355_v7, 0.0  ;;  %v672_v29 = vsel %vm632_vm2, %v1385_v36, 0.0  ;;  %v771_v33 = vsel %vm632_vm2, %v721_v22, 0.0 }
 0x12c   : > { %v665_v10 = vadd.f32 %v664_v63, %v663_v4  ;;  %v764_v13 = vadd.f32 %v763_v5, %v762_v3  ;;  %631 = vst.msk [vmem:[%s1332_s30 + $0x7c] sm:$0xf] %vm599_vm1, %v1000_v24  ;;  %629 = vst.msk [vmem:[%s1332_s30 + $0x74] sm:$0xf] %vm599_vm1, %v998_v26  ;;  %v773_v34 = vsel %vm632_vm2, %v722_v11, 0.0  ;;  %v723_v35 = vmul.f32 %v1395_v43, %v1395_v43 }
 0x12d   : > { %v724_v7 = vmul.f32 %v1380_v31, %v1380_v31  ;;  %v674_v36 = vsel %vm632_vm2, %v1395_v43, 0.0  ;;  %v676_v44 = vsel %vm632_vm2, %v1380_v31, 0.0  ;;  %v725_v45 = vmul.f32 %v1389_v38, %v1389_v38 }
 0x12e   : > { %v766_v20 = vadd.f32 %v765_v6, %v764_v13  ;;  %v667_v21 = vadd.f32 %v666_v16, %v665_v10  ;;  %v775_v46 = vsel %vm632_vm2, %v723_v35, 0.0  ;;  %v726_v48 = vmul.f32 %v1417_v8, %v1417_v8 }
 0x12f   : > { %v777_v52 = vsel %vm632_vm2, %v724_v7, 0.0  ;;  %v678_v43 = vsel %vm632_vm2, %v1389_v38, 0.0  ;;  %v680_v53 = vsel %vm632_vm2, %v1417_v8, 0.0  ;;  %v779_v55 = vsel %vm632_vm2, %v725_v45, 0.0 }
 0x130   : > { %v669_v25 = vadd.f32 %v668_v19, %v667_v21  ;;  %v768_v62 = vadd.f32 %v767_v23, %v766_v20  ;;  %v781_v57 = vsel %vm632_vm2, %v726_v48, 0.0  ;;  %v727_v58 = vmul.f32 %v1427_v17, %v1427_v17 }
 0x131   : > { %v728_v61 = vmul.f32 %v1411_v1, %v1411_v1  ;;  %v682_v38 = vsel %vm632_vm2, %v1427_v17, 0.0  ;;  %v684_v8 = vsel %vm632_vm2, %v1411_v1, 0.0  ;;  %v729_v3 = vmul.f32 %v1421_v12, %v1421_v12 }
 0x132   : > { %v770_v30 = vadd.f32 %v769_v27, %v768_v62  ;;  %v671_v32 = vadd.f32 %v670_v28, %v669_v25  ;;  %v783_v4 = vsel %vm632_vm2, %v727_v58, 0.0  ;;  %v730_v5 = vmul.f32 %v1449_v47, %v1449_v47 }
 0x133   : > { %v785_v2 = vsel %vm632_vm2, %v728_v61, 0.0  ;;  %v686_v17 = vsel %vm632_vm2, %v1421_v12, 0.0  ;;  %v688_v10 = vsel %vm632_vm2, %v1449_v47, 0.0  ;;  %v787_v14 = vsel %vm632_vm2, %v729_v3, 0.0 }
 0x134   : > { %v673_v37 = vadd.f32 %v672_v29, %v671_v32  ;;  %v772_v39 = vadd.f32 %v771_v33, %v770_v30  ;;  %v789_v15 = vsel %vm632_vm2, %v730_v5, 0.0  ;;  %v731_v16 = vmul.f32 %v1461_v56, %v1461_v56 }
 0x135   : > { %v732_v20 = vmul.f32 %v1443_v41, %v1443_v41  ;;  %v690_v12 = vsel %vm632_vm2, %v1461_v56, 0.0  ;;  %v692_v22 = vsel %vm632_vm2, %v1443_v41, 0.0  ;;  %v733_v23 = vmul.f32 %v1455_v51, %v1455_v51 }
 0x136   : > { %v774_v40 = vadd.f32 %v773_v34, %v772_v39  ;;  %v675_v42 = vadd.f32 %v674_v36, %v673_v37  ;;  %v791_v11 = vsel %vm632_vm2, %v731_v16, 0.0  ;;  %v694_v26 = vsel %vm632_vm2, %v1455_v51, 0.0 }
 0x137   : > { %v793_v62 = vsel %vm632_vm2, %v732_v20, 0.0  ;;  %v795_v28 = vsel %vm632_vm2, %v733_v23, 0.0 }
 0x138   : > { %v677_v49 = vadd.f32 %v676_v44, %v675_v42  ;;  %v776_v50 = vadd.f32 %v775_v46, %v774_v40 }
 0x13a   : > { %v778_v54 = vadd.f32 %v777_v52, %v776_v50  ;;  %v679_v31 = vadd.f32 %v678_v43, %v677_v49 }
 0x13c   : > { %v681_v59 = vadd.f32 %v680_v53, %v679_v31  ;;  %v780_v60 = vadd.f32 %v779_v55, %v778_v54 }
 0x13e   : > { %v782_v63 = vadd.f32 %v781_v57, %v780_v60  ;;  %v683_v0 = vadd.f32 %v682_v38, %v681_v59 }
 0x140   : > { %v685_v6 = vadd.f32 %v684_v8, %v683_v0  ;;  %v784_v9 = vadd.f32 %v783_v4, %v782_v63 }
 0x142   : > { %v786_v13 = vadd.f32 %v785_v2, %v784_v9  ;;  %v687_v1 = vadd.f32 %v686_v17, %v685_v6 }
 0x144   : > { %v689_v18 = vadd.f32 %v688_v10, %v687_v1  ;;  %v788_v19 = vadd.f32 %v787_v14, %v786_v13 }
 0x146   : > { %v790_v21 = vadd.f32 %v789_v15, %v788_v19  ;;  %v691_v47 = vadd.f32 %v690_v12, %v689_v18 }
 0x148   : > { %v693_v24 = vadd.f32 %v692_v22, %v691_v47  ;;  %v792_v25 = vadd.f32 %v791_v11, %v790_v21 }
 0x14a   : > { %v695_v27 = vadd.f32 %v694_v26, %v693_v24  ;;  %v794_v56 = vadd.f32 %v793_v62, %v792_v25 }
 0x14c   : > { %v696_v29 = vrot.slane %v695_v27, 4  ;;  %v796_v30 = vadd.f32 %v795_v28, %v794_v56 }
 0x14e   : > { %v697_v41 = vadd.f32 %v696_v29, %v695_v27  ;;  %v797_v32 = vrot.slane %v796_v30, 4 }
 0x150   : > { %v698_v33 = vrot.slane %v697_v41, 2  ;;  %v798_v34 = vadd.f32 %v797_v32, %v796_v30 }
 0x152   : > { %v699_v35 = vadd.f32 %v698_v33, %v697_v41  ;;  %v799_v37 = vrot.slane %v798_v34, 2 }
 0x154   : > { %v700_v39 = vrot.slane %v699_v35, 1  ;;  %v800_v7 = vadd.f32 %v799_v37, %v798_v34 }
 0x156   : > { %v801_v36 = vrot.slane %v800_v7, 1  ;;  %v701_v51 = vadd.f32 %v700_v39, %v699_v35 }
 0x158   : > { %v802_v40 = vadd.f32 %v801_v36, %v800_v7 }
 0x15a   : > { %v804_v42 = vsel %vm803_vm3, %v701_v51, %v802_v40 }
 0x15b   : > { %806 = vst.msk [vmem:[%s203_s9] sm:$0x3] %vm805_vm4, %v804_v42 }
 0x15c PF: > { %p14_p9 = scmp.ge.s32.totalorder %s1207_s17, 4   ;;  %s1599_s12 = smov %s1152_s13 }
 0x15d   : > { %s1600_s13 = smov %s1156_s14  ;;  %s1601_s14 = smov %s1217_s20 }
 0x15e   : > { %s1602_s15 = smov %s1207_s17  ;;  %16 = sbr.rel (!%p14_p9) target bundleno = 3 (0x3), region = 80 }
 0x165   :  { %843 = vsyncpa [#allocation3], 1 }
 0x166   :  { %845 = vsyncpa [#allocation3 + $0x1], 1 }

// kernel: bottleneck_pallas.6
= control target key start
LH: loop header
LB: loop body
LE: loop exit
PB: predicated region body
PF: predicated region fallthrough
CT: control target
= control target key end

     0   :  { %s1342_s18 = smov 0   ;;  %s1714_s0 = inlined_call_operand.vmem [shape: bf16[512,4], index: 0, kind: input, shape index: {}]   ;;  %s1715_s1 = inlined_call_operand.vmem [shape: f32[1,4], index: 1, kind: input, shape index: {}]   ;;  %s1716_s2 = inlined_call_operand.vmem [shape: f32[1,4], index: 2, kind: input, shape index: {}]   ;;  %s1717_s3 = inlined_call_operand.vmem [shape: bf16[4,16], index: 3, kind: input, shape index: {}]   ;;  %s1718_s4 = inlined_call_operand.vmem [shape: bf16[512,16], index: 4, kind: output, shape index: {0}]   ;;  %s1719_s5 = inlined_call_operand.vmem [shape: f32[2,2,16], index: 5, kind: output, shape index: {1}]  }
   0x1 LB: > { %s1348_s19 = sadd.s32 4294967295, %s1310_s18   ;;  %p1072_p0 = scmp.ge.s32.totalorder %s1310_s18, 1  ;;  %s1310_s18 = sphi %s1342_s18, %s16_s18  }
   0x2   : > { %p191_p1 = scmp.lt.s32.totalorder %s1310_s18, 3 }
   0x4   : > { %p192_p2 = pnand %p1072_p0, %p191_p1 }
   0x5   : > { %v430_v0 = vld [vmem:[%s1717_s3] sm:$0x3] (!%p192_p2)  ;;  %vm480_vm0 = vcmask (!%p192_p2), 1041408   ;;  %s1073_s22 = sshll.u32 (!%p192_p2), %s1348_s19, 5  ;;  %vm431_vm1 = vcmask (!%p192_p2), 31744   ;;  %vm773_vm2 = vcmask (!%p192_p2), 125952  }
   0x6   : > { %195 = sbr.rel (%p192_p2) target bundleno = 322 (0x142), region = 36  ;;  %1294 = vmatprep.subr.msk.bf16.mxu0 (!%p192_p2), %vm480_vm0, %v430_v0  ;;  %v482_v1 = vsel (!%p192_p2), %vm480_vm0, %v430_v0, 0  ;;  %p224_p3 = scmp.lt.s32.totalorder (!%p192_p2), %s1073_s22, 63  ;;  %1295 = vmatprep.subr.msk.bf16.mxu1 (!%p192_p2), %vm480_vm0, %v430_v0  ;;  %v1369_v2 = vld [vmem:[%s1715_s1] ss:$0 sm:$0xff] (!%p192_p2)  ;;  %vm806_vm3 = vcmask (!%p192_p2), 130048  }
   0x7   : > { %1259 = vmatpush3.bf16.msra.mxu0 (!%p192_p2), %v482_v1  ;;  %1293 = vmatpush3.bf16.msra.mxu1 (!%p192_p2), %v482_v1  ;;  %v1378_v11 = vld [vmem:[%s1716_s2] ss:$0 sm:$0xff] (!%p192_p2)  ;;  %p235_p4 = scmp.lt.s32.totalorder (!%p192_p2), %s1348_s19, 1  ;;  %vm977_vm4 = vcmask (!%p192_p2), 1040384   ;;  %vm979_vm5 = vcmask (!%p192_p2), 123904  }
   0xd   : > { %s1721_s22 = smov (!%p224_p3, %s1073_s22), 63  ;;  %s1723_s19 = smov (!%p235_p4, %s1348_s19), 1 }
   0xe   : > { %s1074_s23 = sshll.u32 %s1721_s22, 2  ;;  %s1077_s9 = sshll.u32 %s1723_s19, 1 }
   0xf   : > { %s1364_s26 = scalar_lea.vmem %s1714_s0, %s1074_s23  ;;  %s1485_s8 = scalar_lea.vmem %s1718_s4, %s1074_s23 }
  0x10   : > { %v1163_v3 = vld [vmem:[%s1364_s26] sm:$0xff]   ;;  %v1226_v4 = vld [vmem:[%s1364_s26 + $0x8] sm:$0xff]   ;;  %v1227_v5 = vld [vmem:[%s1364_s26 + $0x10] sm:$0xff]   ;;  %s238_s12 = scalar_lea.vmem %s1719_s5, %s1077_s9 }
  0x11   : > { %v1164_v6 = vunpack.c.l.bf16 %v1163_v3  ;;  %v1165_v7 = vunpack.c.h.bf16 %v1163_v3  ;;  %v1168_v8 = vunpack.c.l.bf16 %v1226_v4  ;;  %v1169_v9 = vunpack.c.h.bf16 %v1226_v4  ;;  %v1228_v10 = vld [vmem:[%s1364_s26 + $0x18] sm:$0xff]   ;;  %v1229_v32 = vld [vmem:[%s1364_s26 + $0x20] sm:$0xff]   ;;  %v1230_v37 = vld [vmem:[%s1364_s26 + $0x28] sm:$0xff]  }
  0x12   : > { %v1172_v12 = vunpack.c.l.bf16 %v1227_v5  ;;  %v1173_v13 = vunpack.c.h.bf16 %v1227_v5  ;;  %v1176_v14 = vunpack.c.l.bf16 %v1228_v10  ;;  %v1177_v15 = vunpack.c.h.bf16 %v1228_v10  ;;  %v1231_v42 = vld [vmem:[%s1364_s26 + $0x30] sm:$0xff]   ;;  %v1232_v47 = vld [vmem:[%s1364_s26 + $0x38] sm:$0xff]   ;;  %v1233_v5 = vld [vmem:[%s1364_s26 + $0x40] sm:$0xff]  }
  0x13   : > { %v312_v16 = vmul.f32 %v1164_v6, %v1369_v2  ;;  %v313_v17 = vmul.f32 %v1165_v7, %v1369_v2  ;;  %v314_v18 = vmul.f32 %v1168_v8, %v1369_v2  ;;  %v315_v19 = vmul.f32 %v1169_v9, %v1369_v2 }
  0x14   : > { %v316_v20 = vmul.f32 %v1172_v12, %v1369_v2  ;;  %v317_v21 = vmul.f32 %v1173_v13, %v1369_v2  ;;  %v318_v22 = vmul.f32 %v1176_v14, %v1369_v2  ;;  %v319_v23 = vmul.f32 %v1177_v15, %v1369_v2  ;;  %v1234_v15 = vld [vmem:[%s1364_s26 + $0x48] sm:$0xff]  }
  0x15   : > { %v350_v24 = vadd.f32 %v1378_v11, %v312_v16  ;;  %v351_v25 = vadd.f32 %v1378_v11, %v313_v17  ;;  %v352_v26 = vadd.f32 %v1378_v11, %v314_v18  ;;  %v353_v27 = vadd.f32 %v1378_v11, %v315_v19 }
  0x16   : > { %v354_v28 = vadd.f32 %v1378_v11, %v316_v20  ;;  %v355_v29 = vadd.f32 %v1378_v11, %v317_v21  ;;  %v356_v30 = vadd.f32 %v1378_v11, %v318_v22  ;;  %v357_v31 = vadd.f32 %v1378_v11, %v319_v23  ;;  %v1235_v20 = vld [vmem:[%s1364_s26 + $0x50] sm:$0xff]  }
  0x17   : > { %v382_v33 = vmax.f32 %v350_v24, 0.0  ;;  %v383_v34 = vmax.f32 %v351_v25, 0.0  ;;  %v384_v35 = vmax.f32 %v352_v26, 0.0  ;;  %v385_v36 = vmax.f32 %v353_v27, 0.0  ;;  %v1236_v24 = vld [vmem:[%s1364_s26 + $0x58] sm:$0xff]  }
  0x18   : > { %v386_v38 = vmax.f32 %v354_v28, 0.0  ;;  %v387_v39 = vmax.f32 %v355_v29, 0.0  ;;  %v388_v40 = vmax.f32 %v356_v30, 0.0  ;;  %v389_v41 = vmax.f32 %v357_v31, 0.0 }
  0x19   : > { %v414_v43 = vpack.c.bf16 %v383_v34, %v382_v33  ;;  %v415_v44 = vpack.c.bf16 %v385_v36, %v384_v35  ;;  %v1180_v45 = vunpack.c.l.bf16 %v1229_v32  ;;  %v1181_v46 = vunpack.c.h.bf16 %v1229_v32 }
  0x1a   : > { %v416_v48 = vpack.c.bf16 %v387_v39, %v386_v38  ;;  %v417_v49 = vpack.c.bf16 %v389_v41, %v388_v40  ;;  %v1184_v50 = vunpack.c.l.bf16 %v1230_v37  ;;  %v1185_v51 = vunpack.c.h.bf16 %v1230_v37  ;;  %v1237_v41 = vld [vmem:[%s1364_s26 + $0x60] sm:$0xff]  }
  0x1b   : > { %1260 = vmatprep.mubr.msk.bf16.mxu0 %vm431_vm1, %v414_v43  ;;  %v320_v52 = vmul.f32 %v1180_v45, %v1369_v2  ;;  %v321_v53 = vmul.f32 %v1181_v46, %v1369_v2  ;;  %v1188_v54 = vunpack.c.l.bf16 %v1231_v42  ;;  %v1189_v55 = vunpack.c.h.bf16 %v1231_v42 }
  0x1c   : > { %1261 = vmatmul.mubr.msk.bf16.vlgmr.msra.gmra.mrb[0].mxu0 %vm431_vm1, %v415_v44  ;;  %v322_v56 = vmul.f32 %v1184_v50, %v1369_v2  ;;  %v323_v57 = vmul.f32 %v1185_v51, %v1369_v2  ;;  %v1192_v58 = vunpack.c.l.bf16 %v1232_v47  ;;  %v1193_v59 = vunpack.c.h.bf16 %v1232_v47 }
  0x1d   : > { %1264 = vmatprep.mubr.msk.bf16.mxu0 %vm431_vm1, %v416_v48  ;;  %v358_v60 = vadd.f32 %v1378_v11, %v320_v52  ;;  %v359_v61 = vadd.f32 %v1378_v11, %v321_v53  ;;  %v324_v62 = vmul.f32 %v1188_v54, %v1369_v2  ;;  %v325_v63 = vmul.f32 %v1189_v55, %v1369_v2  ;;  %v1238_v54 = vld [vmem:[%s1364_s26 + $0x68] sm:$0xff]  }
  0x1e   : > { %v360_v0 = vadd.f32 %v1378_v11, %v322_v56  ;;  %v361_v1 = vadd.f32 %v1378_v11, %v323_v57  ;;  %v326_v3 = vmul.f32 %v1192_v58, %v1369_v2  ;;  %v327_v4 = vmul.f32 %v1193_v59, %v1369_v2  ;;  %v1239_v59 = vld [vmem:[%s1364_s26 + $0x70] sm:$0xff]  }
  0x1f   : > { %v390_v6 = vmax.f32 %v358_v60, 0.0  ;;  %v391_v7 = vmax.f32 %v359_v61, 0.0  ;;  %v362_v8 = vadd.f32 %v1378_v11, %v324_v62  ;;  %v363_v9 = vadd.f32 %v1378_v11, %v325_v63 }
  0x20   : > { %v392_v10 = vmax.f32 %v360_v0, 0.0  ;;  %v393_v12 = vmax.f32 %v361_v1, 0.0  ;;  %v1419_v13 = vadd.f32 %v1378_v11, %v326_v3  ;;  %v1422_v14 = vadd.f32 %v1378_v11, %v327_v4 }
  0x21   : > { %v418_v16 = vpack.c.bf16 %v391_v7, %v390_v6  ;;  %v394_v17 = vmax.f32 %v362_v8, 0.0  ;;  %v395_v18 = vmax.f32 %v363_v9, 0.0  ;;  %v1196_v19 = vunpack.c.l.bf16 %v1233_v5  ;;  %v1240_v9 = vld [vmem:[%s1364_s26 + $0x78] sm:$0xff]  }
  0x22   : > { %v419_v21 = vpack.c.bf16 %v393_v12, %v392_v10  ;;  %v396_v22 = vmax.f32 %v1419_v13, 0.0  ;;  %v1197_v23 = vunpack.c.h.bf16 %v1233_v5  ;;  %v397_v25 = vmax.f32 %v1422_v14, 0.0 }
  0x23   : > { %v328_v26 = vmul.f32 %v1196_v19, %v1369_v2  ;;  %v1200_v27 = vunpack.c.l.bf16 %v1234_v15  ;;  %v1201_v28 = vunpack.c.h.bf16 %v1234_v15  ;;  %v420_v29 = vpack.c.bf16 %v395_v18, %v394_v17 }
  0x24   : > { %1265 = vmatmul.mubr.msk.bf16.gmra.mrb[4].mxu0 %vm431_vm1, %v417_v49  ;;  %v329_v30 = vmul.f32 %v1197_v23, %v1369_v2  ;;  %v1204_v31 = vunpack.c.l.bf16 %v1235_v20  ;;  %v1205_v32 = vunpack.c.h.bf16 %v1235_v20  ;;  %v1208_v36 = vunpack.c.l.bf16 %v1236_v24 }
  0x25   : > { %1268 = vmatprep.mubr.msk.bf16.mxu0 %vm431_vm1, %v418_v16  ;;  %v366_v33 = vadd.f32 %v1378_v11, %v328_v26  ;;  %v330_v34 = vmul.f32 %v1200_v27, %v1369_v2  ;;  %v331_v35 = vmul.f32 %v1201_v28, %v1369_v2  ;;  %v1209_v40 = vunpack.c.h.bf16 %v1236_v24 }
  0x26   : > { %v367_v37 = vadd.f32 %v1378_v11, %v329_v30  ;;  %v332_v38 = vmul.f32 %v1204_v31, %v1369_v2  ;;  %v333_v39 = vmul.f32 %v1205_v32, %v1369_v2  ;;  %v334_v45 = vmul.f32 %v1208_v36, %v1369_v2 }
  0x27   : > { %v398_v42 = vmax.f32 %v366_v33, 0.0  ;;  %v368_v43 = vadd.f32 %v1378_v11, %v330_v34  ;;  %v369_v44 = vadd.f32 %v1378_v11, %v331_v35  ;;  %v335_v49 = vmul.f32 %v1209_v40, %v1369_v2 }
  0x28   : > { %v399_v46 = vmax.f32 %v367_v37, 0.0  ;;  %v370_v47 = vadd.f32 %v1378_v11, %v332_v38  ;;  %v371_v48 = vadd.f32 %v1378_v11, %v333_v39  ;;  %v372_v52 = vadd.f32 %v1378_v11, %v334_v45 }
  0x29   : > { %v400_v50 = vmax.f32 %v368_v43, 0.0  ;;  %v401_v51 = vmax.f32 %v369_v44, 0.0  ;;  %v1212_v53 = vunpack.c.l.bf16 %v1237_v41  ;;  %v373_v58 = vadd.f32 %v1378_v11, %v335_v49 }
  0x2a   : > { %v422_v55 = vpack.c.bf16 %v399_v46, %v398_v42  ;;  %v402_v56 = vmax.f32 %v370_v47, 0.0  ;;  %v403_v57 = vmax.f32 %v371_v48, 0.0  ;;  %v404_v61 = vmax.f32 %v372_v52, 0.0 }
  0x2b   : > { %v423_v60 = vpack.c.bf16 %v401_v51, %v400_v50  ;;  %v1213_v62 = vunpack.c.h.bf16 %v1237_v41  ;;  %v336_v63 = vmul.f32 %v1212_v53, %v1369_v2  ;;  %v405_v1 = vmax.f32 %v373_v58, 0.0 }
  0x2c   : > { %1269 = vmatmul.mubr.msk.bf16.gmra.mrb[8].mxu0 %vm431_vm1, %v419_v21  ;;  %1276 = vmatprep.mubr.msk.bf16.mxu1 %vm431_vm1, %v422_v55  ;;  %v424_v0 = vpack.c.bf16 %v403_v57, %v402_v56  ;;  %v1216_v3 = vunpack.c.l.bf16 %v1238_v54  ;;  %v1217_v4 = vunpack.c.h.bf16 %v1238_v54  ;;  %v1220_v7 = vunpack.c.l.bf16 %v1239_v59 }
  0x2d   : > { %1272 = vmatprep.mubr.msk.bf16.mxu0 %vm431_vm1, %v420_v29  ;;  %1277 = vmatmul.mubr.msk.bf16.vlgmr.msra.gmra.mrb[0].mxu1 %vm431_vm1, %v423_v60  ;;  %v337_v5 = vmul.f32 %v1213_v62, %v1369_v2  ;;  %v374_v6 = vadd.f32 %v1378_v11, %v336_v63  ;;  %v1221_v8 = vunpack.c.h.bf16 %v1239_v59  ;;  %v421_v18 = vpack.c.bf16 %v397_v25, %v396_v22 }
  0x2e   : > { %1280 = vmatprep.mubr.msk.bf16.mxu1 %vm431_vm1, %v424_v0  ;;  %v338_v10 = vmul.f32 %v1216_v3, %v1369_v2  ;;  %v339_v12 = vmul.f32 %v1217_v4, %v1369_v2  ;;  %v340_v16 = vmul.f32 %v1220_v7, %v1369_v2  ;;  %v425_v19 = vpack.c.bf16 %v405_v1, %v404_v61 }
  0x2f   : > { %v375_v14 = vadd.f32 %v1378_v11, %v337_v5  ;;  %v406_v15 = vmax.f32 %v374_v6, 0.0  ;;  %v341_v17 = vmul.f32 %v1221_v8, %v1369_v2  ;;  %v1224_v20 = vunpack.c.l.bf16 %v1240_v9 }
  0x30   : > { %v376_v23 = vadd.f32 %v1378_v11, %v338_v10  ;;  %v377_v24 = vadd.f32 %v1378_v11, %v339_v12  ;;  %v1225_v26 = vunpack.c.h.bf16 %v1240_v9  ;;  %v378_v27 = vadd.f32 %v1378_v11, %v340_v16 }
  0x31   : > { %v407_v21 = vmax.f32 %v375_v14, 0.0  ;;  %v379_v28 = vadd.f32 %v1378_v11, %v341_v17  ;;  %v342_v22 = vmul.f32 %v1224_v20, %v1369_v2 }
  0x32   : > { %v408_v30 = vmax.f32 %v376_v23, 0.0  ;;  %v409_v13 = vmax.f32 %v377_v24, 0.0  ;;  %v343_v25 = vmul.f32 %v1225_v26, %v1369_v2  ;;  %v410_v31 = vmax.f32 %v378_v27, 0.0 }
  0x33   : > { %v426_v29 = vpack.c.bf16 %v407_v21, %v406_v15  ;;  %v411_v32 = vmax.f32 %v379_v28, 0.0  ;;  %v380_v34 = vadd.f32 %v1378_v11, %v342_v22 }
  0x34   : > { %1273 = vmatmul.mubr.msk.bf16.gmra.mrb[12].mxu0 %vm431_vm1, %v421_v18  ;;  %v427_v33 = vpack.c.bf16 %v409_v13, %v408_v30  ;;  %v381_v35 = vadd.f32 %v1378_v11, %v343_v25 }
  0x35   : > { %1281 = vmatmul.mubr.msk.bf16.gmra.mrb[4].mxu1 %vm431_vm1, %v425_v19  ;;  %v428_v36 = vpack.c.bf16 %v411_v32, %v410_v31  ;;  %v412_v37 = vmax.f32 %v380_v34, 0.0 }
  0x36   : > { %1284 = vmatprep.mubr.msk.bf16.mxu1 %vm431_vm1, %v426_v29  ;;  %v413_v38 = vmax.f32 %v381_v35, 0.0 }
  0x38   : > { %v429_v39 = vpack.c.bf16 %v413_v38, %v412_v37 }
  0x3d   : > { %1285 = vmatmul.mubr.msk.bf16.gmra.mrb[8].mxu1 %vm431_vm1, %v427_v33 }
  0x3e   : > { %1288 = vmatprep.mubr.msk.bf16.mxu1 %vm431_vm1, %v428_v36 }
  0x45   : > { %1289 = vmatmul.mubr.msk.bf16.gmra.mrb[12].mxu1 %vm431_vm1, %v429_v39 }
  0xef   : > { %v1262_v2 = vpop.f32.mrb[0].mxu0 }
  0xf0   : > { %v1132_v11 = vpack.c.bf16 %v1262_v2, %v1262_v2  ;;  %v518_v40 = vpop.f32.mrb[1].mxu0  ;;  %v878_v44 = vmul.f32 %v1262_v2, %v1262_v2  ;;  %v810_v53 = vsel %vm806_vm3, %v1262_v2, 0.0 }
  0xf1   : > { %v1130_v41 = vpack.c.bf16 %v518_v40, %v518_v40  ;;  %v876_v42 = vmul.f32 %v518_v40, %v518_v40  ;;  %v1263_v43 = vpop.f32.mrb[2].mxu0  ;;  %v807_v47 = vsel %vm806_vm3, %v518_v40, 0.0 }
  0xf2   : > { %776 = vst.msk [vmem:[%s1485_s8 + $0x8] sm:$0xf] %vm773_vm2, %v1132_v11  ;;  %v1133_v45 = vpack.c.bf16 %v1263_v43, %v1263_v43  ;;  %v521_v46 = vpop.f32.mrb[3].mxu0  ;;  %v879_v51 = vmul.f32 %v1263_v43, %v1263_v43  ;;  %v911_v58 = vsel %vm806_vm3, %v878_v44, 0.0  ;;  %v812_v60 = vsel %vm806_vm3, %v1263_v43, 0.0 }
  0xf3   : > { %774 = vst.msk [vmem:[%s1485_s8] sm:$0xf] %vm773_vm2, %v1130_v41  ;;  %v1131_v48 = vpack.c.bf16 %v521_v46, %v521_v46  ;;  %v808_v49 = vsel %vm806_vm3, %v521_v46, 0.0  ;;  %v877_v50 = vmul.f32 %v521_v46, %v521_v46  ;;  %v908_v54 = vsel %vm806_vm3, %v876_v42, 0.0 }
  0xf4   : > { %777 = vst.msk [vmem:[%s1485_s8 + $0xc] sm:$0xf] %vm773_vm2, %v1133_v45  ;;  %v809_v52 = vadd.f32 %v808_v49, %v807_v47  ;;  %v913_v61 = vsel %vm806_vm3, %v879_v51, 0.0 }
  0xf5   : > { %775 = vst.msk [vmem:[%s1485_s8 + $0x4] sm:$0xf] %vm773_vm2, %v1131_v48  ;;  %v909_v55 = vsel %vm806_vm3, %v877_v50, 0.0 }
  0xf6   : > { %v811_v56 = vadd.f32 %v810_v53, %v809_v52  ;;  %v910_v57 = vadd.f32 %v909_v55, %v908_v54 }
  0xf7   : > { %v1266_v59 = vpop.f32.mrb[4].mxu0 }
  0xf8   : > { %v912_v62 = vadd.f32 %v911_v58, %v910_v57  ;;  %v1136_v63 = vpack.c.bf16 %v1266_v59, %v1266_v59  ;;  %v534_v0 = vpop.f32.mrb[5].mxu0  ;;  %v813_v3 = vadd.f32 %v812_v60, %v811_v56  ;;  %v882_v15 = vmul.f32 %v1266_v59, %v1266_v59 }
  0xf9   : > { %v1134_v1 = vpack.c.bf16 %v534_v0, %v534_v0  ;;  %v814_v4 = vsel %vm806_vm3, %v534_v0, 0.0  ;;  %v880_v5 = vmul.f32 %v534_v0, %v534_v0  ;;  %v1267_v6 = vpop.f32.mrb[6].mxu0  ;;  %v818_v20 = vsel %vm806_vm3, %v1266_v59, 0.0 }
  0xfa   : > { %780 = vst.msk [vmem:[%s1485_s8 + $0x18] sm:$0xf] %vm773_vm2, %v1136_v63  ;;  %v914_v7 = vadd.f32 %v913_v61, %v912_v62  ;;  %v1137_v8 = vpack.c.bf16 %v1267_v6, %v1267_v6  ;;  %v537_v9 = vpop.f32.mrb[7].mxu0  ;;  %v815_v10 = vadd.f32 %v814_v4, %v813_v3  ;;  %v883_v21 = vmul.f32 %v1267_v6, %v1267_v6 }
  0xfb   : > { %778 = vst.msk [vmem:[%s1485_s8 + $0x10] sm:$0xf] %vm773_vm2, %v1134_v1  ;;  %v915_v12 = vsel %vm806_vm3, %v880_v5, 0.0  ;;  %v1135_v14 = vpack.c.bf16 %v537_v9, %v537_v9  ;;  %v816_v17 = vsel %vm806_vm3, %v537_v9, 0.0  ;;  %v881_v18 = vmul.f32 %v537_v9, %v537_v9 }
  0xfc   : > { %v916_v16 = vadd.f32 %v915_v12, %v914_v7  ;;  %781 = vst.msk [vmem:[%s1485_s8 + $0x1c] sm:$0xf] %vm773_vm2, %v1137_v8  ;;  %v817_v19 = vadd.f32 %v816_v17, %v815_v10  ;;  %v919_v28 = vsel %vm806_vm3, %v882_v15, 0.0  ;;  %v820_v29 = vsel %vm806_vm3, %v1267_v6, 0.0 }
  0xfd   : > { %779 = vst.msk [vmem:[%s1485_s8 + $0x14] sm:$0xf] %vm773_vm2, %v1135_v14  ;;  %v917_v23 = vsel %vm806_vm3, %v881_v18, 0.0  ;;  %v921_v36 = vsel %vm806_vm3, %v883_v21, 0.0 }
  0xfe   : > { %v819_v24 = vadd.f32 %v818_v20, %v817_v19  ;;  %v918_v26 = vadd.f32 %v917_v23, %v916_v16 }
  0xff   : > { %v1270_v27 = vpop.f32.mrb[8].mxu0 }
 0x100   : > { %v1140_v30 = vpack.c.bf16 %v1270_v27, %v1270_v27  ;;  %v550_v13 = vpop.f32.mrb[9].mxu0  ;;  %v1518_v22 = vpop.f32.mrb[0].mxu1  ;;  %v920_v25 = vadd.f32 %v919_v28, %v918_v26  ;;  %v821_v32 = vadd.f32 %v820_v29, %v819_v24  ;;  %v886_v11 = vmul.f32 %v1270_v27, %v1270_v27 }
 0x101   : > { %v1138_v31 = vpack.c.bf16 %v550_v13, %v550_v13  ;;  %v822_v33 = vsel %vm806_vm3, %v550_v13, 0.0  ;;  %v1271_v34 = vpop.f32.mrb[10].mxu0  ;;  %v1521_v35 = vpop.f32.mrb[1].mxu1  ;;  %v884_v37 = vmul.f32 %v550_v13, %v550_v13  ;;  %v1148_v47 = vpack.c.bf16 %v1518_v22, %v1518_v22 }
 0x102   : > { %784 = vst.msk [vmem:[%s1485_s8 + $0x28] sm:$0xf] %vm773_vm2, %v1140_v30  ;;  %v1141_v38 = vpack.c.bf16 %v1271_v34, %v1271_v34  ;;  %v553_v39 = vpop.f32.mrb[11].mxu0  ;;  %v1526_v2 = vpop.f32.mrb[2].mxu1  ;;  %v823_v40 = vadd.f32 %v822_v33, %v821_v32  ;;  %v922_v41 = vadd.f32 %v921_v36, %v920_v25  ;;  %v826_v50 = vsel %vm806_vm3, %v1270_v27, 0.0 }
 0x103   : > { %782 = vst.msk [vmem:[%s1485_s8 + $0x20] sm:$0xf] %vm773_vm2, %v1138_v31  ;;  %v1139_v42 = vpack.c.bf16 %v553_v39, %v553_v39  ;;  %v1530_v43 = vpop.f32.mrb[3].mxu1  ;;  %v923_v44 = vsel %vm806_vm3, %v884_v37, 0.0  ;;  %v824_v45 = vsel %vm806_vm3, %v553_v39, 0.0  ;;  %v885_v46 = vmul.f32 %v553_v39, %v553_v39 }
 0x104   : > { %785 = vst.msk [vmem:[%s1485_s8 + $0x2c] sm:$0xf] %vm773_vm2, %v1141_v38  ;;  %v924_v48 = vadd.f32 %v923_v44, %v922_v41  ;;  %v825_v49 = vadd.f32 %v824_v45, %v823_v40  ;;  %v887_v51 = vmul.f32 %v1271_v34, %v1271_v34  ;;  %792 = vst.msk [vmem:[%s1485_s8 + $0x48] sm:$0xf] %vm773_vm2, %v1148_v47  ;;  %v927_v58 = vsel %vm806_vm3, %v886_v11, 0.0 }
 0x105   : > { %783 = vst.msk [vmem:[%s1485_s8 + $0x24] sm:$0xf] %vm773_vm2, %v1139_v42  ;;  %v925_v52 = vsel %vm806_vm3, %v885_v46, 0.0  ;;  %v1146_v53 = vpack.c.bf16 %v1521_v35, %v1521_v35  ;;  %v1149_v57 = vpack.c.bf16 %v1526_v2, %v1526_v2  ;;  %v828_v59 = vsel %vm806_vm3, %v1271_v34, 0.0 }
 0x106   : > { %v827_v54 = vadd.f32 %v826_v50, %v825_v49  ;;  %v926_v55 = vadd.f32 %v925_v52, %v924_v48  ;;  %v929_v6 = vsel %vm806_vm3, %v887_v51, 0.0  ;;  %v892_v24 = vmul.f32 %v1521_v35, %v1521_v35 }
 0x107   : > { %v1274_v56 = vpop.f32.mrb[12].mxu0  ;;  %790 = vst.msk [vmem:[%s1485_s8 + $0x40] sm:$0xf] %vm773_vm2, %v1146_v53  ;;  %793 = vst.msk [vmem:[%s1485_s8 + $0x4c] sm:$0xf] %vm773_vm2, %v1149_v57  ;;  %v1147_v29 = vpack.c.bf16 %v1530_v43, %v1530_v43  ;;  %v838_v33 = vsel %vm806_vm3, %v1521_v35, 0.0  ;;  %v893_v35 = vmul.f32 %v1530_v43, %v1530_v43  ;;  %v894_v48 = vmul.f32 %v1518_v22, %v1518_v22 }
 0x108   : > { %v1144_v60 = vpack.c.bf16 %v1274_v56, %v1274_v56  ;;  %v566_v61 = vpop.f32.mrb[13].mxu0  ;;  %v1552_v62 = vpop.f32.mrb[4].mxu1  ;;  %v928_v63 = vadd.f32 %v927_v58, %v926_v55  ;;  %v829_v1 = vadd.f32 %v828_v59, %v827_v54  ;;  %v890_v17 = vmul.f32 %v1274_v56, %v1274_v56 }
 0x109   : > { %v1142_v0 = vpack.c.bf16 %v566_v61, %v566_v61  ;;  %v830_v3 = vsel %vm806_vm3, %v566_v61, 0.0  ;;  %v1275_v4 = vpop.f32.mrb[14].mxu0  ;;  %v1557_v5 = vpop.f32.mrb[5].mxu1  ;;  %v888_v7 = vmul.f32 %v566_v61, %v566_v61  ;;  %v834_v26 = vsel %vm806_vm3, %v1274_v56, 0.0  ;;  %791 = vst.msk [vmem:[%s1485_s8 + $0x44] sm:$0xf] %vm773_vm2, %v1147_v29 }
 0x10a   : > { %788 = vst.msk [vmem:[%s1485_s8 + $0x38] sm:$0xf] %vm773_vm2, %v1144_v60  ;;  %v1145_v8 = vpack.c.bf16 %v1275_v4, %v1275_v4  ;;  %v569_v9 = vpop.f32.mrb[15].mxu0  ;;  %v1562_v10 = vpop.f32.mrb[6].mxu1  ;;  %v831_v12 = vadd.f32 %v830_v3, %v829_v1  ;;  %v930_v14 = vadd.f32 %v929_v6, %v928_v63  ;;  %v891_v27 = vmul.f32 %v1275_v4, %v1275_v4 }
 0x10b   : > { %786 = vst.msk [vmem:[%s1485_s8 + $0x30] sm:$0xf] %vm773_vm2, %v1142_v0  ;;  %v1143_v15 = vpack.c.bf16 %v569_v9, %v569_v9  ;;  %v1566_v16 = vpop.f32.mrb[7].mxu1  ;;  %v931_v18 = vsel %vm806_vm3, %v888_v7, 0.0  ;;  %v832_v19 = vsel %vm806_vm3, %v569_v9, 0.0  ;;  %v889_v20 = vmul.f32 %v569_v9, %v569_v9 }
 0x10c   : > { %789 = vst.msk [vmem:[%s1485_s8 + $0x3c] sm:$0xf] %vm773_vm2, %v1145_v8  ;;  %v932_v21 = vadd.f32 %v931_v18, %v930_v14  ;;  %v833_v23 = vadd.f32 %v832_v19, %v831_v12  ;;  %v1152_v25 = vpack.c.bf16 %v1552_v62, %v1552_v62  ;;  %v935_v31 = vsel %vm806_vm3, %v890_v17, 0.0 }
 0x10d   : > { %787 = vst.msk [vmem:[%s1485_s8 + $0x34] sm:$0xf] %vm773_vm2, %v1143_v15  ;;  %v933_v28 = vsel %vm806_vm3, %v889_v20, 0.0  ;;  %v836_v32 = vsel %vm806_vm3, %v1275_v4, 0.0  ;;  %v1150_v34 = vpack.c.bf16 %v1557_v5, %v1557_v5  ;;  %v937_v11 = vsel %vm806_vm3, %v891_v27, 0.0 }
 0x10e   : > { %v835_v30 = vadd.f32 %v834_v26, %v833_v23  ;;  %v934_v13 = vadd.f32 %v933_v28, %v932_v21  ;;  %796 = vst.msk [vmem:[%s1485_s8 + $0x58] sm:$0xf] %vm773_vm2, %v1152_v25  ;;  %v939_v40 = vsel %vm806_vm3, %v892_v24, 0.0  ;;  %v1153_v41 = vpack.c.bf16 %v1562_v10, %v1562_v10 }
 0x10f   : > { %794 = vst.msk [vmem:[%s1485_s8 + $0x50] sm:$0xf] %vm773_vm2, %v1150_v34  ;;  %v1151_v46 = vpack.c.bf16 %v1566_v16, %v1566_v16  ;;  %v840_v49 = vsel %vm806_vm3, %v1530_v43, 0.0  ;;  %v842_v51 = vsel %vm806_vm3, %v1518_v22, 0.0  ;;  %v895_v54 = vmul.f32 %v1526_v2, %v1526_v2 }
 0x110   : > { %v1590_v36 = vpop.f32.mrb[8].mxu1  ;;  %v936_v37 = vadd.f32 %v935_v31, %v934_v13  ;;  %v837_v38 = vadd.f32 %v836_v32, %v835_v30  ;;  %797 = vst.msk [vmem:[%s1485_s8 + $0x5c] sm:$0xf] %vm773_vm2, %v1153_v41  ;;  %v941_v55 = vsel %vm806_vm3, %v893_v35, 0.0  ;;  %v896_v43 = vmul.f32 %v1557_v5, %v1557_v5 }
 0x111   : > { %v1594_v39 = vpop.f32.mrb[9].mxu1  ;;  %v1156_v50 = vpack.c.bf16 %v1590_v36, %v1590_v36  ;;  %795 = vst.msk [vmem:[%s1485_s8 + $0x54] sm:$0xf] %vm773_vm2, %v1151_v46  ;;  %v943_v59 = vsel %vm806_vm3, %v894_v48, 0.0  ;;  %v844_v60 = vsel %vm806_vm3, %v1526_v2, 0.0  ;;  %v846_v61 = vsel %vm806_vm3, %v1557_v5, 0.0 }
 0x112   : > { %v1604_v42 = vpop.f32.mrb[10].mxu1  ;;  %v839_v44 = vadd.f32 %v838_v33, %v837_v38  ;;  %v938_v45 = vadd.f32 %v937_v11, %v936_v37  ;;  %v1154_v56 = vpack.c.bf16 %v1594_v39, %v1594_v39  ;;  %v945_v6 = vsel %vm806_vm3, %v895_v54, 0.0 }
 0x113   : > { %v1608_v47 = vpop.f32.mrb[11].mxu1  ;;  %800 = vst.msk [vmem:[%s1485_s8 + $0x68] sm:$0xf] %vm773_vm2, %v1156_v50  ;;  %v1157_v58 = vpack.c.bf16 %v1604_v42, %v1604_v42  ;;  %v947_v2 = vsel %vm806_vm3, %v896_v43, 0.0  ;;  %v897_v5 = vmul.f32 %v1566_v16, %v1566_v16  ;;  %v898_v17 = vmul.f32 %v1552_v62, %v1552_v62 }
 0x114   : > { %v940_v52 = vadd.f32 %v939_v40, %v938_v45  ;;  %v841_v53 = vadd.f32 %v840_v49, %v839_v44  ;;  %798 = vst.msk [vmem:[%s1485_s8 + $0x60] sm:$0xf] %vm773_vm2, %v1154_v56  ;;  %v1155_v63 = vpack.c.bf16 %v1608_v47, %v1608_v47  ;;  %v848_v18 = vsel %vm806_vm3, %v1566_v16, 0.0 }
 0x115   : > { %801 = vst.msk [vmem:[%s1485_s8 + $0x6c] sm:$0xf] %vm773_vm2, %v1157_v58  ;;  %v850_v20 = vsel %vm806_vm3, %v1552_v62, 0.0  ;;  %v899_v24 = vmul.f32 %v1562_v10, %v1562_v10  ;;  %v949_v26 = vsel %vm806_vm3, %v897_v5, 0.0  ;;  %v900_v27 = vmul.f32 %v1594_v39, %v1594_v39 }
 0x116   : > { %v843_v57 = vadd.f32 %v842_v51, %v841_v53  ;;  %v942_v22 = vadd.f32 %v941_v55, %v940_v52  ;;  %799 = vst.msk [vmem:[%s1485_s8 + $0x64] sm:$0xf] %vm773_vm2, %v1155_v63  ;;  %v951_v30 = vsel %vm806_vm3, %v898_v17, 0.0  ;;  %v852_v62 = vsel %vm806_vm3, %v1562_v10, 0.0 }
 0x117   : > { %v854_v13 = vsel %vm806_vm3, %v1594_v39, 0.0  ;;  %v953_v32 = vsel %vm806_vm3, %v899_v24, 0.0  ;;  %v955_v33 = vsel %vm806_vm3, %v900_v27, 0.0  ;;  %v901_v34 = vmul.f32 %v1608_v47, %v1608_v47 }
 0x118   : > { %v1642_v0 = vpop.f32.mrb[12].mxu1  ;;  %v944_v1 = vadd.f32 %v943_v59, %v942_v22  ;;  %v845_v3 = vadd.f32 %v844_v60, %v843_v57  ;;  %v902_v11 = vmul.f32 %v1590_v36, %v1590_v36  ;;  %v856_v10 = vsel %vm806_vm3, %v1608_v47, 0.0 }
 0x119   : > { %v630_v4 = vpop.f32.mrb[13].mxu1  ;;  %v1160_v7 = vpack.c.bf16 %v1642_v0, %v1642_v0  ;;  %v858_v35 = vsel %vm806_vm3, %v1590_v36, 0.0  ;;  %v903_v41 = vmul.f32 %v1604_v42, %v1604_v42  ;;  %v957_v44 = vsel %vm806_vm3, %v901_v34, 0.0 }
 0x11a   : > { %v1291_v8 = vpop.f32.mrb[14].mxu1  ;;  %v847_v9 = vadd.f32 %v846_v61, %v845_v3  ;;  %v946_v12 = vadd.f32 %v945_v6, %v944_v1  ;;  %v1158_v14 = vpack.c.bf16 %v630_v4, %v630_v4  ;;  %v904_v45 = vmul.f32 %v630_v4, %v630_v4 }
 0x11b   : > { %v633_v15 = vpop.f32.mrb[15].mxu1  ;;  %804 = vst.msk [vmem:[%s1485_s8 + $0x78] sm:$0xf] %vm773_vm2, %v1160_v7  ;;  %v1161_v19 = vpack.c.bf16 %v1291_v8, %v1291_v8  ;;  %v959_v49 = vsel %vm806_vm3, %v902_v11, 0.0  ;;  %v860_v50 = vsel %vm806_vm3, %v1604_v42, 0.0  ;;  %v862_v47 = vsel %vm806_vm3, %v630_v4, 0.0 }
 0x11c   : > { %v948_v21 = vadd.f32 %v947_v2, %v946_v12  ;;  %v849_v23 = vadd.f32 %v848_v18, %v847_v9  ;;  %802 = vst.msk [vmem:[%s1485_s8 + $0x70] sm:$0xf] %vm773_vm2, %v1158_v14  ;;  %v1159_v16 = vpack.c.bf16 %v633_v15, %v633_v15  ;;  %v961_v53 = vsel %vm806_vm3, %v903_v41, 0.0 }
 0x11d   : > { %805 = vst.msk [vmem:[%s1485_s8 + $0x7c] sm:$0xf] %vm773_vm2, %v1161_v19  ;;  %v963_v36 = vsel %vm806_vm3, %v904_v45, 0.0  ;;  %v905_v54 = vmul.f32 %v633_v15, %v633_v15  ;;  %v906_v56 = vmul.f32 %v1642_v0, %v1642_v0  ;;  %v864_v57 = vsel %vm806_vm3, %v633_v15, 0.0 }
 0x11e   : > { %v851_v28 = vadd.f32 %v850_v20, %v849_v23  ;;  %v950_v29 = vadd.f32 %v949_v26, %v948_v21  ;;  %803 = vst.msk [vmem:[%s1485_s8 + $0x74] sm:$0xf] %vm773_vm2, %v1159_v16  ;;  %v866_v42 = vsel %vm806_vm3, %v1642_v0, 0.0  ;;  %v907_v59 = vmul.f32 %v1291_v8, %v1291_v8 }
 0x11f   : > { %v965_v60 = vsel %vm806_vm3, %v905_v54, 0.0  ;;  %v967_v1 = vsel %vm806_vm3, %v906_v56, 0.0  ;;  %v868_v3 = vsel %vm806_vm3, %v1291_v8, 0.0 }
 0x120   : > { %v952_v25 = vadd.f32 %v951_v30, %v950_v29  ;;  %v853_v31 = vadd.f32 %v852_v62, %v851_v28  ;;  %v969_v2 = vsel %vm806_vm3, %v907_v59, 0.0 }
 0x122   : > { %v855_v37 = vadd.f32 %v854_v13, %v853_v31  ;;  %v954_v38 = vadd.f32 %v953_v32, %v952_v25 }
 0x124   : > { %v956_v39 = vadd.f32 %v955_v33, %v954_v38  ;;  %v857_v40 = vadd.f32 %v856_v10, %v855_v37 }
 0x126   : > { %v859_v46 = vadd.f32 %v858_v35, %v857_v40  ;;  %v958_v48 = vadd.f32 %v957_v44, %v956_v39 }
 0x128   : > { %v960_v51 = vadd.f32 %v959_v49, %v958_v48  ;;  %v861_v52 = vadd.f32 %v860_v50, %v859_v46 }
 0x12a   : > { %v863_v55 = vadd.f32 %v862_v47, %v861_v52  ;;  %v962_v43 = vadd.f32 %v961_v53, %v960_v51 }
 0x12c   : > { %v964_v22 = vadd.f32 %v963_v36, %v962_v43  ;;  %v865_v58 = vadd.f32 %v864_v57, %v863_v55 }
 0x12e   : > { %v867_v61 = vadd.f32 %v866_v42, %v865_v58  ;;  %v966_v63 = vadd.f32 %v965_v60, %v964_v22 }
 0x130   : > { %v869_v4 = vadd.f32 %v868_v3, %v867_v61  ;;  %v968_v6 = vadd.f32 %v967_v1, %v966_v63 }
 0x132   : > { %v870_v5 = vrot.slane %v869_v4, 4  ;;  %v970_v7 = vadd.f32 %v969_v2, %v968_v6 }
 0x134   : > { %v871_v9 = vadd.f32 %v870_v5, %v869_v4  ;;  %v971_v12 = vrot.slane %v970_v7, 4 }
 0x136   : > { %v872_v0 = vrot.slane %v871_v9, 2  ;;  %v972_v14 = vadd.f32 %v971_v12, %v970_v7 }
 0x138   : > { %v873_v15 = vadd.f32 %v872_v0, %v871_v9  ;;  %v973_v17 = vrot.slane %v972_v14, 2 }
 0x13a   : > { %v874_v18 = vrot.slane %v873_v15, 1  ;;  %v974_v19 = vadd.f32 %v973_v17, %v972_v14 }
 0x13c   : > { %v975_v20 = vrot.slane %v974_v19, 1  ;;  %v875_v8 = vadd.f32 %v874_v18, %v873_v15 }
 0x13e   : > { %v976_v21 = vadd.f32 %v975_v20, %v974_v19 }
 0x140   : > { %v978_v23 = vsel %vm977_vm4, %v875_v8, %v976_v21 }
 0x141   : > { %980 = vst.msk [vmem:[%s238_s12] sm:$0x3] %vm979_vm5, %v978_v23 }
 0x142 PF: > { %s16_s18 = sadd.s32 1, %s1310_s18  }
 0x143   : > { %p13_p5 = scmp.ge.s32.totalorder %s16_s18, 4  }
 0x145   :  { %15 = sbr.rel (!%p13_p5) target bundleno = 1 (0x1), region = 78 }

// kernel: bottleneck_pallas.5
= control target key start
LH: loop header
LB: loop body
LE: loop exit
PB: predicated region body
PF: predicated region fallthrough
CT: control target
= control target key end

     0   :  { %s2534_s18 = smov 0   ;;  %s3226_s0 = inlined_call_operand.vmem [shape: bf16[2,16,16,4], index: 0, kind: input, shape index: {}]   ;;  %s3227_s1 = inlined_call_operand.vmem [shape: f32[1,4], index: 1, kind: input, shape index: {}]   ;;  %s3228_s2 = inlined_call_operand.vmem [shape: f32[1,4], index: 2, kind: input, shape index: {}]   ;;  %s3229_s3 = inlined_call_operand.vmem [shape: bf16[36,4], index: 3, kind: input, shape index: {}]   ;;  %s3230_s4 = inlined_call_operand.vmem [shape: bf16[2,256,4], index: 4, kind: output, shape index: {0}]   ;;  %s3231_s5 = inlined_call_operand.vmem [shape: f32[2,2,4], index: 5, kind: output, shape index: {1}]  }
   0x1 LB: > { %s2224_s19 = sadd.s32 4294967295, %s2493_s18   ;;  %p2228_p0 = scmp.ge.s32.totalorder %s2493_s18, 1  ;;  %s2493_s18 = sphi %s2534_s18, %s16_s18  }
   0x2   : > { %p190_p1 = scmp.lt.s32.totalorder %s2493_s18, 3 }
   0x4   : > { %p191_p2 = pnand %p2228_p0, %p190_p1 }
   0x5   : > { %vm411_vm0 = vcmask (!%p191_p2), 31744   ;;  %vm414_vm1 = vcmask (!%p191_p2), 25600   ;;  %vm420_vm2 = vcmask (!%p191_p2), 24576   ;;  %v2495_v0 = vmov (!%p191_p2), 0.0   ;;  %p222_p3 = scmp.lt.s32.totalorder (!%p191_p2), %s2224_s19, 1  ;;  %s2496_s28 = smov (!%p191_p2), 4  }
   0x6   : > { %194 = sbr.rel (%p191_p2) target bundleno = 641 (0x281), region = 36  ;;  %412 = vst.msk [vmem:[#allocation2] sm:$0xff] (!%p191_p2), %vm411_vm0, %v2495_v0  ;;  %413 = vst.msk [vmem:[#allocation2 + $0x8] sm:$0xff] (!%p191_p2), %vm411_vm0, %v2495_v0  ;;  %v2601_v1 = vld [vmem:[%s3227_s1] ss:$0 sm:$0xff] (!%p191_p2)  ;;  %s2497_s29 = smov (!%p191_p2), 8  }
   0x7   : > { %415 = vst.msk [vmem:[#allocation2 + $0x10] sm:$0x3] (!%p191_p2), %vm414_vm1, %v2495_v0  ;;  %419 = vst.msk [vmem:[#allocation2 + $0x1a8] sm:$0x3] (!%p191_p2), %vm414_vm1, %v2495_v0  ;;  %v2609_v14 = vld [vmem:[%s3228_s2] ss:$0 sm:$0xff] (!%p191_p2) }
   0x8   : > { %417 = vst.msk [vmem:[#allocation2 + $0x198] sm:$0xff] (!%p191_p2), %vm411_vm0, %v2495_v0  ;;  %418 = vst.msk [vmem:[#allocation2 + $0x1a0] sm:$0xff] (!%p191_p2), %vm411_vm0, %v2495_v0  ;;  %s2498_s30 = smov (!%p191_p2), 12   ;;  %s2499_s6 = smov (!%p191_p2), 16   ;;  %vm1639_vm3 = vcmask (!%p191_p2), 1041408   ;;  %vm1355_vm4 = vcmask (!%p191_p2), 64512  }
   0x9   : > { %422 = vst.msk [vmem:[#allocation2 + $0x18] sm:$0x1] (!%p191_p2), %vm420_vm2, %v2495_v0  ;;  %423 = vst.msk [vmem:[#allocation2 + $0x30] sm:$0x1] (!%p191_p2), %vm420_vm2, %v2495_v0  ;;  %s2500_s7 = smov (!%p191_p2), 20   ;;  %s2501_s12 = smov (!%p191_p2), 24  }
   0xa   : > { %424 = vst.msk [vmem:[#allocation2 + $0x48] sm:$0x1] (!%p191_p2), %vm420_vm2, %v2495_v0  ;;  %425 = vst.msk [vmem:[#allocation2 + $0x60] sm:$0x1] (!%p191_p2), %vm420_vm2, %v2495_v0  ;;  %s2502_s15 = smov (!%p191_p2), 28   ;;  %s2503_s16 = smov (!%p191_p2), 32  }
   0xb   : > { %426 = vst.msk [vmem:[#allocation2 + $0x78] sm:$0x1] (!%p191_p2), %vm420_vm2, %v2495_v0  ;;  %427 = vst.msk [vmem:[#allocation2 + $0x90] sm:$0x1] (!%p191_p2), %vm420_vm2, %v2495_v0  ;;  %vm1388_vm5 = vcmask (!%p191_p2), 97280   ;;  %vm1421_vm6 = vcmask (!%p191_p2), 130048  }
   0xc   : > { %428 = vst.msk [vmem:[#allocation2 + $0xa8] sm:$0x1] (!%p191_p2), %vm420_vm2, %v2495_v0  ;;  %429 = vst.msk [vmem:[#allocation2 + $0xc0] sm:$0x1] (!%p191_p2), %vm420_vm2, %v2495_v0  ;;  %vm1454_vm7 = vcmask (!%p191_p2), 162816   ;;  %vm1487_vm8 = vcmask (!%p191_p2), 195584  }
   0xd   : > { %430 = vst.msk [vmem:[#allocation2 + $0xd8] sm:$0x1] %vm420_vm2, %v2495_v0  ;;  %431 = vst.msk [vmem:[#allocation2 + $0xf0] sm:$0x1] %vm420_vm2, %v2495_v0  ;;  %s3233_s19 = smov (!%p222_p3, %s2224_s19), 1  ;;  %v586_v5 = vld [vmem:[#allocation2 + $0x2] sm:$0xff] }
   0xe   : > { %432 = vst.msk [vmem:[#allocation2 + $0x108] sm:$0x1] %vm420_vm2, %v2495_v0  ;;  %433 = vst.msk [vmem:[#allocation2 + $0x120] sm:$0x1] %vm420_vm2, %v2495_v0  ;;  %s2289_s20 = sshll.u32 %s3233_s19, 7  ;;  %v538_v6 = vld [vmem:[#allocation2 + $0x1] sm:$0xff] }
   0xf   : > { %434 = vst.msk [vmem:[#allocation2 + $0x138] sm:$0x1] %vm420_vm2, %v2495_v0  ;;  %435 = vst.msk [vmem:[#allocation2 + $0x150] sm:$0x1] %vm420_vm2, %v2495_v0  ;;  %s2596_s23 = scalar_lea.vmem %s3226_s0, %s2289_s20  ;;  %v539_v7 = vld [vmem:[#allocation2 + $0x9] sm:$0xff]  ;;  %vm1520_vm9 = vcmask 228352   ;;  %s3072_s22 = scalar_lea.vmem %s3230_s4, %s2289_s20 }
  0x10   : > { %436 = vst.msk [vmem:[#allocation2 + $0x168] sm:$0x1] %vm420_vm2, %v2495_v0  ;;  %437 = vst.msk [vmem:[#allocation2 + $0x180] sm:$0x1] %vm420_vm2, %v2495_v0  ;;  %v2324_v2 = vld [vmem:[%s2596_s23] sm:$0xff]   ;;  %v2387_v3 = vld [vmem:[%s2596_s23 + $0x8] sm:$0xff]   ;;  %v570_v13 = vpack.c.bf16 %v539_v7, %v538_v6 }
  0x11   : > { %440 = vst.msk [vmem:[#allocation2 + $0x29] sm:$0x1] %vm420_vm2, %v2495_v0  ;;  %441 = vst.msk [vmem:[#allocation2 + $0x41] sm:$0x1] %vm420_vm2, %v2495_v0  ;;  %v2388_v4 = vld [vmem:[%s2596_s23 + $0x10] sm:$0xff]   ;;  %v2325_v8 = vunpack.c.l.bf16 %v2324_v2  ;;  %v2326_v9 = vunpack.c.h.bf16 %v2324_v2  ;;  %v2329_v10 = vunpack.c.l.bf16 %v2387_v3  ;;  %v2330_v11 = vunpack.c.h.bf16 %v2387_v3  ;;  %v2389_v17 = vld [vmem:[%s2596_s23 + $0x18] sm:$0xff]  }
  0x12   : > { %442 = vst.msk [vmem:[#allocation2 + $0x59] sm:$0x1] %vm420_vm2, %v2495_v0  ;;  %443 = vst.msk [vmem:[#allocation2 + $0x71] sm:$0x1] %vm420_vm2, %v2495_v0  ;;  %v2333_v15 = vunpack.c.l.bf16 %v2388_v4  ;;  %v2334_v16 = vunpack.c.h.bf16 %v2388_v4  ;;  %939 = vrot.lane.b32.xlu0 %v570_v13, %s2496_s28  ;;  %v2337_v25 = vunpack.c.l.bf16 %v2389_v17  ;;  %v2338_v29 = vunpack.c.h.bf16 %v2389_v17  ;;  %v2390_v34 = vld [vmem:[%s2596_s23 + $0x20] sm:$0xff]   ;;  %v2391_v35 = vld [vmem:[%s2596_s23 + $0x28] sm:$0xff]  }
  0x13   : > { %444 = vst.msk [vmem:[#allocation2 + $0x89] sm:$0x1] %vm420_vm2, %v2495_v0  ;;  %445 = vst.msk [vmem:[#allocation2 + $0xa1] sm:$0x1] %vm420_vm2, %v2495_v0  ;;  %v309_v19 = vmul.f32 %v2325_v8, %v2601_v1  ;;  %v310_v20 = vmul.f32 %v2326_v9, %v2601_v1  ;;  %v311_v21 = vmul.f32 %v2329_v10, %v2601_v1  ;;  %v2392_v40 = vld [vmem:[%s2596_s23 + $0x30] sm:$0xff]   ;;  %v2341_v46 = vunpack.c.l.bf16 %v2390_v34  ;;  %v2393_v49 = vld [vmem:[%s2596_s23 + $0x38] sm:$0xff]  }
  0x14   : > { %446 = vst.msk [vmem:[#allocation2 + $0xb9] sm:$0x1] %vm420_vm2, %v2495_v0  ;;  %447 = vst.msk [vmem:[#allocation2 + $0xd1] sm:$0x1] %vm420_vm2, %v2495_v0  ;;  %v312_v22 = vmul.f32 %v2330_v11, %v2601_v1  ;;  %v313_v23 = vmul.f32 %v2333_v15, %v2601_v1  ;;  %v314_v24 = vmul.f32 %v2334_v16, %v2601_v1  ;;  %v2342_v47 = vunpack.c.h.bf16 %v2390_v34  ;;  %v2394_v7 = vld [vmem:[%s2596_s23 + $0x40] sm:$0xff]   ;;  %s2233_s20 = sshll.u32 %s3233_s19, 1 }
  0x15   : > { %448 = vst.msk [vmem:[#allocation2 + $0xe9] sm:$0x1] %vm420_vm2, %v2495_v0  ;;  %449 = vst.msk [vmem:[#allocation2 + $0x101] sm:$0x1] %vm420_vm2, %v2495_v0  ;;  %v347_v26 = vadd.f32 %v2609_v14, %v309_v19  ;;  %v348_v27 = vadd.f32 %v2609_v14, %v310_v20  ;;  %v349_v28 = vadd.f32 %v2609_v14, %v311_v21  ;;  %v2345_v48 = vunpack.c.l.bf16 %v2391_v35  ;;  %s235_s25 = scalar_lea.vmem %s3231_s5, %s2233_s20 }
  0x16   : > { %450 = vst.msk [vmem:[#allocation2 + $0x119] sm:$0x1] %vm420_vm2, %v2495_v0  ;;  %451 = vst.msk [vmem:[#allocation2 + $0x131] sm:$0x1] %vm420_vm2, %v2495_v0  ;;  %v350_v30 = vadd.f32 %v2609_v14, %v312_v22  ;;  %v351_v31 = vadd.f32 %v2609_v14, %v313_v23  ;;  %v352_v32 = vadd.f32 %v2609_v14, %v314_v24  ;;  %v2346_v51 = vunpack.c.h.bf16 %v2391_v35 }
  0x17   : > { %452 = vst.msk [vmem:[#allocation2 + $0x149] sm:$0x1] %vm420_vm2, %v2495_v0  ;;  %453 = vst.msk [vmem:[#allocation2 + $0x161] sm:$0x1] %vm420_vm2, %v2495_v0  ;;  %v315_v33 = vmul.f32 %v2337_v25, %v2601_v1  ;;  %v379_v36 = vmax.f32 %v347_v26, 0.0  ;;  %v380_v37 = vmax.f32 %v348_v27, 0.0  ;;  %v316_v39 = vmul.f32 %v2338_v29, %v2601_v1 }
  0x18   : > { %454 = vst.msk [vmem:[#allocation2 + $0x179] sm:$0x1] %vm420_vm2, %v2495_v0  ;;  %455 = vst.msk [vmem:[#allocation2 + $0x191] sm:$0x1] %vm420_vm2, %v2495_v0  ;;  %v381_v38 = vmax.f32 %v349_v28, 0.0  ;;  %v382_v41 = vmax.f32 %v350_v30, 0.0  ;;  %v2349_v52 = vunpack.c.l.bf16 %v2392_v40  ;;  %v2350_v53 = vunpack.c.h.bf16 %v2392_v40 }
  0x19   : > { %439 = vst.msk [vmem:[#allocation2 + $0x11] sm:$0x1] %vm420_vm2, %v2495_v0  ;;  %421 = vst.msk [vmem:[#allocation2] sm:$0x1] %vm420_vm2, %v2495_v0  ;;  %v383_v42 = vmax.f32 %v351_v31, 0.0  ;;  %v384_v43 = vmax.f32 %v352_v32, 0.0  ;;  %v353_v44 = vadd.f32 %v2609_v14, %v315_v33  ;;  %v354_v45 = vadd.f32 %v2609_v14, %v316_v39 }
  0x1a   : > { %456 = vst.msk [vmem:[#allocation2 + $0x1a9] sm:$0x1] %vm420_vm2, %v2495_v0  ;;  %438 = vst.msk [vmem:[#allocation2 + $0x198] sm:$0x1] %vm420_vm2, %v2495_v0  ;;  %v317_v55 = vmul.f32 %v2341_v46, %v2601_v1  ;;  %v318_v56 = vmul.f32 %v2342_v47, %v2601_v1  ;;  %v319_v57 = vmul.f32 %v2345_v48, %v2601_v1  ;;  %v2353_v61 = vunpack.c.l.bf16 %v2393_v49 }
  0x1b   : > { %458 = vst.msk [vmem:[#allocation2 + $0x19] sm:$0xff] %vm411_vm0, %v379_v36  ;;  %459 = vst.msk [vmem:[#allocation2 + $0x21] sm:$0xff] %vm411_vm0, %v380_v37  ;;  %v385_v50 = vmax.f32 %v353_v44, 0.0  ;;  %v386_v54 = vmax.f32 %v354_v45, 0.0  ;;  %v320_v58 = vmul.f32 %v2346_v51, %v2601_v1  ;;  %v321_v59 = vmul.f32 %v2349_v52, %v2601_v1 }
  0x1c   : > { %460 = vst.msk [vmem:[#allocation2 + $0x31] sm:$0xff] %vm411_vm0, %v381_v38  ;;  %461 = vst.msk [vmem:[#allocation2 + $0x39] sm:$0xff] %vm411_vm0, %v382_v41  ;;  %v322_v60 = vmul.f32 %v2350_v53, %v2601_v1  ;;  %v355_v62 = vadd.f32 %v2609_v14, %v317_v55  ;;  %v356_v63 = vadd.f32 %v2609_v14, %v318_v56  ;;  %v2354_v2 = vunpack.c.h.bf16 %v2393_v49  ;;  %v2395_v38 = vld [vmem:[%s2596_s23 + $0x48] sm:$0xff]  }
  0x1d   : > { %462 = vst.msk [vmem:[#allocation2 + $0x49] sm:$0xff] %vm411_vm0, %v383_v42  ;;  %463 = vst.msk [vmem:[#allocation2 + $0x51] sm:$0xff] %vm411_vm0, %v384_v43  ;;  %v357_v0 = vadd.f32 %v2609_v14, %v319_v57  ;;  %v358_v3 = vadd.f32 %v2609_v14, %v320_v58  ;;  %v359_v4 = vadd.f32 %v2609_v14, %v321_v59  ;;  %v2357_v25 = vunpack.c.l.bf16 %v2394_v7 }
  0x1e   : > { %464 = vst.msk [vmem:[#allocation2 + $0x61] sm:$0xff] %vm411_vm0, %v385_v50  ;;  %465 = vst.msk [vmem:[#allocation2 + $0x69] sm:$0xff] %vm411_vm0, %v386_v54  ;;  %v323_v6 = vmul.f32 %v2353_v61, %v2601_v1  ;;  %v387_v8 = vmax.f32 %v355_v62, 0.0  ;;  %v388_v9 = vmax.f32 %v356_v63, 0.0  ;;  %v324_v11 = vmul.f32 %v2354_v2, %v2601_v1  ;;  %v2485_v61 = vld [vmem:[%s3229_s3 + $0x8] sm:$0xff]   ;;  %v2396_v63 = vld [vmem:[%s2596_s23 + $0x50] sm:$0xff]  }
  0x1f   : > { %v389_v10 = vmax.f32 %v357_v0, 0.0  ;;  %v390_v16 = vmax.f32 %v358_v3, 0.0  ;;  %v391_v17 = vmax.f32 %v359_v4, 0.0  ;;  %v2358_v30 = vunpack.c.h.bf16 %v2394_v7  ;;  %v2486_v0 = vld [vmem:[%s3229_s3 + $0x10] ss:$0 sps:$4 sm:$0x33]  }
  0x20   : > { %v587_v12 = vld [vmem:[#allocation2 + $0xa] sm:$0xff]  ;;  %v361_v19 = vadd.f32 %v2609_v14, %v323_v6  ;;  %466 = vst.msk [vmem:[#allocation2 + $0x79] sm:$0xff] %vm411_vm0, %v387_v8  ;;  %467 = vst.msk [vmem:[#allocation2 + $0x81] sm:$0xff] %vm411_vm0, %v388_v9  ;;  %v362_v24 = vadd.f32 %v2609_v14, %v324_v11  ;;  %v325_v33 = vmul.f32 %v2357_v25, %v2601_v1  ;;  %v2361_v43 = vunpack.c.l.bf16 %v2395_v38  ;;  %v2397_v4 = vld [vmem:[%s2596_s23 + $0x58] sm:$0xff]  }
  0x21   : > { %v618_v18 = vpack.c.bf16 %v587_v12, %v586_v5  ;;  %v360_v5 = vadd.f32 %v2609_v14, %v322_v60  ;;  %468 = vst.msk [vmem:[#allocation2 + $0x91] sm:$0xff] %vm411_vm0, %v389_v10  ;;  %469 = vst.msk [vmem:[#allocation2 + $0x99] sm:$0xff] %vm411_vm0, %v390_v16  ;;  %v326_v37 = vmul.f32 %v2358_v30, %v2601_v1  ;;  %v2362_v44 = vunpack.c.h.bf16 %v2395_v38  ;;  %v2484_v60 = vld [vmem:[%s3229_s3] sm:$0xff]  }
  0x22   : > { %v588_v12 = vld [vmem:[#allocation2 + $0x1a] sm:$0xff]  ;;  %v589_v13 = vld [vmem:[#allocation2 + $0x22] sm:$0xff]  ;;  %470 = vst.msk [vmem:[#allocation2 + $0xa9] sm:$0xff] %vm411_vm0, %v391_v17  ;;  %v393_v29 = vmax.f32 %v361_v19, 0.0  ;;  %v394_v32 = vmax.f32 %v362_v24, 0.0  ;;  %v363_v39 = vadd.f32 %v2609_v14, %v325_v33  ;;  %v327_v48 = vmul.f32 %v2361_v43, %v2601_v1  ;;  %2421 = vmatprep.subr.bf16.mxu0 %v2484_v60  ;;  %2459 = vmatprep.subr.bf16.mxu1 %v2484_v60 }
  0x23   : > { %987 = vrot.lane.b32.xlu1 %v618_v18, %s2497_s29  ;;  %v540_v15 = vld [vmem:[#allocation2 + $0x19] sm:$0xff]  ;;  %v392_v18 = vmax.f32 %v360_v5, 0.0  ;;  %v619_v20 = vpack.c.bf16 %v589_v13, %v588_v12  ;;  %v541_v21 = vld [vmem:[#allocation2 + $0x21] sm:$0xff]  ;;  %v636_v22 = vld [vmem:[#allocation2 + $0x30] sm:$0xff]  ;;  %v364_v40 = vadd.f32 %v2609_v14, %v326_v37  ;;  %v328_v49 = vmul.f32 %v2362_v44, %v2601_v1  ;;  %2422 = vmatpush3.bf16.msra.mxu0 %v2484_v60 }
  0x24   : > { %v637_v23 = vld [vmem:[#allocation2 + $0x38] sm:$0xff]  ;;  %v571_v26 = vpack.c.bf16 %v541_v21, %v540_v15  ;;  %v635_v28 = vld [vmem:[#allocation2 + $0x20] sm:$0xff]  ;;  %472 = vst.msk [vmem:[#allocation2 + $0xc1] sm:$0xff] %vm411_vm0, %v393_v29  ;;  %473 = vst.msk [vmem:[#allocation2 + $0xc9] sm:$0xff] %vm411_vm0, %v394_v32  ;;  %v395_v42 = vmax.f32 %v363_v39, 0.0  ;;  %v365_v51 = vadd.f32 %v2609_v14, %v327_v48  ;;  %2423 = vmatprep.subr.bf16.mxu0 %v2485_v61  ;;  %v2365_v2 = vunpack.c.l.bf16 %v2396_v63 }
  0x25   : > { %v634_v27 = vld [vmem:[#allocation2 + $0x18] sm:$0xff]  ;;  %471 = vst.msk [vmem:[#allocation2 + $0xb1] sm:$0xff] %vm411_vm0, %v392_v18  ;;  %v2666_v31 = vpack.c.bf16 %v637_v23, %v636_v22  ;;  %v396_v47 = vmax.f32 %v364_v40, 0.0  ;;  %v366_v52 = vadd.f32 %v2609_v14, %v328_v49  ;;  %v781_v53 = vld [vmem:[#allocation2 + $0x48] sm:$0xff]  ;;  %v782_v54 = vld [vmem:[#allocation2 + $0x50] sm:$0xff]  ;;  %v2366_v3 = vunpack.c.h.bf16 %v2396_v63  ;;  %2462 = vmatpush3.bf16.msra.mxu1 %v2484_v60 }
  0x26   : > { %941 = vrot.lane.b32.xlu0 %v571_v26, %s2496_s28  ;;  %v2670_v34 = vpack.c.bf16 %v635_v28, %v634_v27  ;;  %v684_v35 = vld [vmem:[#allocation2 + $0x31] sm:$0xff]  ;;  %v685_v36 = vld [vmem:[#allocation2 + $0x39] sm:$0xff]  ;;  %474 = vst.msk [vmem:[#allocation2 + $0xd9] sm:$0xff] %vm411_vm0, %v395_v42  ;;  %v397_v55 = vmax.f32 %v365_v51, 0.0  ;;  %v2697_v57 = vpack.c.bf16 %v782_v54, %v781_v53  ;;  %v829_v58 = vld [vmem:[#allocation2 + $0x49] sm:$0xff]  ;;  %v329_v5 = vmul.f32 %v2365_v2, %v2601_v1 }
  0x27   : > { %989 = vrot.lane.b32.xlu1 %v619_v20, %s2497_s29  ;;  %v2680_v41 = vpack.c.bf16 %v685_v36, %v684_v35  ;;  %v732_v45 = vld [vmem:[#allocation2 + $0x32] sm:$0xff]  ;;  %v733_v46 = vld [vmem:[#allocation2 + $0x3a] sm:$0xff]  ;;  %475 = vst.msk [vmem:[#allocation2 + $0xe1] sm:$0xff] %vm411_vm0, %v396_v47  ;;  %v398_v56 = vmax.f32 %v366_v52, 0.0  ;;  %v330_v6 = vmul.f32 %v2366_v3, %v2601_v1  ;;  %v2369_v7 = vunpack.c.l.bf16 %v2397_v4  ;;  %2460 = vmatprep.subr.bf16.mxu1 %v2485_v61  ;;  %v877_v11 = vld [vmem:[#allocation2 + $0x4a] sm:$0xff] }
  0x28   : > { %v2690_v50 = vpack.c.bf16 %v733_v46, %v732_v45  ;;  %476 = vst.msk [vmem:[#allocation2 + $0xf1] sm:$0xff] %vm411_vm0, %v397_v55  ;;  %v830_v59 = vld [vmem:[#allocation2 + $0x51] sm:$0xff]  ;;  %v2370_v8 = vunpack.c.h.bf16 %v2397_v4  ;;  %2424 = vmatpush3.bf16.msra.mxu0 %v2485_v61  ;;  %v1641_v9 = vsel %vm1639_vm3, %v2486_v0, 0  ;;  %v367_v10 = vadd.f32 %v2609_v14, %v329_v5  ;;  %v640_v24 = vld [vmem:[#allocation2 + $0x60] sm:$0xff]  ;;  %v641_v25 = vld [vmem:[#allocation2 + $0x68] sm:$0xff] }
  0x29   : > { %477 = vst.msk [vmem:[#allocation2 + $0xf9] sm:$0xff] %vm411_vm0, %v398_v56  ;;  %v2710_v62 = vpack.c.bf16 %v830_v59, %v829_v58  ;;  %2465 = vmatprep.subr.msk.bf16.mxu0 %vm1639_vm3, %v2486_v0  ;;  %v878_v12 = vld [vmem:[#allocation2 + $0x52] sm:$0xff]  ;;  %v368_v13 = vadd.f32 %v2609_v14, %v330_v6  ;;  %v331_v15 = vmul.f32 %v2369_v7, %v2601_v1  ;;  %v688_v30 = vld [vmem:[#allocation2 + $0x61] sm:$0xff]  ;;  %v689_v32 = vld [vmem:[#allocation2 + $0x69] sm:$0xff]  ;;  %vm1553_vm10 = vcmask 261120  }
  0x2a   : > { %1035 = vrot.lane.b32.xlu0 %v2670_v34, %s2498_s30  ;;  %v332_v16 = vmul.f32 %v2370_v8, %v2601_v1  ;;  %2463 = vmatpush3.bf16.msra.mxu1 %v2485_v61  ;;  %v399_v17 = vmax.f32 %v367_v10, 0.0  ;;  %v908_v21 = vpack.c.bf16 %v878_v12, %v877_v11  ;;  %v2747_v29 = vpack.c.bf16 %v641_v25, %v640_v24  ;;  %v736_v39 = vld [vmem:[#allocation2 + $0x62] sm:$0xff]  ;;  %v737_v40 = vld [vmem:[#allocation2 + $0x6a] sm:$0xff]  ;;  %v785_v44 = vld [vmem:[#allocation2 + $0x78] sm:$0xff] }
  0x2b   : > { %1037 = vrot.lane.b32.xlu1 %v2666_v31, %s2498_s30  ;;  %2466 = vmatprep.subr.msk.bf16.mxu1 %vm1639_vm3, %v2486_v0  ;;  %v400_v18 = vmax.f32 %v368_v13, 0.0  ;;  %v369_v19 = vadd.f32 %v2609_v14, %v331_v15  ;;  %v717_v38 = vpack.c.bf16 %v689_v32, %v688_v30  ;;  %v765_v43 = vpack.c.bf16 %v737_v40, %v736_v39  ;;  %v786_v45 = vld [vmem:[#allocation2 + $0x80] sm:$0xff]  ;;  %v644_v63 = vld [vmem:[#allocation2 + $0x90] sm:$0xff]  ;;  %v645_v0 = vld [vmem:[#allocation2 + $0x98] sm:$0xff] }
  0x2c   : > { %2426 = vmatpush3.bf16.msra.mxu0 %v1641_v9  ;;  %478 = vst.msk [vmem:[#allocation2 + $0x109] sm:$0xff] %vm411_vm0, %v399_v17  ;;  %v2765_v46 = vpack.c.bf16 %v786_v45, %v785_v44  ;;  %v833_v47 = vld [vmem:[#allocation2 + $0x79] sm:$0xff]  ;;  %v834_v48 = vld [vmem:[#allocation2 + $0x81] sm:$0xff]  ;;  %v2400_v2 = vld [vmem:[%s2596_s23 + $0x70] sm:$0xff]   ;;  %v2787_v5 = vpack.c.bf16 %v645_v0, %v644_v63  ;;  %vm1606_vm11 = vcmask 293888   ;;  %vm1932_vm12 = vcmask 27648  }
  0x2d   : > { %479 = vst.msk [vmem:[#allocation2 + $0x111] sm:$0xff] %vm411_vm0, %v400_v18  ;;  %v401_v22 = vmax.f32 %v369_v19, 0.0  ;;  %v862_v49 = vpack.c.bf16 %v834_v48, %v833_v47  ;;  %v881_v55 = vld [vmem:[#allocation2 + $0x7a] sm:$0xff]  ;;  %v882_v56 = vld [vmem:[#allocation2 + $0x82] sm:$0xff]  ;;  %v2381_v3 = vunpack.c.l.bf16 %v2400_v2  ;;  %v2382_v4 = vunpack.c.h.bf16 %v2400_v2  ;;  %v692_v6 = vld [vmem:[#allocation2 + $0x91] sm:$0xff] }
  0x2e   : > { %1083 = vrot.lane.b32.xlu0 %v571_v26, %s2499_s6  ;;  %2464 = vmatpush3.bf16.msra.mxu1 %v1641_v9  ;;  %v2398_v26 = vld [vmem:[%s2596_s23 + $0x60] sm:$0xff]   ;;  %v910_v60 = vpack.c.bf16 %v882_v56, %v881_v55  ;;  %v740_v13 = vld [vmem:[#allocation2 + $0x92] sm:$0xff]  ;;  %v789_v19 = vld [vmem:[#allocation2 + $0xa8] sm:$0xff]  ;;  %vm2135_vm13 = vcmask 1040384  }
  0x2f   : > { %1085 = vrot.lane.b32.xlu1 %v2680_v41, %s2499_s6  ;;  %480 = vst.msk [vmem:[#allocation2 + $0x121] sm:$0xff] %vm411_vm0, %v401_v22  ;;  %v2373_v27 = vunpack.c.l.bf16 %v2398_v26  ;;  %v2374_v28 = vunpack.c.h.bf16 %v2398_v26  ;;  %v693_v7 = vld [vmem:[#allocation2 + $0x99] sm:$0xff]  ;;  %v337_v8 = vmul.f32 %v2381_v3, %v2601_v1  ;;  %v338_v9 = vmul.f32 %v2382_v4, %v2601_v1  ;;  %v837_v22 = vld [vmem:[#allocation2 + $0xa9] sm:$0xff] }
  0x30   : > { %v719_v12 = vpack.c.bf16 %v693_v7, %v692_v6  ;;  %v741_v15 = vld [vmem:[#allocation2 + $0x9a] sm:$0xff]  ;;  %v885_v32 = vld [vmem:[#allocation2 + $0xaa] sm:$0xff]  ;;  %v744_v44 = vld [vmem:[#allocation2 + $0xc2] sm:$0xff] }
  0x31   : > { %v333_v33 = vmul.f32 %v2373_v27, %v2601_v1  ;;  %v334_v35 = vmul.f32 %v2374_v28, %v2601_v1  ;;  %v375_v10 = vadd.f32 %v2609_v14, %v337_v8  ;;  %v376_v11 = vadd.f32 %v2609_v14, %v338_v9  ;;  %v2401_v25 = vld [vmem:[%s2596_s23 + $0x78] sm:$0xff]   ;;  %v649_v40 = vld [vmem:[#allocation2 + $0xc8] sm:$0xff]  ;;  %v490_v4 = vld [vmem:[#allocation2] sm:$0xff] }
  0x32   : > { %1131 = vrot.lane.b32.xlu0 %v619_v20, %s2500_s7  ;;  %v370_v20 = vadd.f32 %v2609_v14, %v332_v16  ;;  %v767_v18 = vpack.c.bf16 %v741_v15, %v740_v13  ;;  %v2385_v26 = vunpack.c.l.bf16 %v2401_v25  ;;  %v2386_v27 = vunpack.c.h.bf16 %v2401_v25  ;;  %v745_v45 = vld [vmem:[#allocation2 + $0xca] sm:$0xff]  ;;  %v793_v48 = vld [vmem:[#allocation2 + $0xd8] sm:$0xff] }
  0x33   : > { %1133 = vrot.lane.b32.xlu1 %v2690_v50, %s2500_s7  ;;  %v371_v36 = vadd.f32 %v2609_v14, %v333_v33  ;;  %v372_v37 = vadd.f32 %v2609_v14, %v334_v35  ;;  %v407_v16 = vmax.f32 %v375_v10, 0.0  ;;  %v408_v17 = vmax.f32 %v376_v11, 0.0  ;;  %v886_v33 = vld [vmem:[#allocation2 + $0xb2] sm:$0xff]  ;;  %v491_v3 = vld [vmem:[#allocation2 + $0x8] sm:$0xff] }
  0x34   : > { %v402_v23 = vmax.f32 %v370_v20, 0.0  ;;  %v790_v20 = vld [vmem:[#allocation2 + $0xb0] sm:$0xff]  ;;  %v339_v28 = vmul.f32 %v2385_v26, %v2601_v1  ;;  %v340_v30 = vmul.f32 %v2386_v27, %v2601_v1  ;;  %v769_v47 = vpack.c.bf16 %v745_v45, %v744_v44  ;;  %v653_v7 = vld [vmem:[#allocation2 + $0xf8] sm:$0xff] }
  0x35   : > { %v404_v42 = vmax.f32 %v372_v37, 0.0  ;;  %486 = vst.msk [vmem:[#allocation2 + $0x169] sm:$0xff] %vm411_vm0, %v407_v16  ;;  %487 = vst.msk [vmem:[#allocation2 + $0x171] sm:$0xff] %vm411_vm0, %v408_v17  ;;  %v912_v37 = vpack.c.bf16 %v886_v33, %v885_v32  ;;  %v652_v6 = vld [vmem:[#allocation2 + $0xf0] sm:$0xff]  ;;  %v522_v9 = vpack.c.bf16 %v491_v3, %v490_v4  ;;  %v701_v13 = vld [vmem:[#allocation2 + $0xf9] sm:$0xff] }
  0x36   : > { %1179 = vrot.lane.b32.xlu0 %v2666_v31, %s2501_s12  ;;  %481 = vst.msk [vmem:[#allocation2 + $0x129] sm:$0xff] %vm411_vm0, %v402_v23  ;;  %v838_v23 = vld [vmem:[#allocation2 + $0xb1] sm:$0xff]  ;;  %v377_v35 = vadd.f32 %v2609_v14, %v339_v28  ;;  %v2841_v11 = vpack.c.bf16 %v653_v7, %v652_v6  ;;  %v797_v32 = vld [vmem:[#allocation2 + $0x108] sm:$0xff] }
  0x37   : > { %1181 = vrot.lane.b32.xlu1 %v2697_v57, %s2501_s12  ;;  %483 = vst.msk [vmem:[#allocation2 + $0x141] sm:$0xff] %vm411_vm0, %v404_v42  ;;  %v864_v24 = vpack.c.bf16 %v838_v23, %v837_v22  ;;  %v697_v42 = vld [vmem:[#allocation2 + $0xc9] sm:$0xff]  ;;  %v704_v3 = vld [vmem:[#allocation2 + $0x121] sm:$0xff] }
  0x38   : > { %v798_v33 = vld [vmem:[#allocation2 + $0x110] sm:$0xff] }
  0x3a   : > { %1227 = vrot.lane.b32.xlu0 %v2680_v41, %s2502_s15 }
  0x3b   : > { %1229 = vrot.lane.b32.xlu1 %v2710_v62, %s2502_s15 }
  0x3d   : > { %v705_v4 = vld [vmem:[#allocation2 + $0x129] sm:$0xff] }
  0x3e   : > { %1275 = vrot.lane.b32.xlu0 %v2690_v50, %s2503_s16 }
  0x3f   : > { %943 = vrot.lane.b32.xlu1 %v2680_v41, %s2496_s28  ;;  %v403_v41 = vmax.f32 %v371_v36, 0.0  ;;  %v378_v36 = vadd.f32 %v2609_v14, %v340_v30 }
  0x41   : > { %482 = vst.msk [vmem:[#allocation2 + $0x139] sm:$0xff] %vm411_vm0, %v403_v41  ;;  %v410_v39 = vmax.f32 %v378_v36, 0.0  ;;  %v696_v41 = vld [vmem:[#allocation2 + $0xc1] sm:$0xff] }
  0x42   : > { %1277 = vrot.lane.b32.xlu0 %v908_v21, %s2503_s16 }
  0x43   : > { %945 = vrot.lane.b32.xlu1 %v2710_v62, %s2496_s28  ;;  %489 = vst.msk [vmem:[#allocation2 + $0x189] sm:$0xff] %vm411_vm0, %v410_v39 }
  0x46   : > { %991 = vrot.lane.b32.xlu0 %v2690_v50, %s2497_s29  ;;  %v2399_v50 = vld [vmem:[%s2596_s23 + $0x68] sm:$0xff]  }
  0x47   : > { %993 = vrot.lane.b32.xlu1 %v908_v21, %s2497_s29  ;;  %v2377_v51 = vunpack.c.l.bf16 %v2399_v50  ;;  %v2378_v52 = vunpack.c.h.bf16 %v2399_v50 }
  0x49   : > { %v335_v53 = vmul.f32 %v2377_v51, %v2601_v1  ;;  %v336_v54 = vmul.f32 %v2378_v52, %v2601_v1  ;;  %v648_v1 = vld [vmem:[#allocation2 + $0xc0] sm:$0xff] }
  0x4a   : > { %1039 = vrot.lane.b32.xlu0 %v2697_v57, %s2498_s30 }
  0x4b   : > { %1041 = vrot.lane.b32.xlu1 %v2747_v29, %s2498_s30  ;;  %v373_v58 = vadd.f32 %v2609_v14, %v335_v53  ;;  %v374_v59 = vadd.f32 %v2609_v14, %v336_v54  ;;  %v673_v14 = vpack.c.bf16 %v649_v40, %v648_v1  ;;  %v841_v53 = vld [vmem:[#allocation2 + $0xd9] sm:$0xff]  ;;  %v842_v54 = vld [vmem:[#allocation2 + $0xe1] sm:$0xff] }
  0x4c   : > { %v866_v55 = vpack.c.bf16 %v842_v54, %v841_v53  ;;  %v893_v54 = vld [vmem:[#allocation2 + $0x10a] sm:$0xff] }
  0x4d   : > { %v405_v61 = vmax.f32 %v373_v58, 0.0 }
  0x4e   : > { %1087 = vrot.lane.b32.xlu0 %v2710_v62, %s2499_s6  ;;  %v406_v62 = vmax.f32 %v374_v59, 0.0 }
  0x4f   : > { %1089 = vrot.lane.b32.xlu1 %v717_v38, %s2499_s6  ;;  %484 = vst.msk [vmem:[#allocation2 + $0x151] sm:$0xff] %vm411_vm0, %v405_v61  ;;  %v890_v61 = vld [vmem:[#allocation2 + $0xe2] sm:$0xff] }
  0x50   : > { %485 = vst.msk [vmem:[#allocation2 + $0x159] sm:$0xff] %vm411_vm0, %v406_v62 }
  0x52   : > { %1135 = vrot.lane.b32.xlu0 %v908_v21, %s2500_s7  ;;  %v2803_v21 = vpack.c.bf16 %v790_v20, %v789_v19  ;;  %v748_v19 = vld [vmem:[#allocation2 + $0xf2] sm:$0xff]  ;;  %v749_v20 = vld [vmem:[#allocation2 + $0xfa] sm:$0xff] }
  0x53   : > { %1137 = vrot.lane.b32.xlu1 %v765_v43, %s2500_s7  ;;  %v771_v28 = vpack.c.bf16 %v749_v20, %v748_v19 }
  0x56   : > { %1183 = vrot.lane.b32.xlu0 %v2747_v29, %s2501_s12 }
  0x57   : > { %1185 = vrot.lane.b32.xlu1 %v2765_v46, %s2501_s12 }
  0x5a   : > { %1231 = vrot.lane.b32.xlu0 %v717_v38, %s2502_s15 }
  0x5b   : > { %1233 = vrot.lane.b32.xlu1 %v862_v49, %s2502_s15 }
  0x5e   : > { %1279 = vrot.lane.b32.xlu0 %v765_v43, %s2503_s16 }
  0x5f   : > { %947 = vrot.lane.b32.xlu1 %v717_v38, %s2496_s28  ;;  %v409_v38 = vmax.f32 %v377_v35, 0.0 }
  0x61   : > { %488 = vst.msk [vmem:[#allocation2 + $0x181] sm:$0xff] %vm411_vm0, %v409_v38 }
  0x62   : > { %1281 = vrot.lane.b32.xlu0 %v910_v60, %s2503_s16 }
  0x63   : > { %949 = vrot.lane.b32.xlu1 %v862_v49, %s2496_s28 }
  0x66   : > { %995 = vrot.lane.b32.xlu0 %v765_v43, %s2497_s29  ;;  %v721_v43 = vpack.c.bf16 %v697_v42, %v696_v41  ;;  %v845_v42 = vld [vmem:[#allocation2 + $0x109] sm:$0xff] }
  0x67   : > { %997 = vrot.lane.b32.xlu1 %v910_v60, %s2497_s29 }
  0x6a   : > { %1043 = vrot.lane.b32.xlu0 %v2765_v46, %s2498_s30 }
  0x6b   : > { %1045 = vrot.lane.b32.xlu1 %v2787_v5, %s2498_s30 }
  0x6e   : > { %1091 = vrot.lane.b32.xlu0 %v862_v49, %s2499_s6  ;;  %v794_v49 = vld [vmem:[#allocation2 + $0xe0] sm:$0xff] }
  0x6f   : > { %1093 = vrot.lane.b32.xlu1 %v719_v12, %s2499_s6  ;;  %v818_v51 = vpack.c.bf16 %v794_v49, %v793_v48 }
  0x72   : > { %1139 = vrot.lane.b32.xlu0 %v910_v60, %s2500_s7  ;;  %v889_v60 = vld [vmem:[#allocation2 + $0xda] sm:$0xff] }
  0x73   : > { %1141 = vrot.lane.b32.xlu1 %v767_v18, %s2500_s7  ;;  %v914_v63 = vpack.c.bf16 %v890_v61, %v889_v60  ;;  %v656_v61 = vld [vmem:[#allocation2 + $0x120] sm:$0xff] }
  0x76   : > { %1187 = vrot.lane.b32.xlu0 %v2787_v5, %s2501_s12 }
  0x77   : > { %1189 = vrot.lane.b32.xlu1 %v2803_v21, %s2501_s12 }
  0x7a   : > { %1235 = vrot.lane.b32.xlu0 %v719_v12, %s2502_s15 }
  0x7b   : > { %1237 = vrot.lane.b32.xlu1 %v864_v24, %s2502_s15 }
  0x7e   : > { %1283 = vrot.lane.b32.xlu0 %v767_v18, %s2503_s16 }
  0x7f   : > { %951 = vrot.lane.b32.xlu1 %v719_v12, %s2496_s28  ;;  %v700_v12 = vld [vmem:[#allocation2 + $0xf1] sm:$0xff] }
  0x82   : > { %1285 = vrot.lane.b32.xlu0 %v912_v37, %s2503_s16 }
  0x83   : > { %953 = vrot.lane.b32.xlu1 %v864_v24, %s2496_s28 }
  0x84   : > { %v940_v52 = vpop.permute.xlu0 %939 }
  0x85   : > { %v1309_v16 = vsel %vm411_vm0, %v522_v9, %v940_v52 }
  0x86   : > { %999 = vrot.lane.b32.xlu0 %v767_v18, %s2497_s29  ;;  %v723_v18 = vpack.c.bf16 %v701_v13, %v700_v12  ;;  %v753_v12 = vld [vmem:[#allocation2 + $0x12a] sm:$0xff] }
  0x87   : > { %1001 = vrot.lane.b32.xlu1 %v912_v37, %s2497_s29 }
  0x8a   : > { %1047 = vrot.lane.b32.xlu0 %v2803_v21, %s2498_s30 }
  0x8b   : > { %1049 = vrot.lane.b32.xlu1 %v673_v14, %s2498_s30 }
  0x8e   : > { %1095 = vrot.lane.b32.xlu0 %v864_v24, %s2499_s6 }
  0x8f   : > { %1097 = vrot.lane.b32.xlu1 %v721_v43, %s2499_s6 }
  0x92   : > { %1143 = vrot.lane.b32.xlu0 %v912_v37, %s2500_s7 }
  0x93   : > { %1145 = vrot.lane.b32.xlu1 %v769_v47, %s2500_s7 }
  0x95   : > { %v988_v50 = vpop.permute.xlu1 %987 }
  0x96   : > { %1191 = vrot.lane.b32.xlu0 %v673_v14, %s2501_s12  ;;  %v1357_v22 = vsel %vm1355_vm4, %v1309_v16, %v988_v50  ;;  %v2863_v14 = vpack.c.bf16 %v798_v33, %v797_v32 }
  0x97   : > { %1193 = vrot.lane.b32.xlu1 %v818_v51, %s2501_s12 }
  0x98   : > { %v942_v58 = vpop.permute.xlu0 %941 }
  0x99   : > { %v990_v56 = vpop.permute.xlu1 %989  ;;  %v1312_v24 = vsel %vm411_vm0, %v2670_v34, %v942_v58 }
  0x9a   : > { %1239 = vrot.lane.b32.xlu0 %v721_v43, %s2502_s15  ;;  %v1359_v35 = vsel %vm1355_vm4, %v1312_v24, %v990_v56 }
  0x9b   : > { %1241 = vrot.lane.b32.xlu1 %v866_v55, %s2502_s15 }
  0x9c   : > { %v1036_v62 = vpop.permute.xlu0 %1035 }
  0x9d   : > { %v1038_v59 = vpop.permute.xlu1 %1037  ;;  %v1390_v25 = vsel %vm1388_vm5, %v1357_v22, %v1036_v62  ;;  %v657_v62 = vld [vmem:[#allocation2 + $0x128] sm:$0xff]  ;;  %v801_v22 = vld [vmem:[#allocation2 + $0x138] sm:$0xff] }
  0x9e   : > { %1287 = vrot.lane.b32.xlu0 %v769_v47, %s2503_s16  ;;  %v1392_v37 = vsel %vm1388_vm5, %v1359_v35, %v1038_v59 }
  0x9f   : > { %955 = vrot.lane.b32.xlu1 %v721_v43, %s2496_s28  ;;  %v846_v43 = vld [vmem:[#allocation2 + $0x111] sm:$0xff] }
  0xa0   : > { %v1084_v2 = vpop.permute.xlu0 %1083  ;;  %v868_v50 = vpack.c.bf16 %v846_v43, %v845_v42 }
  0xa1   : > { %v1086_v0 = vpop.permute.xlu1 %1085  ;;  %v1423_v27 = vsel %vm1421_vm6, %v1390_v25, %v1084_v2  ;;  %v2883_v2 = vpack.c.bf16 %v657_v62, %v656_v61 }
  0xa2   : > { %1289 = vrot.lane.b32.xlu0 %v914_v63, %s2503_s16  ;;  %v1425_v1 = vsel %vm1421_vm6, %v1392_v37, %v1086_v0 }
  0xa3   : > { %957 = vrot.lane.b32.xlu1 %v866_v55, %s2496_s28 }
  0xa4   : > { %v1132_v10 = vpop.permute.xlu0 %1131 }
  0xa5   : > { %v1134_v8 = vpop.permute.xlu1 %1133  ;;  %v1456_v30 = vsel %vm1454_vm7, %v1423_v27, %v1132_v10  ;;  %v752_v10 = vld [vmem:[#allocation2 + $0x122] sm:$0xff] }
  0xa6   : > { %1003 = vrot.lane.b32.xlu0 %v769_v47, %s2497_s29  ;;  %v1458_v41 = vsel %vm1454_vm7, %v1425_v1, %v1134_v8  ;;  %v725_v8 = vpack.c.bf16 %v705_v4, %v704_v3  ;;  %v773_v19 = vpack.c.bf16 %v753_v12, %v752_v10  ;;  %v757_v3 = vld [vmem:[#allocation2 + $0x15a] sm:$0xff] }
  0xa7   : > { %1005 = vrot.lane.b32.xlu1 %v914_v63, %s2497_s29 }
  0xa8   : > { %v1180_v17 = vpop.permute.xlu0 %1179 }
  0xa9   : > { %v1182_v15 = vpop.permute.xlu1 %1181  ;;  %v1489_v34 = vsel %vm1487_vm8, %v1456_v30, %v1180_v17 }
  0xaa   : > { %1051 = vrot.lane.b32.xlu0 %v818_v51, %s2498_s30  ;;  %v1491_v44 = vsel %vm1487_vm8, %v1458_v41, %v1182_v15 }
  0xab   : > { %1053 = vrot.lane.b32.xlu1 %v2841_v11, %s2498_s30 }
  0xac   : > { %v1228_v26 = vpop.permute.xlu0 %1227 }
  0xad   : > { %v1230_v23 = vpop.permute.xlu1 %1229  ;;  %v1522_v38 = vsel %vm1520_vm9, %v1489_v34, %v1228_v26  ;;  %v849_v34 = vld [vmem:[#allocation2 + $0x139] sm:$0xff] }
  0xae   : > { %1099 = vrot.lane.b32.xlu0 %v866_v55, %s2499_s6  ;;  %v1524_v47 = vsel %vm1520_vm9, %v1491_v44, %v1230_v23  ;;  %v894_v55 = vld [vmem:[#allocation2 + $0x112] sm:$0xff]  ;;  %v802_v23 = vld [vmem:[#allocation2 + $0x140] sm:$0xff] }
  0xaf   : > { %1101 = vrot.lane.b32.xlu1 %v723_v18, %s2499_s6  ;;  %v916_v58 = vpack.c.bf16 %v894_v55, %v893_v54  ;;  %v2907_v33 = vpack.c.bf16 %v802_v23, %v801_v22 }
  0xb0   : > { %v1276_v39 = vpop.permute.xlu0 %1275 }
  0xb1   : > { %v944_v36 = vpop.permute.xlu1 %943  ;;  %v1555_v40 = vsel %vm1553_vm10, %v1522_v38, %v1276_v39 }
  0xb2   : > { %1147 = vrot.lane.b32.xlu0 %v914_v63, %s2500_s7  ;;  %2427 = vmatprep.mubr.msk.bf16.mxu0 %vm1606_vm11, %v1555_v40  ;;  %v1315_v9 = vsel %vm411_vm0, %v2666_v31, %v944_v36  ;;  %v850_v36 = vld [vmem:[#allocation2 + $0x141] sm:$0xff] }
  0xb3   : > { %1149 = vrot.lane.b32.xlu1 %v771_v28, %s2500_s7  ;;  %v870_v41 = vpack.c.bf16 %v850_v36, %v849_v34 }
  0xb4   : > { %v1278_v48 = vpop.permute.xlu0 %1277 }
  0xb5   : > { %v946_v45 = vpop.permute.xlu1 %945  ;;  %v1557_v49 = vsel %vm1553_vm10, %v1524_v47, %v1278_v48  ;;  %v898_v47 = vld [vmem:[#allocation2 + $0x142] sm:$0xff] }
  0xb6   : > { %1195 = vrot.lane.b32.xlu0 %v2841_v11, %s2501_s12  ;;  %2428 = vmatmul.mubr.msk.bf16.vlgmr.msra.gmra.mrb[0].mxu0 %vm1606_vm11, %v1557_v49  ;;  %v1318_v20 = vsel %vm411_vm0, %v2697_v57, %v946_v45  ;;  %v897_v45 = vld [vmem:[#allocation2 + $0x13a] sm:$0xff] }
  0xb7   : > { %1197 = vrot.lane.b32.xlu1 %v2863_v14, %s2501_s12  ;;  %v918_v49 = vpack.c.bf16 %v898_v47, %v897_v45 }
  0xb8   : > { %v992_v52 = vpop.permute.xlu0 %991 }
  0xb9   : > { %v994_v51 = vpop.permute.xlu1 %993  ;;  %v1361_v13 = vsel %vm1355_vm4, %v1315_v9, %v992_v52  ;;  %v660_v52 = vld [vmem:[#allocation2 + $0x150] sm:$0xff] }
  0xba   : > { %1243 = vrot.lane.b32.xlu0 %v723_v18, %s2502_s15  ;;  %v1363_v24 = vsel %vm1355_vm4, %v1318_v20, %v994_v51 }
  0xbb   : > { %1245 = vrot.lane.b32.xlu1 %v868_v50, %s2502_s15 }
  0xbc   : > { %v1040_v56 = vpop.permute.xlu0 %1039 }
  0xbd   : > { %v1042_v53 = vpop.permute.xlu1 %1041  ;;  %v1394_v16 = vsel %vm1388_vm5, %v1361_v13, %v1040_v56  ;;  %v805_v13 = vld [vmem:[#allocation2 + $0x168] sm:$0xff] }
  0xbe   : > { %1291 = vrot.lane.b32.xlu0 %v771_v28, %s2503_s16  ;;  %v1396_v27 = vsel %vm1388_vm5, %v1363_v24, %v1042_v53  ;;  %v661_v53 = vld [vmem:[#allocation2 + $0x158] sm:$0xff] }
  0xbf   : > { %959 = vrot.lane.b32.xlu1 %v723_v18, %s2496_s28  ;;  %v2927_v56 = vpack.c.bf16 %v661_v53, %v660_v52 }
  0xc0   : > { %v1088_v60 = vpop.permute.xlu0 %1087 }
  0xc1   : > { %v1090_v59 = vpop.permute.xlu1 %1089  ;;  %v1427_v18 = vsel %vm1421_vm6, %v1394_v16, %v1088_v60 }
  0xc2   : > { %1293 = vrot.lane.b32.xlu0 %v916_v58, %s2503_s16  ;;  %v1429_v32 = vsel %vm1421_vm6, %v1396_v27, %v1090_v59  ;;  %v709_v59 = vld [vmem:[#allocation2 + $0x159] sm:$0xff] }
  0xc3   : > { %961 = vrot.lane.b32.xlu1 %v868_v50, %s2496_s28 }
  0xc4   : > { %v1136_v0 = vpop.permute.xlu0 %1135 }
  0xc5   : > { %v1138_v63 = vpop.permute.xlu1 %1137  ;;  %v1460_v31 = vsel %vm1454_vm7, %v1427_v18, %v1136_v0  ;;  %v756_v0 = vld [vmem:[#allocation2 + $0x152] sm:$0xff] }
  0xc6   : > { %1007 = vrot.lane.b32.xlu0 %v771_v28, %s2497_s29  ;;  %v1462_v35 = vsel %vm1454_vm7, %v1429_v32, %v1138_v63  ;;  %v775_v10 = vpack.c.bf16 %v757_v3, %v756_v0 }
  0xc7   : > { %1009 = vrot.lane.b32.xlu1 %v916_v58, %s2497_s29 }
  0xc8   : > { %v1184_v7 = vpop.permute.xlu0 %1183 }
  0xc9   : > { %v1186_v6 = vpop.permute.xlu1 %1185  ;;  %v1493_v25 = vsel %vm1487_vm8, %v1460_v31, %v1184_v7 }
  0xca   : > { %1055 = vrot.lane.b32.xlu0 %v2863_v14, %s2498_s30  ;;  %v1495_v37 = vsel %vm1487_vm8, %v1462_v35, %v1186_v6 }
  0xcb   : > { %1057 = vrot.lane.b32.xlu1 %v2883_v2, %s2498_s30 }
  0xcc   : > { %v1232_v17 = vpop.permute.xlu0 %1231 }
  0xcd   : > { %v1234_v15 = vpop.permute.xlu1 %1233  ;;  %v1526_v28 = vsel %vm1520_vm9, %v1493_v25, %v1232_v17  ;;  %v853_v25 = vld [vmem:[#allocation2 + $0x169] sm:$0xff] }
  0xce   : > { %1103 = vrot.lane.b32.xlu0 %v868_v50, %s2499_s6  ;;  %v1528_v39 = vsel %vm1520_vm9, %v1495_v37, %v1234_v15  ;;  %v806_v15 = vld [vmem:[#allocation2 + $0x170] sm:$0xff] }
  0xcf   : > { %1105 = vrot.lane.b32.xlu1 %v725_v8, %s2499_s6  ;;  %v2951_v23 = vpack.c.bf16 %v806_v15, %v805_v13 }
  0xd0   : > { %v1280_v30 = vpop.permute.xlu0 %1279 }
  0xd1   : > { %v948_v26 = vpop.permute.xlu1 %947  ;;  %v1559_v57 = vsel %vm1553_vm10, %v1526_v28, %v1280_v30 }
  0xd2   : > { %1151 = vrot.lane.b32.xlu0 %v916_v58, %s2500_s7  ;;  %2431 = vmatprep.mubr.msk.bf16.mxu0 %vm1606_vm11, %v1559_v57  ;;  %v708_v58 = vld [vmem:[#allocation2 + $0x151] sm:$0xff]  ;;  %v1321_v63 = vsel %vm411_vm0, %v2747_v29, %v948_v26 }
  0xd3   : > { %1153 = vrot.lane.b32.xlu1 %v773_v19, %s2500_s7  ;;  %v727_v62 = vpack.c.bf16 %v709_v59, %v708_v58  ;;  %v854_v26 = vld [vmem:[#allocation2 + $0x171] sm:$0xff] }
  0xd4   : > { %v1282_v1 = vpop.permute.xlu0 %1281  ;;  %v872_v35 = vpack.c.bf16 %v854_v26, %v853_v25  ;;  %v761_v58 = vld [vmem:[#allocation2 + $0x18a] sm:$0xff]  ;;  %v905_v25 = vld [vmem:[#allocation2 + $0x19a] sm:$0xff]  ;;  %v906_v26 = vld [vmem:[#allocation2 + $0x1a2] sm:$0xff] }
  0xd5   : > { %v950_v38 = vpop.permute.xlu1 %949  ;;  %v1561_v40 = vsel %vm1553_vm10, %v1528_v39, %v1282_v1  ;;  %v902_v39 = vld [vmem:[#allocation2 + $0x172] sm:$0xff] }
  0xd6   : > { %1199 = vrot.lane.b32.xlu0 %v2883_v2, %s2501_s12  ;;  %2432 = vmatmul.mubr.msk.bf16.gmra.mrb[4].mxu0 %vm1606_vm11, %v1561_v40  ;;  %v1324_v12 = vsel %vm411_vm0, %v2765_v46, %v950_v38  ;;  %v901_v38 = vld [vmem:[#allocation2 + $0x16a] sm:$0xff] }
  0xd7   : > { %1201 = vrot.lane.b32.xlu1 %v2907_v33, %s2501_s12  ;;  %v920_v40 = vpack.c.bf16 %v902_v39, %v901_v38 }
  0xd8   : > { %v996_v43 = vpop.permute.xlu0 %995 }
  0xd9   : > { %v998_v42 = vpop.permute.xlu1 %997  ;;  %v1365_v4 = vsel %vm1355_vm4, %v1321_v63, %v996_v43  ;;  %v664_v43 = vld [vmem:[#allocation2 + $0x180] sm:$0xff] }
  0xda   : > { %1247 = vrot.lane.b32.xlu0 %v725_v8, %s2502_s15  ;;  %v1367_v16 = vsel %vm1355_vm4, %v1324_v12, %v998_v42 }
  0xdb   : > { %1249 = vrot.lane.b32.xlu1 %v870_v41, %s2502_s15 }
  0xdc   : > { %v1044_v48 = vpop.permute.xlu0 %1043 }
  0xdd   : > { %v1046_v44 = vpop.permute.xlu1 %1045  ;;  %v1398_v7 = vsel %vm1388_vm5, %v1365_v4, %v1044_v48  ;;  %v809_v4 = vld [vmem:[#allocation2 + $0x198] sm:$0xff] }
  0xde   : > { %1295 = vrot.lane.b32.xlu0 %v773_v19, %s2503_s16 }
  0xdf   : > { %963 = vrot.lane.b32.xlu1 %v725_v8, %s2496_s28 }
  0xe0   : > { %v1092_v51 = vpop.permute.xlu0 %1091 }
  0xe1   : > { %v1094_v50 = vpop.permute.xlu1 %1093  ;;  %v1431_v9 = vsel %vm1421_vm6, %v1398_v7, %v1092_v51 }
  0xe2   : > { %1297 = vrot.lane.b32.xlu0 %v918_v49, %s2503_s16 }
  0xe3   : > { %965 = vrot.lane.b32.xlu1 %v870_v41, %s2496_s28 }
  0xe4   : > { %v1140_v55 = vpop.permute.xlu0 %1139 }
  0xe5   : > { %v1142_v54 = vpop.permute.xlu1 %1141  ;;  %v1464_v29 = vsel %vm1454_vm7, %v1431_v9, %v1140_v55  ;;  %v760_v55 = vld [vmem:[#allocation2 + $0x182] sm:$0xff] }
  0xe6   : > { %1011 = vrot.lane.b32.xlu0 %v773_v19, %s2497_s29  ;;  %v1400_v19 = vsel %vm1388_vm5, %v1367_v16, %v1046_v44  ;;  %v665_v44 = vld [vmem:[#allocation2 + $0x188] sm:$0xff]  ;;  %v777_v0 = vpack.c.bf16 %v761_v58, %v760_v55 }
  0xe7   : > { %1013 = vrot.lane.b32.xlu1 %v918_v49, %s2497_s29  ;;  %v1433_v22 = vsel %vm1421_vm6, %v1400_v19, %v1094_v50  ;;  %v681_v48 = vpack.c.bf16 %v665_v44, %v664_v43  ;;  %v713_v50 = vld [vmem:[#allocation2 + $0x189] sm:$0xff] }
  0xe8   : > { %v1188_v61 = vpop.permute.xlu0 %1187  ;;  %v1466_v24 = vsel %vm1454_vm7, %v1433_v22, %v1142_v54 }
  0xe9   : > { %v1190_v60 = vpop.permute.xlu1 %1189  ;;  %v1497_v17 = vsel %vm1487_vm8, %v1464_v29, %v1188_v61 }
  0xea   : > { %1059 = vrot.lane.b32.xlu0 %v2907_v33, %s2498_s30  ;;  %v1499_v27 = vsel %vm1487_vm8, %v1466_v24, %v1190_v60 }
  0xeb   : > { %1061 = vrot.lane.b32.xlu1 %v2927_v56, %s2498_s30 }
  0xec   : > { %v1236_v8 = vpop.permute.xlu0 %1235 }
  0xed   : > { %v1238_v6 = vpop.permute.xlu1 %1237  ;;  %v1530_v20 = vsel %vm1520_vm9, %v1497_v17, %v1236_v8  ;;  %v857_v17 = vld [vmem:[#allocation2 + $0x199] sm:$0xff] }
  0xee   : > { %1107 = vrot.lane.b32.xlu0 %v870_v41, %s2499_s6  ;;  %v1532_v30 = vsel %vm1520_vm9, %v1499_v27, %v1238_v6  ;;  %v810_v6 = vld [vmem:[#allocation2 + $0x1a0] sm:$0xff] }
  0xef   : > { %1109 = vrot.lane.b32.xlu1 %v727_v62, %s2499_s6  ;;  %v826_v15 = vpack.c.bf16 %v810_v6, %v809_v4 }
  0xf0   : > { %v1284_v31 = vpop.permute.xlu0 %1283 }
  0xf1   : > { %v952_v18 = vpop.permute.xlu1 %951  ;;  %v1563_v46 = vsel %vm1553_vm10, %v1530_v20, %v1284_v31 }
  0xf2   : > { %1155 = vrot.lane.b32.xlu0 %v918_v49, %s2500_s7  ;;  %2435 = vmatprep.mubr.msk.bf16.mxu0 %vm1606_vm11, %v1563_v46  ;;  %v712_v49 = vld [vmem:[#allocation2 + $0x181] sm:$0xff]  ;;  %v1327_v54 = vsel %vm411_vm0, %v2787_v5, %v952_v18 }
  0xf3   : > { %1157 = vrot.lane.b32.xlu1 %v775_v10, %s2500_s7  ;;  %v729_v53 = vpack.c.bf16 %v713_v50, %v712_v49  ;;  %v858_v18 = vld [vmem:[#allocation2 + $0x1a1] sm:$0xff] }
  0xf4   : > { %v1286_v32 = vpop.permute.xlu0 %1285  ;;  %v874_v24 = vpack.c.bf16 %v858_v18, %v857_v17 }
  0xf5   : > { %v954_v28 = vpop.permute.xlu1 %953  ;;  %v1565_v57 = vsel %vm1553_vm10, %v1532_v30, %v1286_v32  ;;  %v922_v30 = vpack.c.bf16 %v906_v26, %v905_v25 }
  0xf6   : > { %1203 = vrot.lane.b32.xlu0 %v2927_v56, %s2501_s12  ;;  %2436 = vmatmul.mubr.msk.bf16.gmra.mrb[8].mxu0 %vm1606_vm11, %v1565_v57  ;;  %v1330_v3 = vsel %vm411_vm0, %v2803_v21, %v954_v28 }
  0xf7   : > { %1205 = vrot.lane.b32.xlu1 %v2951_v23, %s2501_s12 }
  0xf8   : > { %v1000_v36 = vpop.permute.xlu0 %999 }
  0xf9   : > { %v1002_v34 = vpop.permute.xlu1 %1001  ;;  %v1369_v59 = vsel %vm1355_vm4, %v1327_v54, %v1000_v36  ;;  %v506_v36 = vld [vmem:[#allocation2 + $0xc0] sm:$0xff] }
  0xfa   : > { %1251 = vrot.lane.b32.xlu0 %v727_v62, %s2502_s15  ;;  %v1371_v7 = vsel %vm1355_vm4, %v1330_v3, %v1002_v34 }
  0xfb   : > { %1253 = vrot.lane.b32.xlu1 %v872_v35, %s2502_s15 }
  0xfc   : > { %v1048_v1 = vpop.permute.xlu0 %1047 }
  0xfd   : > { %v1050_v37 = vpop.permute.xlu1 %1049  ;;  %v1402_v61 = vsel %vm1388_vm5, %v1369_v59, %v1048_v1 }
  0xfe   : > { %1299 = vrot.lane.b32.xlu0 %v775_v10, %s2503_s16 }
  0xff   : > { %967 = vrot.lane.b32.xlu1 %v727_v62, %s2496_s28 }
 0x100   : > { %v1096_v42 = vpop.permute.xlu0 %1095 }
 0x101   : > { %v1098_v41 = vpop.permute.xlu1 %1097  ;;  %v1435_v63 = vsel %vm1421_vm6, %v1402_v61, %v1096_v42 }
 0x102   : > { %1301 = vrot.lane.b32.xlu0 %v920_v40, %s2503_s16 }
 0x103   : > { %969 = vrot.lane.b32.xlu1 %v872_v35, %s2496_s28 }
 0x104   : > { %v1144_v47 = vpop.permute.xlu0 %1143 }
 0x105   : > { %v1146_v45 = vpop.permute.xlu1 %1145  ;;  %v1468_v5 = vsel %vm1454_vm7, %v1435_v63, %v1144_v47 }
 0x106   : > { %1015 = vrot.lane.b32.xlu0 %v775_v10, %s2497_s29  ;;  %v1404_v10 = vsel %vm1388_vm5, %v1371_v7, %v1050_v37  ;;  %v507_v37 = vld [vmem:[#allocation2 + $0xc8] sm:$0xff] }
 0x107   : > { %1017 = vrot.lane.b32.xlu1 %v920_v40, %s2497_s29  ;;  %v1437_v13 = vsel %vm1421_vm6, %v1404_v10, %v1098_v41  ;;  %v530_v1 = vpack.c.bf16 %v507_v37, %v506_v36  ;;  %v509_v41 = vld [vmem:[#allocation2 + $0xe0] sm:$0xff] }
 0x108   : > { %v1192_v52 = vpop.permute.xlu0 %1191  ;;  %v1470_v16 = vsel %vm1454_vm7, %v1437_v13, %v1146_v45 }
 0x109   : > { %v1194_v51 = vpop.permute.xlu1 %1193  ;;  %v1501_v8 = vsel %vm1487_vm8, %v1468_v5, %v1192_v52 }
 0x10a   : > { %1063 = vrot.lane.b32.xlu0 %v2951_v23, %s2498_s30  ;;  %v1503_v19 = vsel %vm1487_vm8, %v1470_v16, %v1194_v51 }
 0x10b   : > { %1065 = vrot.lane.b32.xlu1 %v681_v48, %s2498_s30 }
 0x10c   : > { %v1240_v62 = vpop.permute.xlu0 %1239 }
 0x10d   : > { %v1242_v60 = vpop.permute.xlu1 %1241  ;;  %v1534_v12 = vsel %vm1520_vm9, %v1501_v8, %v1240_v62 }
 0x10e   : > { %1111 = vrot.lane.b32.xlu0 %v872_v35, %s2499_s6  ;;  %v1536_v31 = vsel %vm1520_vm9, %v1503_v19, %v1242_v60 }
 0x10f   : > { %1113 = vrot.lane.b32.xlu1 %v729_v53, %s2499_s6 }
 0x110   : > { %v1288_v29 = vpop.permute.xlu0 %1287 }
 0x111   : > { %v956_v9 = vpop.permute.xlu1 %955  ;;  %v1567_v21 = vsel %vm1553_vm10, %v1534_v12, %v1288_v29 }
 0x112   : > { %1159 = vrot.lane.b32.xlu0 %v920_v40, %s2500_s7  ;;  %2439 = vmatprep.mubr.msk.bf16.mxu0 %vm1606_vm11, %v1567_v21  ;;  %v508_v40 = vld [vmem:[#allocation2 + $0xd8] sm:$0xff]  ;;  %v1333_v44 = vsel %vm411_vm0, %v530_v1, %v956_v9 }
 0x113   : > { %1161 = vrot.lane.b32.xlu1 %v777_v0, %s2500_s7  ;;  %v531_v45 = vpack.c.bf16 %v509_v41, %v508_v40 }
 0x114   : > { %v1290_v22 = vpop.permute.xlu0 %1289 }
 0x115   : > { %v958_v20 = vpop.permute.xlu1 %957  ;;  %v1569_v46 = vsel %vm1553_vm10, %v1536_v31, %v1290_v22 }
 0x116   : > { %1207 = vrot.lane.b32.xlu0 %v681_v48, %s2501_s12  ;;  %2440 = vmatmul.mubr.msk.bf16.gmra.mrb[12].mxu0 %vm1606_vm11, %v1569_v46  ;;  %v1336_v52 = vsel %vm411_vm0, %v531_v45, %v958_v20 }
 0x117   : > { %1209 = vrot.lane.b32.xlu1 %v826_v15, %s2501_s12 }
 0x118   : > { %v1004_v28 = vpop.permute.xlu0 %1003 }
 0x119   : > { %v1006_v27 = vpop.permute.xlu1 %1005  ;;  %v1373_v47 = vsel %vm1355_vm4, %v1333_v44, %v1004_v28 }
 0x11a   : > { %1255 = vrot.lane.b32.xlu0 %v729_v53, %s2502_s15  ;;  %v1375_v54 = vsel %vm1355_vm4, %v1336_v52, %v1006_v27 }
 0x11b   : > { %1257 = vrot.lane.b32.xlu1 %v874_v24, %s2502_s15 }
 0x11c   : > { %v1052_v57 = vpop.permute.xlu0 %1051 }
 0x11d   : > { %v1054_v32 = vpop.permute.xlu1 %1053  ;;  %v1406_v49 = vsel %vm1388_vm5, %v1373_v47, %v1052_v57 }
 0x11e   : > { %1303 = vrot.lane.b32.xlu0 %v777_v0, %s2503_s16  ;;  %v1408_v59 = vsel %vm1388_vm5, %v1375_v54, %v1054_v32 }
 0x11f   : > { %1305 = vrot.lane.b32.xlu1 %v922_v30, %s2503_s16 }
 0x120   : > { %v1100_v34 = vpop.permute.xlu0 %1099 }
 0x121   : > { %v1102_v35 = vpop.permute.xlu1 %1101  ;;  %v1439_v51 = vsel %vm1421_vm6, %v1406_v49, %v1100_v34 }
 0x122   : > { %v1441_v62 = vsel %vm1421_vm6, %v1408_v59, %v1102_v35 }
 0x124   : > { %v1148_v39 = vpop.permute.xlu0 %1147 }
 0x125   : > { %v1150_v38 = vpop.permute.xlu1 %1149  ;;  %v1472_v53 = vsel %vm1454_vm7, %v1439_v51, %v1148_v39 }
 0x126   : > { %v1474_v0 = vsel %vm1454_vm7, %v1441_v62, %v1150_v38 }
 0x128   : > { %v1196_v43 = vpop.permute.xlu0 %1195 }
 0x129   : > { %v1198_v42 = vpop.permute.xlu1 %1197  ;;  %v1505_v55 = vsel %vm1487_vm8, %v1472_v53, %v1196_v43 }
 0x12a   : > { %v1507_v3 = vsel %vm1487_vm8, %v1474_v0, %v1198_v42 }
 0x12c   : > { %v1244_v50 = vpop.permute.xlu0 %1243 }
 0x12d   : > { %v1246_v48 = vpop.permute.xlu1 %1245  ;;  %v1538_v60 = vsel %vm1520_vm9, %v1505_v55, %v1244_v50 }
 0x12e   : > { %v1540_v4 = vsel %vm1520_vm9, %v1507_v3, %v1246_v48 }
 0x130   : > { %v1292_v61 = vpop.permute.xlu0 %1291 }
 0x131   : > { %v960_v58 = vpop.permute.xlu1 %959  ;;  %v1571_v63 = vsel %vm1553_vm10, %v1538_v60, %v1292_v61 }
 0x132   : > { %2443 = vmatprep.mubr.msk.bf16.mxu1 %vm1606_vm11, %v1571_v63  ;;  %v1339_v18 = vsel %vm411_vm0, %v2841_v11, %v960_v58 }
 0x134   : > { %v1294_v6 = vpop.permute.xlu0 %1293 }
 0x135   : > { %v962_v5 = vpop.permute.xlu1 %961  ;;  %v1573_v7 = vsel %vm1553_vm10, %v1540_v4, %v1294_v6 }
 0x136   : > { %2444 = vmatmul.mubr.msk.bf16.vlgmr.msra.gmra.mrb[0].mxu1 %vm1606_vm11, %v1573_v7  ;;  %v1342_v24 = vsel %vm411_vm0, %v2863_v14, %v962_v5 }
 0x138   : > { %v1008_v9 = vpop.permute.xlu0 %1007 }
 0x139   : > { %v1010_v8 = vpop.permute.xlu1 %1009  ;;  %v1377_v19 = vsel %vm1355_vm4, %v1339_v18, %v1008_v9 }
 0x13a   : > { %v1379_v26 = vsel %vm1355_vm4, %v1342_v24, %v1010_v8 }
 0x13c   : > { %v1056_v12 = vpop.permute.xlu0 %1055 }
 0x13d   : > { %v1058_v10 = vpop.permute.xlu1 %1057  ;;  %v1410_v31 = vsel %vm1388_vm5, %v1377_v19, %v1056_v12 }
 0x13e   : > { %v1412_v11 = vsel %vm1388_vm5, %v1379_v26, %v1058_v10 }
 0x140   : > { %v1104_v13 = vpop.permute.xlu0 %1103 }
 0x141   : > { %v1106_v29 = vpop.permute.xlu1 %1105  ;;  %v1443_v46 = vsel %vm1421_vm6, %v1410_v31, %v1104_v13 }
 0x142   : > { %v1445_v57 = vsel %vm1421_vm6, %v1412_v11, %v1106_v29 }
 0x144   : > { %v1152_v15 = vpop.permute.xlu0 %1151 }
 0x145   : > { %v1154_v21 = vpop.permute.xlu1 %1153  ;;  %v1476_v25 = vsel %vm1454_vm7, %v1443_v46, %v1152_v15 }
 0x146   : > { %v1478_v34 = vsel %vm1454_vm7, %v1445_v57, %v1154_v21 }
 0x148   : > { %v1200_v17 = vpop.permute.xlu0 %1199 }
 0x149   : > { %v1202_v16 = vpop.permute.xlu1 %1201  ;;  %v1509_v27 = vsel %vm1487_vm8, %v1476_v25, %v1200_v17 }
 0x14a   : > { %v1511_v14 = vsel %vm1487_vm8, %v1478_v34, %v1202_v16 }
 0x14c   : > { %v1248_v22 = vpop.permute.xlu0 %1247 }
 0x14d   : > { %v1250_v20 = vpop.permute.xlu1 %1249  ;;  %v1542_v30 = vsel %vm1520_vm9, %v1509_v27, %v1248_v22 }
 0x14e   : > { %v1544_v37 = vsel %vm1520_vm9, %v1511_v14, %v1250_v20 }
 0x150   : > { %v1296_v32 = vpop.permute.xlu0 %1295 }
 0x151   : > { %v964_v28 = vpop.permute.xlu1 %963  ;;  %v1575_v35 = vsel %vm1553_vm10, %v1542_v30, %v1296_v32 }
 0x152   : > { %2447 = vmatprep.mubr.msk.bf16.mxu1 %vm1606_vm11, %v1575_v35  ;;  %v1345_v50 = vsel %vm411_vm0, %v2883_v2, %v964_v28 }
 0x154   : > { %v1298_v38 = vpop.permute.xlu0 %1297 }
 0x155   : > { %v966_v36 = vpop.permute.xlu1 %965  ;;  %v1577_v39 = vsel %vm1553_vm10, %v1544_v37, %v1298_v38 }
 0x156   : > { %2448 = vmatmul.mubr.msk.bf16.gmra.mrb[4].mxu1 %vm1606_vm11, %v1577_v39  ;;  %v1348_v58 = vsel %vm411_vm0, %v2907_v33, %v966_v36 }
 0x158   : > { %v1012_v40 = vpop.permute.xlu0 %1011 }
 0x159   : > { %v1014_v1 = vpop.permute.xlu1 %1013  ;;  %v1381_v51 = vsel %vm1355_vm4, %v1345_v50, %v1012_v40 }
 0x15a   : > { %v1383_v60 = vsel %vm1355_vm4, %v1348_v58, %v1014_v1 }
 0x15c   : > { %v1060_v42 = vpop.permute.xlu0 %1059 }
 0x15d   : > { %v1062_v41 = vpop.permute.xlu1 %1061  ;;  %v1414_v53 = vsel %vm1388_vm5, %v1381_v51, %v1060_v42 }
 0x15e   : > { %v1416_v2 = vsel %vm1388_vm5, %v1383_v60, %v1062_v41 }
 0x160   : > { %v1108_v44 = vpop.permute.xlu0 %1107 }
 0x161   : > { %v1110_v43 = vpop.permute.xlu1 %1109  ;;  %v1447_v55 = vsel %vm1421_vm6, %v1414_v53, %v1108_v44 }
 0x162   : > { %v1449_v3 = vsel %vm1421_vm6, %v1416_v2, %v1110_v43 }
 0x164   : > { %v1156_v47 = vpop.permute.xlu0 %1155 }
 0x165   : > { %v1158_v45 = vpop.permute.xlu1 %1157  ;;  %v1480_v59 = vsel %vm1454_vm7, %v1447_v55, %v1156_v47 }
 0x166   : > { %v1482_v4 = vsel %vm1454_vm7, %v1449_v3, %v1158_v45 }
 0x168   : > { %v1204_v49 = vpop.permute.xlu0 %1203 }
 0x169   : > { %v1206_v48 = vpop.permute.xlu1 %1205  ;;  %v1513_v61 = vsel %vm1487_vm8, %v1480_v59, %v1204_v49 }
 0x16a   : > { %v1515_v33 = vsel %vm1487_vm8, %v1482_v4, %v1206_v48 }
 0x16c   : > { %v1252_v54 = vpop.permute.xlu0 %1251 }
 0x16d   : > { %v1254_v52 = vpop.permute.xlu1 %1253  ;;  %v1546_v63 = vsel %vm1520_vm9, %v1513_v61, %v1252_v54 }
 0x16e   : > { %v1548_v7 = vsel %vm1520_vm9, %v1515_v33, %v1254_v52 }
 0x170   : > { %v1300_v0 = vpop.permute.xlu0 %1299 }
 0x171   : > { %v968_v62 = vpop.permute.xlu1 %967  ;;  %v1579_v5 = vsel %vm1553_vm10, %v1546_v63, %v1300_v0 }
 0x172   : > { %2451 = vmatprep.mubr.msk.bf16.mxu1 %vm1606_vm11, %v1579_v5  ;;  %v1351_v19 = vsel %vm411_vm0, %v2927_v56, %v968_v62 }
 0x174   : > { %v1302_v8 = vpop.permute.xlu0 %1301 }
 0x175   : > { %v970_v6 = vpop.permute.xlu1 %969  ;;  %v1581_v9 = vsel %vm1553_vm10, %v1548_v7, %v1302_v8 }
 0x176   : > { %2452 = vmatmul.mubr.msk.bf16.gmra.mrb[8].mxu1 %vm1606_vm11, %v1581_v9  ;;  %v1354_v20 = vsel %vm411_vm0, %v2951_v23, %v970_v6 }
 0x178   : > { %v1016_v12 = vpop.permute.xlu0 %1015 }
 0x179   : > { %v1018_v10 = vpop.permute.xlu1 %1017  ;;  %v1385_v46 = vsel %vm1355_vm4, %v1351_v19, %v1016_v12 }
 0x17a   : > { %v1387_v22 = vsel %vm1355_vm4, %v1354_v20, %v1018_v10 }
 0x17c   : > { %v1064_v13 = vpop.permute.xlu0 %1063 }
 0x17d   : > { %v1066_v29 = vpop.permute.xlu1 %1065  ;;  %v1418_v56 = vsel %vm1388_vm5, %v1385_v46, %v1064_v13 }
 0x17e   : > { %v1420_v25 = vsel %vm1388_vm5, %v1387_v22, %v1066_v29 }
 0x180   : > { %v1112_v15 = vpop.permute.xlu0 %1111 }
 0x181   : > { %v1114_v21 = vpop.permute.xlu1 %1113  ;;  %v1451_v28 = vsel %vm1421_vm6, %v1418_v56, %v1112_v15 }
 0x182   : > { %v1453_v27 = vsel %vm1421_vm6, %v1420_v25, %v1114_v21 }
 0x184   : > { %v1160_v17 = vpop.permute.xlu0 %1159 }
 0x185   : > { %v1162_v16 = vpop.permute.xlu1 %1161  ;;  %v1484_v35 = vsel %vm1454_vm7, %v1451_v28, %v1160_v17 }
 0x186   : > { %v1486_v57 = vsel %vm1454_vm7, %v1453_v27, %v1162_v16 }
 0x188   : > { %v1208_v31 = vpop.permute.xlu0 %1207 }
 0x189   : > { %v1210_v18 = vpop.permute.xlu1 %1209  ;;  %v2429_v24 = vpop.f32.mrb[0].mxu0  ;;  %v1517_v39 = vsel %vm1487_vm8, %v1484_v35, %v1208_v31 }
 0x18a   : > { %v2293_v26 = vpack.c.bf16 %v2429_v24, %v2429_v24  ;;  %v1677_v23 = vpop.f32.mrb[1].mxu0  ;;  %v1519_v38 = vsel %vm1487_vm8, %v1486_v57, %v1210_v18  ;;  %v2036_v40 = vmul.f32 %v2429_v24, %v2429_v24  ;;  %v1968_v44 = vsel %vm411_vm0, %v2429_v24, 0.0 }
 0x18b   : > { %v2291_v11 = vpack.c.bf16 %v1677_v23, %v1677_v23  ;;  %v2430_v30 = vpop.f32.mrb[2].mxu0  ;;  %v2034_v34 = vmul.f32 %v1677_v23, %v1677_v23  ;;  %v1965_v41 = vsel %vm411_vm0, %v1677_v23, 0.0 }
 0x18c   : > { %1935 = vst.msk [vmem:[%s3072_s22 + $0x8] sm:$0xf] %vm1932_vm12, %v2293_v26  ;;  %v2294_v14 = vpack.c.bf16 %v2430_v30, %v2430_v30  ;;  %v1256_v36 = vpop.permute.xlu0 %1255  ;;  %v1680_v37 = vpop.f32.mrb[3].mxu0  ;;  %v2037_v45 = vmul.f32 %v2430_v30, %v2430_v30  ;;  %v2069_v60 = vsel %vm411_vm0, %v2036_v40, 0.0  ;;  %v1970_v61 = vsel %vm411_vm0, %v2430_v30, 0.0 }
 0x18d   : > { %v1258_v32 = vpop.permute.xlu1 %1257  ;;  %1933 = vst.msk [vmem:[%s3072_s22] sm:$0xf] %vm1932_vm12, %v2291_v11  ;;  %v2292_v1 = vpack.c.bf16 %v1680_v37, %v1680_v37  ;;  %v1966_v42 = vsel %vm411_vm0, %v1680_v37, 0.0  ;;  %v2035_v43 = vmul.f32 %v1680_v37, %v1680_v37  ;;  %v2066_v50 = vsel %vm411_vm0, %v2034_v34, 0.0 }
 0x18e   : > { %1936 = vst.msk [vmem:[%s3072_s22 + $0xc] sm:$0xf] %vm1932_vm12, %v2294_v14  ;;  %v1552_v47 = vsel %vm1520_vm9, %v1519_v38, %v1258_v32  ;;  %v1967_v48 = vadd.f32 %v1966_v42, %v1965_v41  ;;  %v1550_v51 = vsel %vm1520_vm9, %v1517_v39, %v1256_v36  ;;  %v2071_v63 = vsel %vm411_vm0, %v2037_v45, 0.0 }
 0x18f   : > { %1934 = vst.msk [vmem:[%s3072_s22 + $0x4] sm:$0xf] %vm1932_vm12, %v2292_v1  ;;  %v2067_v52 = vsel %vm411_vm0, %v2035_v43, 0.0 }
 0x190   : > { %v1304_v54 = vpop.permute.xlu0 %1303  ;;  %v1969_v55 = vadd.f32 %v1968_v44, %v1967_v48  ;;  %v2068_v58 = vadd.f32 %v2067_v52, %v2066_v50 }
 0x191   : > { %v1306_v49 = vpop.permute.xlu1 %1305  ;;  %v1583_v59 = vsel %vm1553_vm10, %v1550_v51, %v1304_v54 }
 0x192   : > { %v1585_v53 = vsel %vm1553_vm10, %v1552_v47, %v1306_v49  ;;  %2455 = vmatprep.mubr.msk.bf16.mxu1 %vm1606_vm11, %v1583_v59  ;;  %v2070_v62 = vadd.f32 %v2069_v60, %v2068_v58  ;;  %v1971_v2 = vadd.f32 %v1970_v61, %v1969_v55 }
 0x193   : > { %2456 = vmatmul.mubr.msk.bf16.gmra.mrb[12].mxu1 %vm1606_vm11, %v1585_v53 }
 0x194   : > { %v2072_v0 = vadd.f32 %v2071_v63, %v2070_v62 }
 0x1a9   : > { %v2433_v3 = vpop.f32.mrb[4].mxu0 }
 0x1aa   : > { %v2297_v5 = vpack.c.bf16 %v2433_v3, %v2433_v3  ;;  %v1693_v4 = vpop.f32.mrb[5].mxu0  ;;  %v2040_v15 = vmul.f32 %v2433_v3, %v2433_v3  ;;  %v1976_v19 = vsel %vm411_vm0, %v2433_v3, 0.0 }
 0x1ab   : > { %v2295_v33 = vpack.c.bf16 %v1693_v4, %v1693_v4  ;;  %v1972_v6 = vsel %vm411_vm0, %v1693_v4, 0.0  ;;  %v2038_v7 = vmul.f32 %v1693_v4, %v1693_v4  ;;  %v2434_v8 = vpop.f32.mrb[6].mxu0 }
 0x1ac   : > { %1939 = vst.msk [vmem:[%s3072_s22 + $0x18] sm:$0xf] %vm1932_vm12, %v2297_v5  ;;  %v1973_v9 = vadd.f32 %v1972_v6, %v1971_v2  ;;  %v2298_v10 = vpack.c.bf16 %v2434_v8, %v2434_v8  ;;  %v1696_v12 = vpop.f32.mrb[7].mxu0  ;;  %v2041_v20 = vmul.f32 %v2434_v8, %v2434_v8  ;;  %v1978_v46 = vsel %vm411_vm0, %v2434_v8, 0.0 }
 0x1ad   : > { %1937 = vst.msk [vmem:[%s3072_s22 + $0x10] sm:$0xf] %vm1932_vm12, %v2295_v33  ;;  %v2073_v29 = vsel %vm411_vm0, %v2038_v7, 0.0  ;;  %v2296_v13 = vpack.c.bf16 %v1696_v12, %v1696_v12  ;;  %v1974_v21 = vsel %vm411_vm0, %v1696_v12, 0.0  ;;  %v2039_v18 = vmul.f32 %v1696_v12, %v1696_v12 }
 0x1ae   : > { %v2074_v16 = vadd.f32 %v2073_v29, %v2072_v0  ;;  %1940 = vst.msk [vmem:[%s3072_s22 + $0x1c] sm:$0xf] %vm1932_vm12, %v2298_v10  ;;  %v1975_v17 = vadd.f32 %v1974_v21, %v1973_v9  ;;  %v2077_v25 = vsel %vm411_vm0, %v2040_v15, 0.0  ;;  %v2079_v23 = vsel %vm411_vm0, %v2041_v20, 0.0 }
 0x1af   : > { %1938 = vst.msk [vmem:[%s3072_s22 + $0x14] sm:$0xf] %vm1932_vm12, %v2296_v13  ;;  %v2075_v22 = vsel %vm411_vm0, %v2039_v18, 0.0 }
 0x1b0   : > { %v1977_v31 = vadd.f32 %v1976_v19, %v1975_v17  ;;  %v2076_v24 = vadd.f32 %v2075_v22, %v2074_v16 }
 0x1b2   : > { %v1979_v56 = vadd.f32 %v1978_v46, %v1977_v31  ;;  %v2078_v26 = vadd.f32 %v2077_v25, %v2076_v24 }
 0x1b4   : > { %v2080_v27 = vadd.f32 %v2079_v23, %v2078_v26 }
 0x1c9   : > { %v2437_v28 = vpop.f32.mrb[8].mxu0 }
 0x1ca   : > { %v2301_v11 = vpack.c.bf16 %v2437_v28, %v2437_v28  ;;  %v1709_v30 = vpop.f32.mrb[9].mxu0  ;;  %v2044_v40 = vmul.f32 %v2437_v28, %v2437_v28  ;;  %v1984_v44 = vsel %vm411_vm0, %v2437_v28, 0.0 }
 0x1cb   : > { %v2299_v32 = vpack.c.bf16 %v1709_v30, %v1709_v30  ;;  %v1980_v57 = vsel %vm411_vm0, %v1709_v30, 0.0  ;;  %v2042_v35 = vmul.f32 %v1709_v30, %v1709_v30  ;;  %v2438_v34 = vpop.f32.mrb[10].mxu0 }
 0x1cc   : > { %1943 = vst.msk [vmem:[%s3072_s22 + $0x28] sm:$0xf] %vm1932_vm12, %v2301_v11  ;;  %v1981_v14 = vadd.f32 %v1980_v57, %v1979_v56  ;;  %v2302_v36 = vpack.c.bf16 %v2438_v34, %v2438_v34  ;;  %v1712_v37 = vpop.f32.mrb[11].mxu0  ;;  %v2045_v45 = vmul.f32 %v2438_v34, %v2438_v34  ;;  %v1986_v49 = vsel %vm411_vm0, %v2438_v34, 0.0 }
 0x1cd   : > { %1941 = vst.msk [vmem:[%s3072_s22 + $0x20] sm:$0xf] %vm1932_vm12, %v2299_v32  ;;  %v2081_v38 = vsel %vm411_vm0, %v2042_v35, 0.0  ;;  %v2300_v39 = vpack.c.bf16 %v1712_v37, %v1712_v37  ;;  %v1982_v1 = vsel %vm411_vm0, %v1712_v37, 0.0  ;;  %v2043_v43 = vmul.f32 %v1712_v37, %v1712_v37 }
 0x1ce   : > { %v2082_v41 = vadd.f32 %v2081_v38, %v2080_v27  ;;  %1944 = vst.msk [vmem:[%s3072_s22 + $0x2c] sm:$0xf] %vm1932_vm12, %v2302_v36  ;;  %v1983_v42 = vadd.f32 %v1982_v1, %v1981_v14  ;;  %v2085_v51 = vsel %vm411_vm0, %v2044_v40, 0.0  ;;  %v2087_v54 = vsel %vm411_vm0, %v2045_v45, 0.0 }
 0x1cf   : > { %1942 = vst.msk [vmem:[%s3072_s22 + $0x24] sm:$0xf] %vm1932_vm12, %v2300_v39  ;;  %v2083_v48 = vsel %vm411_vm0, %v2043_v43, 0.0 }
 0x1d0   : > { %v1985_v47 = vadd.f32 %v1984_v44, %v1983_v42  ;;  %v2084_v50 = vadd.f32 %v2083_v48, %v2082_v41 }
 0x1d2   : > { %v1987_v52 = vadd.f32 %v1986_v49, %v1985_v47  ;;  %v2086_v53 = vadd.f32 %v2085_v51, %v2084_v50 }
 0x1d4   : > { %v2088_v55 = vadd.f32 %v2087_v54, %v2086_v53 }
 0x1e9   : > { %v2441_v58 = vpop.f32.mrb[12].mxu0 }
 0x1ea   : > { %v2305_v59 = vpack.c.bf16 %v2441_v58, %v2441_v58  ;;  %v1725_v60 = vpop.f32.mrb[13].mxu0  ;;  %v2048_v7 = vmul.f32 %v2441_v58, %v2441_v58  ;;  %v1992_v12 = vsel %vm411_vm0, %v2441_v58, 0.0 }
 0x1eb   : > { %v2303_v61 = vpack.c.bf16 %v1725_v60, %v1725_v60  ;;  %v1988_v62 = vsel %vm411_vm0, %v1725_v60, 0.0  ;;  %v2046_v2 = vmul.f32 %v1725_v60, %v1725_v60  ;;  %v2442_v63 = vpop.f32.mrb[14].mxu0 }
 0x1ec   : > { %1947 = vst.msk [vmem:[%s3072_s22 + $0x38] sm:$0xf] %vm1932_vm12, %v2305_v59  ;;  %v1989_v0 = vadd.f32 %v1988_v62, %v1987_v52  ;;  %v2306_v3 = vpack.c.bf16 %v2442_v63, %v2442_v63  ;;  %v1728_v5 = vpop.f32.mrb[15].mxu0  ;;  %v2049_v29 = vmul.f32 %v2442_v63, %v2442_v63  ;;  %v1994_v15 = vsel %vm411_vm0, %v2442_v63, 0.0 }
 0x1ed   : > { %1945 = vst.msk [vmem:[%s3072_s22 + $0x30] sm:$0xf] %vm1932_vm12, %v2303_v61  ;;  %v2089_v4 = vsel %vm411_vm0, %v2046_v2, 0.0  ;;  %v2304_v33 = vpack.c.bf16 %v1728_v5, %v1728_v5  ;;  %v1990_v6 = vsel %vm411_vm0, %v1728_v5, 0.0  ;;  %v2047_v10 = vmul.f32 %v1728_v5, %v1728_v5 }
 0x1ee   : > { %v2090_v8 = vadd.f32 %v2089_v4, %v2088_v55  ;;  %1948 = vst.msk [vmem:[%s3072_s22 + $0x3c] sm:$0xf] %vm1932_vm12, %v2306_v3  ;;  %v1991_v9 = vadd.f32 %v1990_v6, %v1989_v0  ;;  %v2093_v17 = vsel %vm411_vm0, %v2048_v7, 0.0  ;;  %v2095_v20 = vsel %vm411_vm0, %v2049_v29, 0.0 }
 0x1ef   : > { %1946 = vst.msk [vmem:[%s3072_s22 + $0x34] sm:$0xf] %vm1932_vm12, %v2304_v33  ;;  %v2091_v21 = vsel %vm411_vm0, %v2047_v10, 0.0 }
 0x1f0   : > { %v1993_v13 = vadd.f32 %v1992_v12, %v1991_v9  ;;  %v2092_v16 = vadd.f32 %v2091_v21, %v2090_v8 }
 0x1f2   : > { %v1995_v18 = vadd.f32 %v1994_v15, %v1993_v13  ;;  %v2094_v19 = vadd.f32 %v2093_v17, %v2092_v16 }
 0x1f4   : > { %v2096_v31 = vadd.f32 %v2095_v20, %v2094_v19 }
 0x209   : > { %v2445_v22 = vpop.f32.mrb[0].mxu1 }
 0x20a   : > { %v2309_v46 = vpack.c.bf16 %v2445_v22, %v2445_v22  ;;  %v1741_v24 = vpop.f32.mrb[1].mxu1  ;;  %v2052_v35 = vmul.f32 %v2445_v22, %v2445_v22  ;;  %v2000_v37 = vsel %vm411_vm0, %v2445_v22, 0.0 }
 0x20b   : > { %v2307_v25 = vpack.c.bf16 %v1741_v24, %v1741_v24  ;;  %v1996_v56 = vsel %vm411_vm0, %v1741_v24, 0.0  ;;  %v2050_v26 = vmul.f32 %v1741_v24, %v1741_v24  ;;  %v2446_v23 = vpop.f32.mrb[2].mxu1 }
 0x20c   : > { %1951 = vst.msk [vmem:[%s3072_s22 + $0x48] sm:$0xf] %vm1932_vm12, %v2309_v46  ;;  %v1997_v27 = vadd.f32 %v1996_v56, %v1995_v18  ;;  %v2310_v28 = vpack.c.bf16 %v2446_v23, %v2446_v23  ;;  %v1744_v11 = vpop.f32.mrb[3].mxu1  ;;  %v2053_v38 = vmul.f32 %v2446_v23, %v2446_v23  ;;  %v2002_v40 = vsel %vm411_vm0, %v2446_v23, 0.0 }
 0x20d   : > { %1949 = vst.msk [vmem:[%s3072_s22 + $0x40] sm:$0xf] %vm1932_vm12, %v2307_v25  ;;  %v2097_v30 = vsel %vm411_vm0, %v2050_v26, 0.0  ;;  %v2308_v32 = vpack.c.bf16 %v1744_v11, %v1744_v11  ;;  %v1998_v57 = vsel %vm411_vm0, %v1744_v11, 0.0  ;;  %v2051_v36 = vmul.f32 %v1744_v11, %v1744_v11 }
 0x20e   : > { %v2098_v34 = vadd.f32 %v2097_v30, %v2096_v31  ;;  %1952 = vst.msk [vmem:[%s3072_s22 + $0x4c] sm:$0xf] %vm1932_vm12, %v2310_v28  ;;  %v1999_v14 = vadd.f32 %v1998_v57, %v1997_v27  ;;  %v2101_v42 = vsel %vm411_vm0, %v2052_v35, 0.0  ;;  %v2103_v45 = vsel %vm411_vm0, %v2053_v38, 0.0 }
 0x20f   : > { %1950 = vst.msk [vmem:[%s3072_s22 + $0x44] sm:$0xf] %vm1932_vm12, %v2308_v32  ;;  %v2099_v1 = vsel %vm411_vm0, %v2051_v36, 0.0 }
 0x210   : > { %v2001_v39 = vadd.f32 %v2000_v37, %v1999_v14  ;;  %v2100_v41 = vadd.f32 %v2099_v1, %v2098_v34 }
 0x212   : > { %v2003_v43 = vadd.f32 %v2002_v40, %v2001_v39  ;;  %v2102_v44 = vadd.f32 %v2101_v42, %v2100_v41 }
 0x214   : > { %v2104_v47 = vadd.f32 %v2103_v45, %v2102_v44 }
 0x229   : > { %v2449_v48 = vpop.f32.mrb[4].mxu1 }
 0x22a   : > { %v2313_v49 = vpack.c.bf16 %v2449_v48, %v2449_v48  ;;  %v1757_v50 = vpop.f32.mrb[5].mxu1  ;;  %v2056_v2 = vmul.f32 %v2449_v48, %v2449_v48  ;;  %v2008_v5 = vsel %vm411_vm0, %v2449_v48, 0.0 }
 0x22b   : > { %v2311_v51 = vpack.c.bf16 %v1757_v50, %v1757_v50  ;;  %v2004_v52 = vsel %vm411_vm0, %v1757_v50, 0.0  ;;  %v2054_v53 = vmul.f32 %v1757_v50, %v1757_v50  ;;  %v2450_v54 = vpop.f32.mrb[6].mxu1 }
 0x22c   : > { %1955 = vst.msk [vmem:[%s3072_s22 + $0x58] sm:$0xf] %vm1932_vm12, %v2313_v49  ;;  %v2005_v55 = vadd.f32 %v2004_v52, %v2003_v43  ;;  %v2314_v58 = vpack.c.bf16 %v2450_v54, %v2450_v54  ;;  %v1760_v59 = vpop.f32.mrb[7].mxu1  ;;  %v2057_v4 = vmul.f32 %v2450_v54, %v2450_v54  ;;  %v2010_v7 = vsel %vm411_vm0, %v2450_v54, 0.0 }
 0x22d   : > { %1953 = vst.msk [vmem:[%s3072_s22 + $0x50] sm:$0xf] %vm1932_vm12, %v2311_v51  ;;  %v2105_v60 = vsel %vm411_vm0, %v2054_v53, 0.0  ;;  %v2312_v61 = vpack.c.bf16 %v1760_v59, %v1760_v59  ;;  %v2006_v62 = vsel %vm411_vm0, %v1760_v59, 0.0  ;;  %v2055_v3 = vmul.f32 %v1760_v59, %v1760_v59 }
 0x22e   : > { %v2106_v63 = vadd.f32 %v2105_v60, %v2104_v47  ;;  %1956 = vst.msk [vmem:[%s3072_s22 + $0x5c] sm:$0xf] %vm1932_vm12, %v2314_v58  ;;  %v2007_v0 = vadd.f32 %v2006_v62, %v2005_v55  ;;  %v2109_v9 = vsel %vm411_vm0, %v2056_v2, 0.0  ;;  %v2111_v29 = vsel %vm411_vm0, %v2057_v4, 0.0 }
 0x22f   : > { %1954 = vst.msk [vmem:[%s3072_s22 + $0x54] sm:$0xf] %vm1932_vm12, %v2312_v61  ;;  %v2107_v6 = vsel %vm411_vm0, %v2055_v3, 0.0 }
 0x230   : > { %v2009_v33 = vadd.f32 %v2008_v5, %v2007_v0  ;;  %v2108_v8 = vadd.f32 %v2107_v6, %v2106_v63 }
 0x232   : > { %v2011_v10 = vadd.f32 %v2010_v7, %v2009_v33  ;;  %v2110_v12 = vadd.f32 %v2109_v9, %v2108_v8 }
 0x234   : > { %v2112_v13 = vadd.f32 %v2111_v29, %v2110_v12 }
 0x249   : > { %v2453_v21 = vpop.f32.mrb[8].mxu1 }
 0x24a   : > { %v2317_v15 = vpack.c.bf16 %v2453_v21, %v2453_v21  ;;  %v1773_v16 = vpop.f32.mrb[9].mxu1  ;;  %v2060_v26 = vmul.f32 %v2453_v21, %v2453_v21  ;;  %v2016_v11 = vsel %vm411_vm0, %v2453_v21, 0.0 }
 0x24b   : > { %v2315_v17 = vpack.c.bf16 %v1773_v16, %v1773_v16  ;;  %v2012_v18 = vsel %vm411_vm0, %v1773_v16, 0.0  ;;  %v2058_v19 = vmul.f32 %v1773_v16, %v1773_v16  ;;  %v2454_v20 = vpop.f32.mrb[10].mxu1 }
 0x24c   : > { %1959 = vst.msk [vmem:[%s3072_s22 + $0x68] sm:$0xf] %vm1932_vm12, %v2317_v15  ;;  %v2013_v31 = vadd.f32 %v2012_v18, %v2011_v10  ;;  %v2318_v22 = vpack.c.bf16 %v2454_v20, %v2454_v20  ;;  %v1776_v46 = vpop.f32.mrb[11].mxu1  ;;  %v2061_v30 = vmul.f32 %v2454_v20, %v2454_v20  ;;  %v2018_v35 = vsel %vm411_vm0, %v2454_v20, 0.0 }
 0x24d   : > { %1957 = vst.msk [vmem:[%s3072_s22 + $0x60] sm:$0xf] %vm1932_vm12, %v2315_v17  ;;  %v2113_v24 = vsel %vm411_vm0, %v2058_v19, 0.0  ;;  %v2316_v25 = vpack.c.bf16 %v1776_v46, %v1776_v46  ;;  %v2014_v56 = vsel %vm411_vm0, %v1776_v46, 0.0  ;;  %v2059_v28 = vmul.f32 %v1776_v46, %v1776_v46 }
 0x24e   : > { %v2114_v23 = vadd.f32 %v2113_v24, %v2112_v13  ;;  %1960 = vst.msk [vmem:[%s3072_s22 + $0x6c] sm:$0xf] %vm1932_vm12, %v2318_v22  ;;  %v2015_v27 = vadd.f32 %v2014_v56, %v2013_v31  ;;  %v2117_v14 = vsel %vm411_vm0, %v2060_v26, 0.0  ;;  %v2119_v38 = vsel %vm411_vm0, %v2061_v30, 0.0 }
 0x24f   : > { %1958 = vst.msk [vmem:[%s3072_s22 + $0x64] sm:$0xf] %vm1932_vm12, %v2316_v25  ;;  %v2115_v57 = vsel %vm411_vm0, %v2059_v28, 0.0 }
 0x250   : > { %v2017_v32 = vadd.f32 %v2016_v11, %v2015_v27  ;;  %v2116_v34 = vadd.f32 %v2115_v57, %v2114_v23 }
 0x252   : > { %v2019_v36 = vadd.f32 %v2018_v35, %v2017_v32  ;;  %v2118_v37 = vadd.f32 %v2117_v14, %v2116_v34 }
 0x254   : > { %v2120_v39 = vadd.f32 %v2119_v38, %v2118_v37 }
 0x266   : > { %v2457_v1 = vpop.f32.mrb[12].mxu1 }
 0x267   : > { %v2321_v40 = vpack.c.bf16 %v2457_v1, %v2457_v1  ;;  %v1789_v41 = vpop.f32.mrb[13].mxu1  ;;  %v2064_v53 = vmul.f32 %v2457_v1, %v2457_v1  ;;  %v2024_v59 = vsel %vm411_vm0, %v2457_v1, 0.0 }
 0x268   : > { %v2319_v42 = vpack.c.bf16 %v1789_v41, %v1789_v41  ;;  %v2020_v43 = vsel %vm411_vm0, %v1789_v41, 0.0  ;;  %v2062_v44 = vmul.f32 %v1789_v41, %v1789_v41  ;;  %v2458_v45 = vpop.f32.mrb[14].mxu1 }
 0x269   : > { %1963 = vst.msk [vmem:[%s3072_s22 + $0x78] sm:$0xf] %vm1932_vm12, %v2321_v40  ;;  %v2021_v47 = vadd.f32 %v2020_v43, %v2019_v36  ;;  %v2322_v48 = vpack.c.bf16 %v2458_v45, %v2458_v45  ;;  %v1792_v49 = vpop.f32.mrb[15].mxu1  ;;  %v2065_v60 = vmul.f32 %v2458_v45, %v2458_v45  ;;  %v2026_v2 = vsel %vm411_vm0, %v2458_v45, 0.0 }
 0x26a   : > { %1961 = vst.msk [vmem:[%s3072_s22 + $0x70] sm:$0xf] %vm1932_vm12, %v2319_v42  ;;  %v2121_v50 = vsel %vm411_vm0, %v2062_v44, 0.0  ;;  %v2320_v51 = vpack.c.bf16 %v1792_v49, %v1792_v49  ;;  %v2022_v52 = vsel %vm411_vm0, %v1792_v49, 0.0  ;;  %v2063_v58 = vmul.f32 %v1792_v49, %v1792_v49 }
 0x26b   : > { %v2122_v54 = vadd.f32 %v2121_v50, %v2120_v39  ;;  %1964 = vst.msk [vmem:[%s3072_s22 + $0x7c] sm:$0xf] %vm1932_vm12, %v2322_v48  ;;  %v2023_v55 = vadd.f32 %v2022_v52, %v2021_v47  ;;  %v2125_v0 = vsel %vm411_vm0, %v2064_v53, 0.0  ;;  %v2127_v4 = vsel %vm411_vm0, %v2065_v60, 0.0 }
 0x26c   : > { %1962 = vst.msk [vmem:[%s3072_s22 + $0x74] sm:$0xf] %vm1932_vm12, %v2320_v51  ;;  %v2123_v62 = vsel %vm411_vm0, %v2063_v58, 0.0 }
 0x26d   : > { %v2025_v61 = vadd.f32 %v2024_v59, %v2023_v55  ;;  %v2124_v63 = vadd.f32 %v2123_v62, %v2122_v54 }
 0x26f   : > { %v2027_v3 = vadd.f32 %v2026_v2, %v2025_v61  ;;  %v2126_v5 = vadd.f32 %v2125_v0, %v2124_v63 }
 0x271   : > { %v2028_v33 = vrot.slane %v2027_v3, 4  ;;  %v2128_v6 = vadd.f32 %v2127_v4, %v2126_v5 }
 0x273   : > { %v2029_v7 = vadd.f32 %v2028_v33, %v2027_v3  ;;  %v2129_v8 = vrot.slane %v2128_v6, 4 }
 0x275   : > { %v2030_v9 = vrot.slane %v2029_v7, 2  ;;  %v2130_v10 = vadd.f32 %v2129_v8, %v2128_v6 }
 0x277   : > { %v2031_v12 = vadd.f32 %v2030_v9, %v2029_v7  ;;  %v2131_v29 = vrot.slane %v2130_v10, 2 }
 0x279   : > { %v2032_v13 = vrot.slane %v2031_v12, 1  ;;  %v2132_v21 = vadd.f32 %v2131_v29, %v2130_v10 }
 0x27b   : > { %v2133_v15 = vrot.slane %v2132_v21, 1  ;;  %v2033_v16 = vadd.f32 %v2032_v13, %v2031_v12 }
 0x27d   : > { %v2134_v17 = vadd.f32 %v2133_v15, %v2132_v21 }
 0x27f   : > { %v2136_v18 = vsel %vm2135_vm13, %v2033_v16, %v2134_v17 }
 0x280   : > { %2137 = vst.msk [vmem:[%s235_s25] sm:$0x3] %vm414_vm1, %v2136_v18 }
 0x281 PF: > { %s16_s18 = sadd.s32 1, %s2493_s18  }
 0x282   : > { %p13_p4 = scmp.ge.s32.totalorder %s16_s18, 4  }
 0x284   :  { %15 = sbr.rel (!%p13_p4) target bundleno = 1 (0x1), region = 81 }

</bundles_post_ra>
